<compile_context>
chip_gen: v5e
topology: v5e:2x2
jax: 0.10.0
libtpu: 0.0.40
codegen_flags: <defaults>
</compile_context>

<pallas_src>
import jax
import jax.numpy as jnp
from jax.experimental import pallas as pl
from jax.experimental.pallas import tpu as pltpu

LANE = 128
SUBLANE = 8

# Static layer configuration (never passed through jit).
_CONV_CFGS = (
    dict(cin=17, cout=13, ksize=(1, 6), stride=(1, 2), output_padding=(0, 0)),
    dict(cin=13, cout=9,  ksize=(1, 7), stride=(1, 1), output_padding=(0, 0)),
    dict(cin=9,  cout=11, ksize=(5, 7), stride=(3, 4), output_padding=(2, 3)),
)


def _round_up(x, m):
    return ((x + m - 1) // m) * m


def _choose_tile_m(M):
    """Pick a big, sublane-aligned M tile; keep >=2 grid steps when possible."""
    if M <= 2 * SUBLANE:
        return _round_up(M, SUBLANE)
    if M <= 1024:
        # Exactly two grid steps (megacore on v7x), each as large as possible.
        return _round_up(pl.cdiv(M, 2), SUBLANE)
    # Large M: ~512-row tiles; prefer an even divisor to avoid a wasted
    # ragged tail tile.
    for t in range(768, 255, -SUBLANE):
        if M % t == 0:
            return t
    return 512


# ----------------------------- Pallas kernel -------------------------------
def _gemm_bias_sigmoid_kernel(p_ref, w_ref, b_ref, o_ref):
    # p_ref: (tile_m, K_pad)   w_ref: (K_pad, N_pad)   b_ref: (1, N_pad)
    # o_ref: (tile_m, N_pad)   with K_pad, N_pad multiples of 128.
    acc = jnp.dot(p_ref[...], w_ref[...], preferred_element_type=jnp.float32)
    o_ref[...] = jax.nn.sigmoid(acc + b_ref[...])


def _fused_gemm_bias_sigmoid(patches, wmat, bias2d):
    """sigmoid(patches @ wmat + bias) with lane-dense, aligned tiles."""
    M, K_pad = patches.shape
    K_w, N_pad = wmat.shape
    assert K_pad == K_w and K_pad % LANE == 0 and N_pad % LANE == 0
    tile_m = _choose_tile_m(M)
    grid = (pl.cdiv(M, tile_m),)

    return pl.pallas_call(
        _gemm_bias_sigmoid_kernel,
        out_shape=jax.ShapeDtypeStruct((M, N_pad), jnp.float32),
        grid=grid,
        in_specs=[
            pl.BlockSpec((tile_m, K_pad), lambda i: (i, 0)),
            pl.BlockSpec((K_pad, N_pad), lambda i: (0, 0)),
            pl.BlockSpec((1, N_pad), lambda i: (0, 0)),
        ],
        out_specs=pl.BlockSpec((tile_m, N_pad), lambda i: (i, 0)),
        compiler_params=pltpu.CompilerParams(
            dimension_semantics=("parallel",)),
    )(patches, wmat, bias2d)


# --------------------- transposed conv (PyTorch semantics) -----------------
def conv_transpose2d_sigmoid(x_nhwc, wmat, bias2d, cfg):
    """sigmoid(conv_transpose2d(x, w) + bias), padding=0, dilation=1.

    x_nhwc: (N, H, W, Cin) float32
    wmat:   (K_pad, N_pad) precomputed GEMM weight (flipped, transposed,
            reshaped, zero-padded); bias2d: (1, N_pad).
    """
    N, H, W, Cin = x_nhwc.shape
    KH, KW = cfg["ksize"]
    sh, sw = cfg["stride"]
    oph, opw = cfg["output_padding"]
    Cout = cfg["cout"]
    K = KH * KW * Cin
    K_pad, N_pad = wmat.shape

    Ho = (H - 1) * sh + KH + oph
    Wo = (W - 1) * sw + KW + opw

    # --- glue: zero-dilate by the stride and pad by (k-1, k-1+output_padding)
    Hd = (H - 1) * sh + 1
    Wd = (W - 1) * sw + 1
    xd = jnp.zeros((N, Hd, Wd, Cin), x_nhwc.dtype).at[:, ::sh, ::sw, :].set(x_nhwc)
    xp = jnp.pad(xd, ((0, 0),
                      (KH - 1, KH - 1 + oph),
                      (KW - 1, KW - 1 + opw),
                      (0, 0)))

    # --- glue: im2col -> (N*Ho*Wo, K), K zero-padded to K_pad in the same
    # producer fusion (no extra materialization).
    cols = [xp[:, kh:kh + Ho, kw:kw + Wo, :]
            for kh in range(KH) for kw in range(KW)]
    patches = jnp.stack(cols, axis=3).reshape(N * Ho * Wo, K)
    patches = jnp.pad(patches, ((0, 0), (0, K_pad - K)))
    # TODO(synk): pull im2col/zero-dilation into the kernel (sub-pixel GEMMs)
    # to avoid the KH*KW HBM inflation of `patches`.

    # --- hot path in Pallas: GEMM + bias + sigmoid (lane-dense output)
    out = _fused_gemm_bias_sigmoid(patches, wmat, bias2d)
    return out[:, :Cout].reshape(N, Ho, Wo, Cout)


# ------------------------------- the model ---------------------------------
def init_params(key):
    k1, k2, k3, kb = jax.random.split(key, 4)

    def winit(k, cin, cout, kh, kw):
        s = 1.0 / jnp.sqrt(jnp.float32(cin * kh * kw))
        return jax.random.uniform(k, (cin, cout, kh, kw), jnp.float32, -s, s)

    return {
        "w1": winit(k1, 17, 13, 1, 6),
        "b1": jax.random.uniform(kb, (13,), jnp.float32, -0.1, 0.1),
        "w2": winit(k2, 13, 9, 1, 7),
        "b2": jnp.zeros((9,), jnp.float32),
        "w3": winit(k3, 9, 11, 5, 7),
        "b3": jnp.zeros((11,), jnp.float32),
    }


def _prepare_layer(w, b):
    """Precompute the GEMM-ready, zero-padded weight matrix and bias (once)."""
    Cin, Cout, KH, KW = w.shape
    K = KH * KW * Cin
    K_pad = _round_up(K, LANE)
    N_pad = _round_up(Cout, LANE)
    # equivalent regular-conv weight: swap channel axes + flip spatially
    wm = jnp.transpose(w[:, :, ::-1, ::-1], (2, 3, 0, 1)).reshape(K, Cout)
    wm = jnp.pad(wm.astype(jnp.float32), ((0, K_pad - K), (0, N_pad - Cout)))
    bias = jnp.pad(b.astype(jnp.float32), (0, N_pad - Cout)).reshape(1, N_pad)
    return {"wmat": wm, "bias": bias}


def prepare_gemm_params(params):
    return (
        _prepare_layer(params["w1"], params["b1"]),
        _prepare_layer(params["w2"], params["b2"]),
        _prepare_layer(params["w3"], params["b3"]),
    )


def model_forward(gemm_params, x_nchw):
    x = jnp.transpose(x_nchw, (0, 2, 3, 1)).astype(jnp.float32)   # NCHW -> NHWC
    for layer, cfg in zip(gemm_params, _CONV_CFGS):
        x = conv_transpose2d_sigmoid(x, layer["wmat"], layer["bias"], cfg)
    return jnp.transpose(x, (0, 3, 1, 2))                         # NHWC -> NCHW


# -------------------------- pure-JAX reference ------------------------------
def _ref_layer(x_nhwc, w, bias, stride, output_padding):
    KH, KW = w.shape[2], w.shape[3]
    rhs = jnp.transpose(w[:, :, ::-1, ::-1], (2, 3, 0, 1))  # HWIO
    y = jax.lax.conv_general_dilated(
        x_nhwc, rhs, window_strides=(1, 1),
        padding=((KH - 1, KH - 1 + output_padding[0]),
                 (KW - 1, KW - 1 + output_padding[1])),
        lhs_dilation=stride,
        dimension_numbers=("NHWC", "HWIO", "NHWC"))
    return jax.nn.sigmoid(y + bias.reshape(1, 1, 1, -1))


def model_forward_ref(params, x_nchw):
    x = jnp.transpose(x_nchw, (0, 2, 3, 1)).astype(jnp.float32)
    x = _ref_layer(x, params["w1"], params["b1"], (1, 2), (0, 0))
    x = _ref_layer(x, params["w2"], params["b2"], (1, 1), (0, 0))
    x = _ref_layer(x, params["w3"], params["b3"], (3, 4), (2, 3))
    return jnp.transpose(x, (0, 3, 1, 2))


if __name__ == "__main__":
    key = jax.random.PRNGKey(0)
    kx, kp = jax.random.split(key)
    params = init_params(kp)
    gemm_params = prepare_gemm_params(params)   # weight prep done once, off the fwd path

    # small spatial size (original was (2, 17, 51, 53)); channel count must be 17
    x1 = jax.random.normal(kx, (2, 17, 8, 8), jnp.float32)

    fwd = jax.jit(model_forward)
    out = jax.block_until_ready(fwd(gemm_params, x1))

    ref = jax.block_until_ready(model_forward_ref(params, x1))

    assert out.shape == (2, 11, 28, 110), out.shape
    assert jnp.allclose(out, ref, atol=1e-4, rtol=1e-4), float(jnp.max(jnp.abs(out - ref)))

    print("KERNEL_OK")
</pallas_src>

<mosaic_0001>
module attributes {stable_mosaic.version = 11 : i64} {
  func.func @_gemm_bias_sigmoid_kernel(%arg0: i32, %arg1: memref<160x128xf32, #tpu.memory_space<vmem>>, %arg2: memref<128x128xf32, #tpu.memory_space<vmem>>, %arg3: memref<1x128xf32, #tpu.memory_space<vmem>>, %arg4: memref<160x128xf32, #tpu.memory_space<vmem>>) attributes {dimension_semantics = [#tpu.dimension_semantics<parallel>], iteration_bounds = array<i64: 2>, scalar_prefetch = 0 : i64, scratch_operands = 0 : i64, tpu.core_type = #tpu.core_type<tc>, window_params = [{transform_indices = @transform_0, window_bounds = array<i64: 160, 128>}, {pipeline_mode = #tpu.pipeline_mode<synchronous>, transform_indices = @transform_1, window_bounds = array<i64: 128, 128>}, {pipeline_mode = #tpu.pipeline_mode<synchronous>, transform_indices = @transform_2, window_bounds = array<i64: 1, 128>}, {transform_indices = @transform_3, window_bounds = array<i64: 160, 128>}]} {
    %c0 = arith.constant 0 : index
    %c0_0 = arith.constant 0 : index
    %0 = vector.load %arg1[%c0, %c0_0] : memref<160x128xf32, #tpu.memory_space<vmem>>, vector<160x128xf32>
    %c0_1 = arith.constant 0 : index
    %c0_2 = arith.constant 0 : index
    %1 = vector.load %arg2[%c0_1, %c0_2] : memref<128x128xf32, #tpu.memory_space<vmem>>, vector<128x128xf32>
    %cst = arith.constant dense<0.000000e+00> : vector<160x128xf32>
    %2 = tpu.matmul %0, %1, %cst {dimension_numbers = #tpu.dot_dimension_numbers<[1], [0], [0], [1], [0, 0, 1, 1], [], []>} : vector<160x128xf32>, vector<128x128xf32>, vector<160x128xf32> -> vector<160x128xf32>
    %c0_3 = arith.constant 0 : index
    %c0_4 = arith.constant 0 : index
    %3 = vector.load %arg3[%c0_3, %c0_4] : memref<1x128xf32, #tpu.memory_space<vmem>>, vector<1x128xf32>
    %4 = vector.broadcast %3 : vector<1x128xf32> to vector<160x128xf32>
    %5 = arith.addf %2, %4 : vector<160x128xf32>
    %6 = arith.negf %5 : vector<160x128xf32>
    %7 = math.exp %6 : vector<160x128xf32>
    %cst_5 = arith.constant 1.000000e+00 : f32
    %8 = vector.broadcast %cst_5 : f32 to vector<160x128xf32>
    %9 = arith.addf %8, %7 : vector<160x128xf32>
    %10 = arith.divf %8, %9 : vector<160x128xf32>
    %c0_6 = arith.constant 0 : index
    %c0_7 = arith.constant 0 : index
    %11 = vector.load %arg4[%c0_6, %c0_7] : memref<160x128xf32, #tpu.memory_space<vmem>>, vector<160x128xf32>
    tpu.vector_store %arg4[%c0_6, %c0_7], %10 {strides = array<i32>} : memref<160x128xf32, #tpu.memory_space<vmem>>, vector<160x128xf32>,
    return
  }
  func.func @transform_0(%arg0: i32) -> (i32, i32) {
    %c0_i32 = arith.constant 0 : i32
    %c0_i32_0 = arith.constant 0 : i32
    return %arg0, %c0_i32 : i32, i32
  }
  func.func @transform_1(%arg0: i32) -> (i32, i32) {
    %c0_i32 = arith.constant 0 : i32
    %c0_i32_0 = arith.constant 0 : i32
    %c0_i32_1 = arith.constant 0 : i32
    return %c0_i32, %c0_i32_0 : i32, i32
  }
  func.func @transform_2(%arg0: i32) -> (i32, i32) {
    %c0_i32 = arith.constant 0 : i32
    %c0_i32_0 = arith.constant 0 : i32
    %c0_i32_1 = arith.constant 0 : i32
    return %c0_i32, %c0_i32_0 : i32, i32
  }
  func.func @transform_3(%arg0: i32) -> (i32, i32) {
    %c0_i32 = arith.constant 0 : i32
    %c0_i32_0 = arith.constant 0 : i32
    return %arg0, %c0_i32 : i32, i32
  }
}

module attributes {stable_mosaic.version = 11 : i64} {
  func.func @_gemm_bias_sigmoid_kernel(%arg0: i32, %arg1: memref<208x128xf32, #tpu.memory_space<vmem>>, %arg2: memref<128x128xf32, #tpu.memory_space<vmem>>, %arg3: memref<1x128xf32, #tpu.memory_space<vmem>>, %arg4: memref<208x128xf32, #tpu.memory_space<vmem>>) attributes {dimension_semantics = [#tpu.dimension_semantics<parallel>], iteration_bounds = array<i64: 2>, scalar_prefetch = 0 : i64, scratch_operands = 0 : i64, tpu.core_type = #tpu.core_type<tc>, window_params = [{transform_indices = @transform_0, window_bounds = array<i64: 208, 128>}, {pipeline_mode = #tpu.pipeline_mode<synchronous>, transform_indices = @transform_1, window_bounds = array<i64: 128, 128>}, {pipeline_mode = #tpu.pipeline_mode<synchronous>, transform_indices = @transform_2, window_bounds = array<i64: 1, 128>}, {transform_indices = @transform_3, window_bounds = array<i64: 208, 128>}]} {
    %c0 = arith.constant 0 : index
    %c0_0 = arith.constant 0 : index
    %0 = vector.load %arg1[%c0, %c0_0] : memref<208x128xf32, #tpu.memory_space<vmem>>, vector<208x128xf32>
    %c0_1 = arith.constant 0 : index
    %c0_2 = arith.constant 0 : index
    %1 = vector.load %arg2[%c0_1, %c0_2] : memref<128x128xf32, #tpu.memory_space<vmem>>, vector<128x128xf32>
    %cst = arith.constant dense<0.000000e+00> : vector<208x128xf32>
    %2 = tpu.matmul %0, %1, %cst {dimension_numbers = #tpu.dot_dimension_numbers<[1], [0], [0], [1], [0, 0, 1, 1], [], []>} : vector<208x128xf32>, vector<128x128xf32>, vector<208x128xf32> -> vector<208x128xf32>
    %c0_3 = arith.constant 0 : index
    %c0_4 = arith.constant 0 : index
    %3 = vector.load %arg3[%c0_3, %c0_4] : memref<1x128xf32, #tpu.memory_space<vmem>>, vector<1x128xf32>
    %4 = vector.broadcast %3 : vector<1x128xf32> to vector<208x128xf32>
    %5 = arith.addf %2, %4 : vector<208x128xf32>
    %6 = arith.negf %5 : vector<208x128xf32>
    %7 = math.exp %6 : vector<208x128xf32>
    %cst_5 = arith.constant 1.000000e+00 : f32
    %8 = vector.broadcast %cst_5 : f32 to vector<208x128xf32>
    %9 = arith.addf %8, %7 : vector<208x128xf32>
    %10 = arith.divf %8, %9 : vector<208x128xf32>
    %c0_6 = arith.constant 0 : index
    %c0_7 = arith.constant 0 : index
    %11 = vector.load %arg4[%c0_6, %c0_7] : memref<208x128xf32, #tpu.memory_space<vmem>>, vector<208x128xf32>
    tpu.vector_store %arg4[%c0_6, %c0_7], %10 {strides = array<i32>} : memref<208x128xf32, #tpu.memory_space<vmem>>, vector<208x128xf32>,
    return
  }
  func.func @transform_0(%arg0: i32) -> (i32, i32) {
    %c0_i32 = arith.constant 0 : i32
    %c0_i32_0 = arith.constant 0 : i32
    return %arg0, %c0_i32 : i32, i32
  }
  func.func @transform_1(%arg0: i32) -> (i32, i32) {
    %c0_i32 = arith.constant 0 : i32
    %c0_i32_0 = arith.constant 0 : i32
    %c0_i32_1 = arith.constant 0 : i32
    return %c0_i32, %c0_i32_0 : i32, i32
  }
  func.func @transform_2(%arg0: i32) -> (i32, i32) {
    %c0_i32 = arith.constant 0 : i32
    %c0_i32_0 = arith.constant 0 : i32
    %c0_i32_1 = arith.constant 0 : i32
    return %c0_i32, %c0_i32_0 : i32, i32
  }
  func.func @transform_3(%arg0: i32) -> (i32, i32) {
    %c0_i32 = arith.constant 0 : i32
    %c0_i32_0 = arith.constant 0 : i32
    return %arg0, %c0_i32 : i32, i32
  }
}

module attributes {stable_mosaic.version = 11 : i64} {
  func.func @_gemm_bias_sigmoid_kernel(%arg0: i32, %arg1: memref<616x384xf32, #tpu.memory_space<vmem>>, %arg2: memref<384x128xf32, #tpu.memory_space<vmem>>, %arg3: memref<1x128xf32, #tpu.memory_space<vmem>>, %arg4: memref<616x128xf32, #tpu.memory_space<vmem>>) attributes {dimension_semantics = [#tpu.dimension_semantics<parallel>], iteration_bounds = array<i64: 10>, scalar_prefetch = 0 : i64, scratch_operands = 0 : i64, tpu.core_type = #tpu.core_type<tc>, window_params = [{transform_indices = @transform_0, window_bounds = array<i64: 616, 384>}, {pipeline_mode = #tpu.pipeline_mode<synchronous>, transform_indices = @transform_1, window_bounds = array<i64: 384, 128>}, {pipeline_mode = #tpu.pipeline_mode<synchronous>, transform_indices = @transform_2, window_bounds = array<i64: 1, 128>}, {transform_indices = @transform_3, window_bounds = array<i64: 616, 128>}]} {
    %c0 = arith.constant 0 : index
    %c0_0 = arith.constant 0 : index
    %0 = vector.load %arg1[%c0, %c0_0] : memref<616x384xf32, #tpu.memory_space<vmem>>, vector<616x384xf32>
    %c0_1 = arith.constant 0 : index
    %c0_2 = arith.constant 0 : index
    %1 = vector.load %arg2[%c0_1, %c0_2] : memref<384x128xf32, #tpu.memory_space<vmem>>, vector<384x128xf32>
    %cst = arith.constant dense<0.000000e+00> : vector<616x128xf32>
    %2 = tpu.matmul %0, %1, %cst {dimension_numbers = #tpu.dot_dimension_numbers<[1], [0], [0], [1], [0, 0, 1, 1], [], []>} : vector<616x384xf32>, vector<384x128xf32>, vector<616x128xf32> -> vector<616x128xf32>
    %c0_3 = arith.constant 0 : index
    %c0_4 = arith.constant 0 : index
    %3 = vector.load %arg3[%c0_3, %c0_4] : memref<1x128xf32, #tpu.memory_space<vmem>>, vector<1x128xf32>
    %4 = vector.broadcast %3 : vector<1x128xf32> to vector<616x128xf32>
    %5 = arith.addf %2, %4 : vector<616x128xf32>
    %6 = arith.negf %5 : vector<616x128xf32>
    %7 = math.exp %6 : vector<616x128xf32>
    %cst_5 = arith.constant 1.000000e+00 : f32
    %8 = vector.broadcast %cst_5 : f32 to vector<616x128xf32>
    %9 = arith.addf %8, %7 : vector<616x128xf32>
    %10 = arith.divf %8, %9 : vector<616x128xf32>
    %c0_6 = arith.constant 0 : index
    %c0_7 = arith.constant 0 : index
    %11 = vector.load %arg4[%c0_6, %c0_7] : memref<616x128xf32, #tpu.memory_space<vmem>>, vector<616x128xf32>
    tpu.vector_store %arg4[%c0_6, %c0_7], %10 {strides = array<i32>} : memref<616x128xf32, #tpu.memory_space<vmem>>, vector<616x128xf32>,
    return
  }
  func.func @transform_0(%arg0: i32) -> (i32, i32) {
    %c0_i32 = arith.constant 0 : i32
    %c0_i32_0 = arith.constant 0 : i32
    return %arg0, %c0_i32 : i32, i32
  }
  func.func @transform_1(%arg0: i32) -> (i32, i32) {
    %c0_i32 = arith.constant 0 : i32
    %c0_i32_0 = arith.constant 0 : i32
    %c0_i32_1 = arith.constant 0 : i32
    return %c0_i32, %c0_i32_0 : i32, i32
  }
  func.func @transform_2(%arg0: i32) -> (i32, i32) {
    %c0_i32 = arith.constant 0 : i32
    %c0_i32_0 = arith.constant 0 : i32
    %c0_i32_1 = arith.constant 0 : i32
    return %c0_i32, %c0_i32_0 : i32, i32
  }
  func.func @transform_3(%arg0: i32) -> (i32, i32) {
    %c0_i32 = arith.constant 0 : i32
    %c0_i32_0 = arith.constant 0 : i32
    return %arg0, %c0_i32 : i32, i32
  }
}

</mosaic_0001>

<bundles_post_ra>
// kernel: model_forward.3
= control target key start
LH: loop header
LB: loop body
LE: loop exit
PB: predicated region body
PF: predicated region fallthrough
CT: control target
= control target key end

     0   :  { %s941_s12 = smov 0   ;;  %s1316_s0 = inlined_call_operand.vmem [shape: f32[320,128], index: 0, kind: input, shape index: {}]   ;;  %s1317_s1 = inlined_call_operand.vmem [shape: f32[128,128], index: 1, kind: input, shape index: {}]   ;;  %s1318_s2 = inlined_call_operand.vmem [shape: f32[1,128], index: 2, kind: input, shape index: {}]   ;;  %s1319_s3 = inlined_call_operand.vmem [shape: f32[320,128], index: 3, kind: output, shape index: {}]  }
   0x1 LB: > { %s747_s13 = sadd.s32 4294967295, %s919_s12   ;;  %p751_p0 = scmp.ge.s32.totalorder %s919_s12, 1  ;;  %s919_s12 = sphi %s941_s12, %s13_s12  }
   0x2   : > { %p138_p1 = scmp.lt.s32.totalorder %s919_s12, 3 }
   0x4   : > { %p139_p2 = pnand %p751_p0, %p138_p1 }
   0x5   : > { %s162_s30 = smul.u32 (!%p139_p2), 20, %s747_s13 }
   0x6   : > { %142 = sbr.rel (%p139_p2) target bundleno = 276 (0x114), region = 32 }
   0x7   : > { %p163_p3 = scmp.lt.s32.totalorder (!%p139_p2), %s162_s30, 39 }
   0xb   : > { %v209_v0 = vld [vmem:[%s1317_s1 + $0x78] sm:$0xff]  ;;  %v208_v1 = vld [vmem:[%s1317_s1 + $0x70] sm:$0xff]  ;;  %v207_v2 = vld [vmem:[%s1317_s1 + $0x68] sm:$0xff]  ;;  %s1347_s30 = smov (!%p163_p3, %s162_s30), 39 }
   0xc   : > { %214 = vmatpush.msra.mxu0 %v209_v0  ;;  %776 = vmatpush.msra.mxu1 %v209_v0  ;;  %v206_v3 = vld [vmem:[%s1317_s1 + $0x60] sm:$0xff]  ;;  %v205_v4 = vld [vmem:[%s1317_s1 + $0x58] sm:$0xff]  ;;  %v204_v5 = vld [vmem:[%s1317_s1 + $0x50] sm:$0xff]  ;;  %s752_s17 = sshll.u32 %s1347_s30, 3 }
   0xd   : > { %777 = vmatpush.msra.mxu2 %v209_v0  ;;  %778 = vmatpush.msra.mxu3 %v209_v0  ;;  %v203_v6 = vld [vmem:[%s1317_s1 + $0x48] sm:$0xff]  ;;  %v202_v7 = vld [vmem:[%s1317_s1 + $0x40] sm:$0xff]  ;;  %v201_v8 = vld [vmem:[%s1317_s1 + $0x38] sm:$0xff]  ;;  %s1004_s22 = scalar_lea.vmem %s1316_s0, %s752_s17  ;;  %s1088_s29 = scalar_lea.vmem %s1319_s3, %s752_s17 }
   0xe   : > { %215 = vmatpush.msra.mxu0 %v208_v1  ;;  %779 = vmatpush.msra.mxu1 %v208_v1  ;;  %v200_v9 = vld [vmem:[%s1317_s1 + $0x30] sm:$0xff]  ;;  %v199_v10 = vld [vmem:[%s1317_s1 + $0x28] sm:$0xff]  ;;  %v198_v11 = vld [vmem:[%s1317_s1 + $0x20] sm:$0xff] }
   0xf   : > { %780 = vmatpush.msra.mxu2 %v208_v1  ;;  %781 = vmatpush.msra.mxu3 %v208_v1  ;;  %v197_v12 = vld [vmem:[%s1317_s1 + $0x18] sm:$0xff]  ;;  %v196_v13 = vld [vmem:[%s1317_s1 + $0x10] sm:$0xff]  ;;  %v195_v14 = vld [vmem:[%s1317_s1 + $0x8] sm:$0xff] }
  0x10   : > { %216 = vmatpush.msra.mxu0 %v207_v2  ;;  %782 = vmatpush.msra.mxu1 %v207_v2  ;;  %v194_v15 = vld [vmem:[%s1317_s1] sm:$0xff]  ;;  %v179_v17 = vld [vmem:[%s1004_s22 + $0x28] sm:$0xff]  ;;  %v184_v18 = vld [vmem:[%s1004_s22 + $0x50] sm:$0xff] }
  0x11   : > { %783 = vmatpush.msra.mxu2 %v207_v2  ;;  %784 = vmatpush.msra.mxu3 %v207_v2  ;;  %v174_v16 = vld [vmem:[%s1004_s22] sm:$0xff]  ;;  %v189_v19 = vld [vmem:[%s1004_s22 + $0x78] sm:$0xff]  ;;  %v175_v20 = vld [vmem:[%s1004_s22 + $0x8] sm:$0xff] }
  0x12   : > { %217 = vmatpush.msra.mxu0 %v206_v3  ;;  %785 = vmatpush.msra.mxu1 %v206_v3  ;;  %v180_v21 = vld [vmem:[%s1004_s22 + $0x30] sm:$0xff]  ;;  %v185_v22 = vld [vmem:[%s1004_s22 + $0x58] sm:$0xff]  ;;  %v190_v23 = vld [vmem:[%s1004_s22 + $0x80] sm:$0xff] }
  0x13   : > { %786 = vmatpush.msra.mxu2 %v206_v3  ;;  %787 = vmatpush.msra.mxu3 %v206_v3  ;;  %v176_v24 = vld [vmem:[%s1004_s22 + $0x10] sm:$0xff]  ;;  %v181_v25 = vld [vmem:[%s1004_s22 + $0x38] sm:$0xff]  ;;  %v186_v26 = vld [vmem:[%s1004_s22 + $0x60] sm:$0xff] }
  0x14   : > { %218 = vmatpush.msra.mxu0 %v205_v4  ;;  %788 = vmatpush.msra.mxu1 %v205_v4  ;;  %v191_v27 = vld [vmem:[%s1004_s22 + $0x88] sm:$0xff]  ;;  %v177_v28 = vld [vmem:[%s1004_s22 + $0x18] sm:$0xff]  ;;  %v182_v29 = vld [vmem:[%s1004_s22 + $0x40] sm:$0xff] }
  0x15   : > { %789 = vmatpush.msra.mxu2 %v205_v4  ;;  %790 = vmatpush.msra.mxu3 %v205_v4  ;;  %v187_v30 = vld [vmem:[%s1004_s22 + $0x68] sm:$0xff]  ;;  %v192_v31 = vld [vmem:[%s1004_s22 + $0x90] sm:$0xff]  ;;  %v178_v32 = vld [vmem:[%s1004_s22 + $0x20] sm:$0xff] }
  0x16   : > { %219 = vmatpush.msra.mxu0 %v204_v5  ;;  %791 = vmatpush.msra.mxu1 %v204_v5  ;;  %v183_v33 = vld [vmem:[%s1004_s22 + $0x48] sm:$0xff]  ;;  %v188_v34 = vld [vmem:[%s1004_s22 + $0x70] sm:$0xff]  ;;  %v193_v35 = vld [vmem:[%s1004_s22 + $0x98] sm:$0xff] }
  0x17   : > { %792 = vmatpush.msra.mxu2 %v204_v5  ;;  %793 = vmatpush.msra.mxu3 %v204_v5  ;;  %v1032_v36 = vld [vmem:[%s1318_s2] ss:$0 sm:$0xff] }
  0x18   : > { %220 = vmatpush.msra.mxu0 %v203_v6  ;;  %794 = vmatpush.msra.mxu1 %v203_v6 }
  0x19   : > { %795 = vmatpush.msra.mxu2 %v203_v6  ;;  %796 = vmatpush.msra.mxu3 %v203_v6 }
  0x1a   : > { %221 = vmatpush.msra.mxu0 %v202_v7  ;;  %797 = vmatpush.msra.mxu1 %v202_v7 }
  0x1b   : > { %798 = vmatpush.msra.mxu2 %v202_v7  ;;  %799 = vmatpush.msra.mxu3 %v202_v7 }
  0x1c   : > { %222 = vmatpush.msra.mxu0 %v201_v8  ;;  %800 = vmatpush.msra.mxu1 %v201_v8 }
  0x1d   : > { %801 = vmatpush.msra.mxu2 %v201_v8  ;;  %802 = vmatpush.msra.mxu3 %v201_v8 }
  0x1e   : > { %223 = vmatpush.msra.mxu0 %v200_v9  ;;  %803 = vmatpush.msra.mxu1 %v200_v9 }
  0x1f   : > { %804 = vmatpush.msra.mxu2 %v200_v9  ;;  %805 = vmatpush.msra.mxu3 %v200_v9 }
  0x20   : > { %224 = vmatpush.msra.mxu0 %v199_v10  ;;  %806 = vmatpush.msra.mxu1 %v199_v10 }
  0x21   : > { %807 = vmatpush.msra.mxu2 %v199_v10  ;;  %808 = vmatpush.msra.mxu3 %v199_v10 }
  0x22   : > { %225 = vmatpush.msra.mxu0 %v198_v11  ;;  %809 = vmatpush.msra.mxu1 %v198_v11 }
  0x23   : > { %810 = vmatpush.msra.mxu2 %v198_v11  ;;  %811 = vmatpush.msra.mxu3 %v198_v11 }
  0x24   : > { %226 = vmatpush.msra.mxu0 %v197_v12  ;;  %812 = vmatpush.msra.mxu1 %v197_v12 }
  0x25   : > { %813 = vmatpush.msra.mxu2 %v197_v12  ;;  %814 = vmatpush.msra.mxu3 %v197_v12 }
  0x26   : > { %227 = vmatpush.msra.mxu0 %v196_v13  ;;  %815 = vmatpush.msra.mxu1 %v196_v13 }
  0x27   : > { %816 = vmatpush.msra.mxu2 %v196_v13  ;;  %817 = vmatpush.msra.mxu3 %v196_v13 }
  0x28   : > { %228 = vmatpush.msra.mxu0 %v195_v14  ;;  %818 = vmatpush.msra.mxu1 %v195_v14 }
  0x29   : > { %819 = vmatpush.msra.mxu2 %v195_v14  ;;  %820 = vmatpush.msra.mxu3 %v195_v14 }
  0x2a   : > { %229 = vmatpush.msra.mxu0 %v194_v15  ;;  %821 = vmatpush.msra.mxu1 %v194_v15 }
  0x2b   : > { %822 = vmatpush.msra.mxu2 %v194_v15  ;;  %823 = vmatpush.msra.mxu3 %v194_v15 }
  0x2c   : > { %230 = vmatmul.f32.vlgmr.msra.gmra.mxu0 %v174_v16  ;;  %245 = vmatmul.f32.vlgmr.msra.gmra.mxu1 %v179_v17 }
  0x2d   : > { %260 = vmatmul.f32.vlgmr.msra.gmra.mxu2 %v184_v18  ;;  %275 = vmatmul.f32.vlgmr.msra.gmra.mxu3 %v189_v19 }
  0x34   : > { %233 = vmatmul.f32.gmra.mxu0 %v175_v20  ;;  %248 = vmatmul.f32.gmra.mxu1 %v180_v21 }
  0x35   : > { %263 = vmatmul.f32.gmra.mxu2 %v185_v22  ;;  %278 = vmatmul.f32.gmra.mxu3 %v190_v23 }
  0x3c   : > { %236 = vmatmul.f32.gmra.mxu0 %v176_v24  ;;  %251 = vmatmul.f32.gmra.mxu1 %v181_v25 }
  0x3d   : > { %266 = vmatmul.f32.gmra.mxu2 %v186_v26  ;;  %281 = vmatmul.f32.gmra.mxu3 %v191_v27 }
  0x44   : > { %239 = vmatmul.f32.gmra.mxu0 %v177_v28  ;;  %254 = vmatmul.f32.gmra.mxu1 %v182_v29 }
  0x45   : > { %269 = vmatmul.f32.gmra.mxu2 %v187_v30  ;;  %284 = vmatmul.f32.gmra.mxu3 %v192_v31 }
  0x4c   : > { %242 = vmatmul.f32.gmra.mxu0 %v178_v32  ;;  %257 = vmatmul.f32.gmra.mxu1 %v183_v33 }
  0x4d   : > { %272 = vmatmul.f32.gmra.mxu2 %v188_v34  ;;  %287 = vmatmul.f32.gmra.mxu3 %v193_v35 }
  0xa9   : > { %v231_v37 = vpop.f32.mrf.mxu0  ;;  %v246_v38 = vpop.f32.mrf.mxu1 }
  0xaa   : > { %v232_v39 = vadd.f32 %v1032_v36, %v231_v37  ;;  %v247_v40 = vadd.f32 %v1032_v36, %v246_v38 }
  0xac   : > { %v754_v41 = vmul.f32 -1.442695, %v232_v39  ;;  %v759_v42 = vmul.f32 -1.442695, %v247_v40 }
  0xae   : > { %833 = vpow2.f32 %v754_v41 }
  0xaf   : > { %835 = vpow2.f32 %v759_v42 }
  0xb0   : > { %v261_v43 = vpop.f32.mrf.mxu2  ;;  %v276_v44 = vpop.f32.mrf.mxu3 }
  0xb1   : > { %v262_v45 = vadd.f32 %v1032_v36, %v261_v43  ;;  %v277_v46 = vadd.f32 %v1032_v36, %v276_v44  ;;  %v234_v47 = vpop.f32.mrf.mxu0  ;;  %v249_v48 = vpop.f32.mrf.mxu1 }
  0xb2   : > { %v235_v49 = vadd.f32 %v1032_v36, %v234_v47  ;;  %v250_v50 = vadd.f32 %v1032_v36, %v249_v48 }
  0xb3   : > { %v764_v51 = vmul.f32 -1.442695, %v262_v45  ;;  %v769_v52 = vmul.f32 -1.442695, %v277_v46 }
  0xb4   : > { %v834_v53 = vpop.eup %833  ;;  %v755_v56 = vmul.f32 -1.442695, %v235_v49  ;;  %v760_v58 = vmul.f32 -1.442695, %v250_v50 }
  0xb5   : > { %v836_v54 = vpop.eup %835  ;;  %v1040_v55 = vadd.f32 1.0, %v834_v53  ;;  %837 = vpow2.f32 %v764_v51 }
  0xb6   : > { %v1042_v57 = vadd.f32 1.0, %v836_v54  ;;  %839 = vpow2.f32 %v769_v52 }
  0xb7   : > { %841 = vrcp.f32 %v1040_v55  ;;  %v380_v62 = vand.u32 2147483647, %v1040_v55  ;;  %v382_v63 = vand.u32 2147483648, %v1040_v55  ;;  %vm376_vm0 = vweird.f32 %v1040_v55 }
  0xb8   : > { %843 = vrcp.f32 %v1042_v57  ;;  %v264_v59 = vpop.f32.mrf.mxu2  ;;  %v279_v60 = vpop.f32.mrf.mxu3  ;;  %v455_v2 = vand.u32 2147483647, %v1042_v57  ;;  %v457_v6 = vand.u32 2147483648, %v1042_v57  ;;  %vm451_vm1 = vweird.f32 %v1042_v57 }
  0xb9   : > { %845 = vpow2.f32 %v755_v56  ;;  %v265_v61 = vadd.f32 %v1032_v36, %v264_v59  ;;  %v237_v0 = vpop.f32.mrf.mxu0  ;;  %v280_v4 = vadd.f32 %v1032_v36, %v279_v60  ;;  %v252_v11 = vpop.f32.mrf.mxu1  ;;  %vm1060_vm2 = vcmp.eq.f32.partialorder %v380_v62, 8.507059e+37 }
  0xba   : > { %847 = vpow2.f32 %v760_v58  ;;  %v238_v10 = vadd.f32 %v1032_v36, %v237_v0  ;;  %v383_v15 = vor.u32 1.1754944e-38, %v382_v63  ;;  %vm1066_vm3 = vcmp.eq.f32.partialorder %v455_v2, 8.507059e+37 }
  0xbb   : > { %v838_v1 = vpop.eup %837  ;;  %v765_v3 = vmul.f32 -1.442695, %v265_v61  ;;  %v770_v19 = vmul.f32 -1.442695, %v280_v4  ;;  %v458_v22 = vor.u32 1.1754944e-38, %v457_v6  ;;  %v253_v23 = vadd.f32 %v1032_v36, %v252_v11 }
  0xbc   : > { %v840_v5 = vpop.eup %839  ;;  %v1052_v7 = vadd.f32 1.0, %v838_v1  ;;  %v756_v26 = vmul.f32 -1.442695, %v238_v10 }
  0xbd   : > { %v842_v8 = vpop.eup %841  ;;  %v1056_v9 = vadd.f32 1.0, %v840_v5  ;;  %v1081_v37 = vmul.f32 -1.442695, %v253_v23 }
  0xbe   : > { %v844_v12 = vpop.eup %843  ;;  %v372_v13 = vmul.f32 %v842_v8, %v1040_v55  ;;  %849 = vrcp.f32 %v1052_v7  ;;  %vm377_vm4 = vweird.f32 %v842_v8  ;;  %v530_v25 = vand.u32 2147483647, %v1052_v7 }
  0xbf   : > { %v846_v16 = vpop.eup %845  ;;  %v447_v17 = vmul.f32 %v844_v12, %v1042_v57  ;;  %851 = vpow2.f32 %v765_v3  ;;  %v532_v28 = vand.u32 2147483648, %v1052_v7  ;;  %vm452_vm5 = vweird.f32 %v844_v12  ;;  %vm378_vm6 = vmor %vm376_vm0, %vm377_vm4 }
  0xc0   : > { %v848_v20 = vpop.eup %847  ;;  %v373_v21 = vsub.f32 1.0, %v372_v13  ;;  %853 = vrcp.f32 %v1056_v9  ;;  %v1074_v29 = vadd.f32 1.0, %v846_v16  ;;  %v605_v32 = vand.u32 2147483647, %v1056_v9  ;;  %v267_v41 = vpop.f32.mrf.mxu2  ;;  %vm453_vm9 = vmor %vm451_vm1, %vm452_vm5 }
  0xc1   : > { %v448_v24 = vsub.f32 1.0, %v447_v17  ;;  %v1076_v30 = vadd.f32 1.0, %v848_v20  ;;  %855 = vpow2.f32 %v770_v19  ;;  %v607_v35 = vand.u32 2147483648, %v1056_v9  ;;  %v282_v4 = vpop.f32.mrf.mxu3  ;;  %v240_v23 = vpop.f32.mrf.mxu0 }
  0xc2   : > { %v374_v27 = vmul.f32 %v842_v8, %v373_v21  ;;  %857 = vrcp.f32 %v1074_v29  ;;  %vm526_vm7 = vweird.f32 %v1052_v7  ;;  %vm601_vm8 = vweird.f32 %v1056_v9 }
  0xc3   : > { %v449_v31 = vmul.f32 %v844_v12, %v448_v24  ;;  %vm1099_vm10 = vcmp.eq.f32.partialorder %v530_v25, 8.507059e+37  ;;  %v533_v45 = vor.u32 1.1754944e-38, %v532_v28  ;;  %859 = vrcp.f32 %v1076_v30 }
  0xc4   : > { %v850_v33 = vpop.eup %849  ;;  %v375_v34 = vadd.f32 %v842_v8, %v374_v27  ;;  %vm1107_vm11 = vcmp.eq.f32.partialorder %v605_v32, 8.507059e+37  ;;  %v608_v52 = vor.u32 1.1754944e-38, %v607_v35  ;;  %v395_v53 = vand.u32 2147483647, %v1074_v29 }
  0xc5   : > { %v852_v38 = vpop.eup %851  ;;  %v450_v39 = vadd.f32 %v844_v12, %v449_v31  ;;  %v522_v40 = vmul.f32 %v850_v33, %v1052_v7  ;;  %v268_v54 = vadd.f32 %v1032_v36, %v267_v41  ;;  %vm527_vm12 = vweird.f32 %v850_v33  ;;  %v255_v41 = vpop.f32.mrf.mxu1 }
  0xc6   : > { %v854_v42 = vpop.eup %853  ;;  %v379_v43 = vsel %vm378_vm6, %v842_v8, %v375_v34  ;;  %v1117_v58 = vadd.f32 1.0, %v852_v38  ;;  %vm391_vm14 = vweird.f32 %v1074_v29  ;;  %v397_v60 = vand.u32 2147483648, %v1074_v29  ;;  %vm528_vm15 = vmor %vm526_vm7, %vm527_vm12 }
  0xc7   : > { %v384_v46 = vsel %vm1060_vm2, %v383_v15, %v379_v43  ;;  %v454_v47 = vsel %vm453_vm9, %v844_v12, %v450_v39  ;;  %v523_v48 = vsub.f32 1.0, %v522_v40  ;;  %v597_v49 = vmul.f32 %v854_v42, %v1056_v9  ;;  %v856_v55 = vpop.eup %855 }
  0xc8   : > { %671 = vst [vmem:[%s1088_s29] sm:$0xff] %v384_v46  ;;  %v459_v51 = vsel %vm1066_vm3, %v458_v22, %v454_v47  ;;  %v858_v59 = vpop.eup %857  ;;  %vm602_vm13 = vweird.f32 %v854_v42  ;;  %861 = vpow2.f32 %v756_v26  ;;  %v1122_v0 = vadd.f32 1.0, %v856_v55 }
  0xc9   : > { %676 = vst [vmem:[%s1088_s29 + $0x28] sm:$0xff] %v459_v51  ;;  %v524_v56 = vmul.f32 %v850_v33, %v523_v48  ;;  %v598_v57 = vsub.f32 1.0, %v597_v49  ;;  %v387_v63 = vmul.f32 %v858_v59, %v1074_v29  ;;  %v860_v1 = vpop.eup %859  ;;  %vm1126_vm0 = vcmp.eq.f32.partialorder %v395_v53, 8.507059e+37  ;;  %vm603_vm2 = vmor %vm601_vm8, %vm602_vm13 }
  0xca   : > { %vm466_vm1 = vweird.f32 %v1076_v30  ;;  %v470_v3 = vand.u32 2147483647, %v1076_v30  ;;  %863 = vrcp.f32 %v1117_v58  ;;  %v462_v10 = vmul.f32 %v860_v1, %v1076_v30 }
  0xcb   : > { %v525_v61 = vadd.f32 %v850_v33, %v524_v56  ;;  %v599_v62 = vmul.f32 %v854_v42, %v598_v57  ;;  %v388_v8 = vsub.f32 1.0, %v387_v63  ;;  %vm392_vm3 = vweird.f32 %v858_v59 }
  0xcc   : > { %v472_v11 = vand.u32 2147483648, %v1076_v30  ;;  %v545_v12 = vand.u32 2147483647, %v1117_v58  ;;  %v463_v15 = vsub.f32 1.0, %v462_v10  ;;  %865 = vrcp.f32 %v1122_v0  ;;  %vm393_vm6 = vmor %vm391_vm14, %vm392_vm3 }
  0xcd   : > { %v529_v5 = vsel %vm528_vm15, %v850_v33, %v525_v61  ;;  %v600_v6 = vadd.f32 %v854_v42, %v599_v62  ;;  %v389_v14 = vmul.f32 %v858_v59, %v388_v8  ;;  %v398_v18 = vor.u32 1.1754944e-38, %v397_v60 }
  0xce   : > { %v534_v7 = vsel %vm1099_vm10, %v533_v45, %v529_v5  ;;  %v862_v16 = vpop.eup %861  ;;  %vm1145_vm4 = vcmp.eq.f32.partialorder %v470_v3, 8.507059e+37  ;;  %v547_v9 = vand.u32 2147483648, %v1117_v58  ;;  %v464_v21 = vmul.f32 %v860_v1, %v463_v15  ;;  %v285_v45 = vpop.f32.mrf.mxu3 }
  0xcf   : > { %681 = vst [vmem:[%s1088_s29 + $0x50] sm:$0xff] %v534_v7  ;;  %v604_v13 = vsel %vm603_vm2, %v854_v42, %v600_v6  ;;  %v390_v20 = vadd.f32 %v858_v59, %v389_v14  ;;  %vm467_vm5 = vweird.f32 %v860_v1  ;;  %v1151_v22 = vadd.f32 1.0, %v862_v16  ;;  %v270_v42 = vpop.f32.mrf.mxu2 }
  0xd0   : > { %v609_v17 = vsel %vm1107_vm11, %v608_v52, %v604_v13  ;;  %v864_v24 = vpop.eup %863  ;;  %v473_v25 = vor.u32 1.1754944e-38, %v472_v11  ;;  %vm541_vm7 = vweird.f32 %v1117_v58  ;;  %867 = vpow2.f32 %v1081_v37  ;;  %vm468_vm9 = vmor %vm466_vm1, %vm467_vm5 }
  0xd1   : > { %686 = vst [vmem:[%s1088_s29 + $0x78] sm:$0xff] %v609_v17  ;;  %v766_v26 = vmul.f32 -1.442695, %v268_v54  ;;  %v394_v27 = vsel %vm393_vm6, %v858_v59, %v390_v20  ;;  %v465_v28 = vadd.f32 %v860_v1, %v464_v21  ;;  %v537_v31 = vmul.f32 %v864_v24, %v1117_v58  ;;  %v243_v21 = vpop.f32.mrf.mxu0 }
  0xd2   : > { %vm1159_vm8 = vcmp.eq.f32.partialorder %v545_v12, 8.507059e+37  ;;  %v283_v33 = vadd.f32 %v1032_v36, %v282_v4  ;;  %v399_v29 = vsel %vm1126_vm0, %v398_v18, %v394_v27  ;;  %v548_v34 = vor.u32 1.1754944e-38, %v547_v9  ;;  %v866_v37 = vpop.eup %865 }
  0xd3   : > { %869 = vrcp.f32 %v1151_v22  ;;  %v241_v35 = vadd.f32 %v1032_v36, %v240_v23  ;;  %672 = vst [vmem:[%s1088_s29 + $0x8] sm:$0xff] %v399_v29  ;;  %v469_v38 = vsel %vm468_vm9, %v860_v1, %v465_v28  ;;  %v538_v39 = vsub.f32 1.0, %v537_v31 }
  0xd4   : > { %vm616_vm10 = vweird.f32 %v1122_v0  ;;  %v620_v40 = vand.u32 2147483647, %v1122_v0  ;;  %v474_v30 = vsel %vm1145_vm4, %v473_v25, %v469_v38  ;;  %v612_v43 = vmul.f32 %v866_v37, %v1122_v0 }
  0xd5   : > { %v622_v44 = vand.u32 2147483648, %v1122_v0  ;;  %871 = vpow2.f32 %v766_v26  ;;  %677 = vst [vmem:[%s1088_s29 + $0x30] sm:$0xff] %v474_v30  ;;  %v539_v46 = vmul.f32 %v864_v24, %v538_v39  ;;  %vm542_vm11 = vweird.f32 %v864_v24 }
  0xd6   : > { %vm617_vm12 = vweird.f32 %v866_v37  ;;  %v771_v47 = vmul.f32 -1.442695, %v283_v33  ;;  %v868_v48 = vpop.eup %867  ;;  %v613_v49 = vsub.f32 1.0, %v612_v43  ;;  %v757_v50 = vmul.f32 -1.442695, %v241_v35  ;;  %vm543_vm13 = vmor %vm541_vm7, %vm542_vm11 }
  0xd7   : > { %v256_v51 = vadd.f32 %v1032_v36, %v255_v41  ;;  %v271_v52 = vadd.f32 %v1032_v36, %v270_v42  ;;  %v540_v53 = vadd.f32 %v864_v24, %v539_v46  ;;  %v1181_v54 = vadd.f32 1.0, %v868_v48  ;;  %vm618_vm0 = vmor %vm616_vm10, %vm617_vm12 }
  0xd8   : > { %873 = vpow2.f32 %v771_v47  ;;  %v286_v55 = vadd.f32 %v1032_v36, %v285_v45  ;;  %v614_v57 = vmul.f32 %v866_v37, %v613_v49  ;;  %vm1186_vm14 = vcmp.eq.f32.partialorder %v620_v40, 8.507059e+37 }
  0xd9   : > { %v870_v56 = vpop.eup %869  ;;  %875 = vpow2.f32 %v757_v50  ;;  %v762_v59 = vmul.f32 -1.442695, %v256_v51  ;;  %v767_v60 = vmul.f32 -1.442695, %v271_v52  ;;  %v544_v61 = vsel %vm543_vm13, %v864_v24, %v540_v53 }
  0xda   : > { %v402_v63 = vmul.f32 %v870_v56, %v1151_v22  ;;  %877 = vrcp.f32 %v1181_v54  ;;  %v549_v2 = vsel %vm1159_vm8, %v548_v34, %v544_v61  ;;  %v615_v3 = vadd.f32 %v866_v37, %v614_v57 }
  0xdb   : > { %v872_v1 = vpop.eup %871  ;;  %v623_v58 = vor.u32 1.1754944e-38, %v622_v44  ;;  %vm406_vm15 = vweird.f32 %v1151_v22  ;;  %682 = vst [vmem:[%s1088_s29 + $0x58] sm:$0xff] %v549_v2  ;;  %v410_v5 = vand.u32 2147483647, %v1151_v22  ;;  %879 = vpow2.f32 %v762_v59 }
  0xdc   : > { %v403_v4 = vsub.f32 1.0, %v402_v63  ;;  %v1200_v6 = vadd.f32 1.0, %v872_v1  ;;  %v619_v8 = vsel %vm618_vm0, %v866_v37, %v615_v3  ;;  %v412_v10 = vand.u32 2147483648, %v1151_v22 }
  0xdd   : > { %881 = vpow2.f32 %v767_v60  ;;  %v772_v7 = vmul.f32 -1.442695, %v286_v55  ;;  %v624_v12 = vsel %vm1186_vm14, %v623_v58, %v619_v8  ;;  %vm407_vm1 = vweird.f32 %v870_v56  ;;  %v258_v58 = vpop.f32.mrf.mxu1 }
  0xde   : > { %v874_v11 = vpop.eup %873  ;;  %v404_v13 = vmul.f32 %v870_v56, %v403_v4  ;;  %883 = vrcp.f32 %v1200_v6  ;;  %687 = vst [vmem:[%s1088_s29 + $0x80] sm:$0xff] %v624_v12  ;;  %v485_v14 = vand.u32 2147483647, %v1181_v54  ;;  %v487_v18 = vand.u32 2147483648, %v1181_v54  ;;  %vm408_vm2 = vmor %vm406_vm15, %vm407_vm1 }
  0xdf   : > { %v876_v0 = vpop.eup %875  ;;  %v1208_v15 = vadd.f32 1.0, %v874_v11  ;;  %885 = vpow2.f32 %v772_v7  ;;  %vm411_vm3 = vcmp.eq.f32.partialorder %v410_v5, 8.507059e+37  ;;  %v413_v9 = vor.u32 1.1754944e-38, %v412_v10  ;;  %v273_v10 = vpop.f32.mrf.mxu2 }
  0xe0   : > { %v878_v16 = vpop.eup %877  ;;  %v405_v17 = vadd.f32 %v870_v56, %v404_v13  ;;  %v1211_v19 = vadd.f32 1.0, %v876_v0  ;;  %v560_v25 = vand.u32 2147483647, %v1200_v6  ;;  %v562_v26 = vand.u32 2147483648, %v1200_v6 }
  0xe1   : > { %v477_v20 = vmul.f32 %v878_v16, %v1181_v54  ;;  %v880_v23 = vpop.eup %879  ;;  %887 = vrcp.f32 %v1208_v15  ;;  %vm481_vm4 = vweird.f32 %v1181_v54  ;;  %vm1222_vm5 = vcmp.eq.f32.partialorder %v485_v14, 8.507059e+37 }
  0xe2   : > { %v409_v24 = vsel %vm408_vm2, %v870_v56, %v405_v17  ;;  %889 = vrcp.f32 %v1211_v19  ;;  %v488_v33 = vor.u32 1.1754944e-38, %v487_v18  ;;  %vm556_vm6 = vweird.f32 %v1200_v6 }
  0xe3   : > { %v882_v27 = vpop.eup %881  ;;  %v414_v28 = vsel %vm411_vm3, %v413_v9, %v409_v24  ;;  %v478_v31 = vsub.f32 1.0, %v477_v20  ;;  %v244_v29 = vadd.f32 %v1032_v36, %v243_v21  ;;  %vm482_vm7 = vweird.f32 %v878_v16  ;;  %v288_v24 = vpop.f32.mrf.mxu3 }
  0xe4   : > { %v884_v22 = vpop.eup %883  ;;  %673 = vst [vmem:[%s1088_s29 + $0x10] sm:$0xff] %v414_v28  ;;  %v635_v37 = vand.u32 2147483647, %v1208_v15  ;;  %vm1230_vm8 = vcmp.eq.f32.partialorder %v560_v25, 8.507059e+37  ;;  %v563_v40 = vor.u32 1.1754944e-38, %v562_v26  ;;  %v637_v41 = vand.u32 2147483648, %v1208_v15  ;;  %vm483_vm10 = vmor %vm481_vm4, %vm482_vm7 }
  0xe5   : > { %v479_v34 = vmul.f32 %v878_v16, %v478_v31  ;;  %v552_v35 = vmul.f32 %v884_v22, %v1200_v6  ;;  %v886_v38 = vpop.eup %885  ;;  %v1235_v42 = vadd.f32 1.0, %v880_v23  ;;  %vm631_vm9 = vweird.f32 %v1208_v15 }
  0xe6   : > { %v1238_v44 = vadd.f32 1.0, %v882_v27  ;;  %vm557_vm11 = vweird.f32 %v884_v22  ;;  %vm421_vm12 = vweird.f32 %v1211_v19  ;;  %v425_v46 = vand.u32 2147483647, %v1211_v19 }
  0xe7   : > { %v480_v30 = vadd.f32 %v878_v16, %v479_v34  ;;  %v553_v43 = vsub.f32 1.0, %v552_v35  ;;  %v888_v45 = vpop.eup %887  ;;  %891 = vrcp.f32 %v1235_v42  ;;  %vm1246_vm13 = vcmp.eq.f32.partialorder %v635_v37, 8.507059e+37  ;;  %vm558_vm14 = vmor %vm556_vm6, %vm557_vm11 }
  0xe8   : > { %v890_v47 = vpop.eup %889  ;;  %v627_v50 = vmul.f32 %v888_v45, %v1208_v15  ;;  %v1250_v52 = vadd.f32 1.0, %v886_v38  ;;  %v638_v54 = vor.u32 1.1754944e-38, %v637_v41  ;;  %v427_v56 = vand.u32 2147483648, %v1211_v19 }
  0xe9   : > { %v484_v48 = vsel %vm483_vm10, %v878_v16, %v480_v30  ;;  %v554_v49 = vmul.f32 %v884_v22, %v553_v43  ;;  %v417_v55 = vmul.f32 %v890_v47, %v1211_v19  ;;  %v500_v60 = vand.u32 2147483647, %v1235_v42 }
  0xea   : > { %v489_v53 = vsel %vm1222_vm5, %v488_v33, %v484_v48  ;;  %v628_v59 = vsub.f32 1.0, %v627_v50  ;;  %893 = vrcp.f32 %v1238_v44  ;;  %vm1262_vm15 = vcmp.eq.f32.partialorder %v425_v46, 8.507059e+37 }
  0xeb   : > { %678 = vst [vmem:[%s1088_s29 + $0x38] sm:$0xff] %v489_v53  ;;  %v555_v57 = vadd.f32 %v884_v22, %v554_v49  ;;  %v418_v61 = vsub.f32 1.0, %v417_v55  ;;  %v502_v63 = vand.u32 2147483648, %v1235_v42  ;;  %v758_v1 = vmul.f32 -1.442695, %v244_v29 }
  0xec   : > { %v629_v3 = vmul.f32 %v888_v45, %v628_v59  ;;  %vm632_vm0 = vweird.f32 %v888_v45  ;;  %895 = vrcp.f32 %v1250_v52  ;;  %vm422_vm1 = vweird.f32 %v890_v47 }
  0xed   : > { %v559_v2 = vsel %vm558_vm14, %v884_v22, %v555_v57  ;;  %v892_v4 = vpop.eup %891  ;;  %v419_v6 = vmul.f32 %v890_v47, %v418_v61  ;;  %v428_v8 = vor.u32 1.1754944e-38, %v427_v56  ;;  %vm496_vm2 = vweird.f32 %v1235_v42  ;;  %vm633_vm4 = vmor %vm631_vm9, %vm632_vm0 }
  0xee   : > { %v564_v5 = vsel %vm1230_vm8, %v563_v40, %v559_v2  ;;  %v630_v7 = vadd.f32 %v888_v45, %v629_v3  ;;  %v492_v11 = vmul.f32 %v892_v4, %v1235_v42  ;;  %vm1273_vm3 = vcmp.eq.f32.partialorder %v500_v60, 8.507059e+37  ;;  %vm423_vm5 = vmor %vm421_vm12, %vm422_vm1 }
  0xef   : > { %683 = vst [vmem:[%s1088_s29 + $0x60] sm:$0xff] %v564_v5  ;;  %v420_v13 = vadd.f32 %v890_v47, %v419_v6  ;;  %v503_v0 = vor.u32 1.1754944e-38, %v502_v63  ;;  %897 = vpow2.f32 %v758_v1  ;;  %v259_v14 = vadd.f32 %v1032_v36, %v258_v58 }
  0xf0   : > { %v894_v16 = vpop.eup %893  ;;  %v634_v17 = vsel %vm633_vm4, %v888_v45, %v630_v7  ;;  %v493_v18 = vsub.f32 1.0, %v492_v11  ;;  %vm571_vm6 = vweird.f32 %v1238_v44  ;;  %v274_v9 = vadd.f32 %v1032_v36, %v273_v10 }
  0xf1   : > { %v639_v15 = vsel %vm1246_vm13, %v638_v54, %v634_v17  ;;  %v424_v20 = vsel %vm423_vm5, %v890_v47, %v420_v13  ;;  %v567_v21 = vmul.f32 %v894_v16, %v1238_v44  ;;  %v575_v23 = vand.u32 2147483647, %v1238_v44 }
  0xf2   : > { %v896_v25 = vpop.eup %895  ;;  %688 = vst [vmem:[%s1088_s29 + $0x88] sm:$0xff] %v639_v15  ;;  %v429_v19 = vsel %vm1262_vm15, %v428_v8, %v424_v20  ;;  %v494_v26 = vmul.f32 %v892_v4, %v493_v18  ;;  %vm497_vm7 = vweird.f32 %v892_v4  ;;  %v763_v27 = vmul.f32 -1.442695, %v259_v14 }
  0xf3   : > { %674 = vst [vmem:[%s1088_s29 + $0x18] sm:$0xff] %v429_v19  ;;  %v568_v28 = vsub.f32 1.0, %v567_v21  ;;  %v577_v31 = vand.u32 2147483648, %v1238_v44  ;;  %v642_v22 = vmul.f32 %v896_v25, %v1250_v52  ;;  %v768_v32 = vmul.f32 -1.442695, %v274_v9  ;;  %vm498_vm8 = vmor %vm496_vm2, %vm497_vm7 }
  0xf4   : > { %v495_v33 = vadd.f32 %v892_v4, %v494_v26  ;;  %v650_v29 = vand.u32 2147483647, %v1250_v52  ;;  %899 = vpow2.f32 %v763_v27  ;;  %v289_v34 = vadd.f32 %v1032_v36, %v288_v24 }
  0xf5   : > { %v898_v35 = vpop.eup %897  ;;  %v569_v37 = vmul.f32 %v894_v16, %v568_v28  ;;  %vm572_vm9 = vweird.f32 %v894_v16  ;;  %v643_v38 = vsub.f32 1.0, %v642_v22  ;;  %901 = vpow2.f32 %v768_v32 }
  0xf6   : > { %v499_v39 = vsel %vm498_vm8, %v892_v4, %v495_v33  ;;  %v652_v40 = vand.u32 2147483648, %v1250_v52  ;;  %v355_v41 = vadd.f32 1.0, %v898_v35  ;;  %v773_v30 = vmul.f32 -1.442695, %v289_v34  ;;  %vm573_vm11 = vmor %vm571_vm6, %vm572_vm9 }
  0xf7   : > { %v504_v43 = vsel %vm1273_vm3, %v503_v0, %v499_v39  ;;  %v570_v45 = vadd.f32 %v894_v16, %v569_v37  ;;  %v644_v46 = vmul.f32 %v896_v25, %v643_v38  ;;  %vm647_vm10 = vweird.f32 %v896_v25 }
  0xf8   : > { %679 = vst [vmem:[%s1088_s29 + $0x40] sm:$0xff] %v504_v43  ;;  %v578_v36 = vor.u32 1.1754944e-38, %v577_v31  ;;  %vm646_vm12 = vweird.f32 %v1250_v52  ;;  %903 = vrcp.f32 %v355_v41  ;;  %vm576_vm13 = vcmp.eq.f32.partialorder %v575_v23, 8.507059e+37 }
  0xf9   : > { %v574_v42 = vsel %vm573_vm11, %v894_v16, %v570_v45  ;;  %v645_v47 = vadd.f32 %v896_v25, %v644_v46  ;;  %905 = vpow2.f32 %v773_v30  ;;  %vm648_vm14 = vmor %vm646_vm12, %vm647_vm10  ;;  %v653_v50 = vor.u32 1.1754944e-38, %v652_v40 }
  0xfa   : > { %v900_v48 = vpop.eup %899  ;;  %v579_v49 = vsel %vm576_vm13, %v578_v36, %v574_v42  ;;  %vm651_vm15 = vcmp.eq.f32.partialorder %v650_v29, 8.507059e+37  ;;  %v440_v61 = vand.u32 2147483647, %v355_v41  ;;  %v442_v62 = vand.u32 2147483648, %v355_v41 }
  0xfb   : > { %v902_v51 = vpop.eup %901  ;;  %684 = vst [vmem:[%s1088_s29 + $0x68] sm:$0xff] %v579_v49  ;;  %v649_v53 = vsel %vm648_vm14, %v896_v25, %v645_v47  ;;  %v360_v54 = vadd.f32 1.0, %v900_v48  ;;  %vm436_vm0 = vweird.f32 %v355_v41 }
  0xfc   : > { %v654_v44 = vsel %vm651_vm15, %v653_v50, %v649_v53  ;;  %v365_v55 = vadd.f32 1.0, %v902_v51  ;;  %vm441_vm2 = vcmp.eq.f32.partialorder %v440_v61, 8.507059e+37  ;;  %v443_v5 = vor.u32 1.1754944e-38, %v442_v62 }
  0xfd   : > { %689 = vst [vmem:[%s1088_s29 + $0x90] sm:$0xff] %v654_v44  ;;  %907 = vrcp.f32 %v360_v54  ;;  %vm511_vm4 = vweird.f32 %v360_v54  ;;  %v515_v8 = vand.u32 2147483647, %v360_v54  ;;  %v517_v7 = vand.u32 2147483648, %v360_v54 }
  0xfe   : > { %v904_v52 = vpop.eup %903  ;;  %909 = vrcp.f32 %v365_v55  ;;  %v590_v12 = vand.u32 2147483647, %v365_v55  ;;  %v592_v16 = vand.u32 2147483648, %v365_v55  ;;  %vm586_vm8 = vweird.f32 %v365_v55 }
  0xff   : > { %v906_v56 = vpop.eup %905  ;;  %v432_v57 = vmul.f32 %v904_v52, %v355_v41  ;;  %vm437_vm1 = vweird.f32 %v904_v52  ;;  %vm516_vm7 = vcmp.eq.f32.partialorder %v515_v8, 8.507059e+37  ;;  %v518_v15 = vor.u32 1.1754944e-38, %v517_v7 }
 0x100   : > { %v370_v59 = vadd.f32 1.0, %v906_v56  ;;  %vm438_vm3 = vmor %vm436_vm0, %vm437_vm1  ;;  %vm591_vm10 = vcmp.eq.f32.partialorder %v590_v12, 8.507059e+37  ;;  %v593_v24 = vor.u32 1.1754944e-38, %v592_v16 }
 0x101   : > { %v433_v60 = vsub.f32 1.0, %v432_v57 }
 0x102   : > { %911 = vrcp.f32 %v370_v59  ;;  %v665_v25 = vand.u32 2147483647, %v370_v59  ;;  %v667_v19 = vand.u32 2147483648, %v370_v59  ;;  %vm661_vm13 = vweird.f32 %v370_v59 }
 0x103   : > { %v908_v63 = vpop.eup %907  ;;  %v434_v1 = vmul.f32 %v904_v52, %v433_v60 }
 0x104   : > { %v910_v2 = vpop.eup %909  ;;  %v507_v3 = vmul.f32 %v908_v63, %v360_v54  ;;  %vm512_vm5 = vweird.f32 %v908_v63  ;;  %v668_v32 = vor.u32 1.1754944e-38, %v667_v19  ;;  %vm666_vm15 = vcmp.eq.f32.partialorder %v665_v25, 8.507059e+37 }
 0x105   : > { %v435_v58 = vadd.f32 %v904_v52, %v434_v1  ;;  %v582_v4 = vmul.f32 %v910_v2, %v365_v55  ;;  %vm587_vm6 = vweird.f32 %v910_v2  ;;  %vm513_vm9 = vmor %vm511_vm4, %vm512_vm5 }
 0x106   : > { %v508_v6 = vsub.f32 1.0, %v507_v3  ;;  %vm588_vm11 = vmor %vm586_vm8, %vm587_vm6 }
 0x107   : > { %v439_v10 = vsel %vm438_vm3, %v904_v52, %v435_v58  ;;  %v583_v11 = vsub.f32 1.0, %v582_v4 }
 0x108   : > { %v912_v13 = vpop.eup %911  ;;  %v444_v0 = vsel %vm441_vm2, %v443_v5, %v439_v10  ;;  %v509_v14 = vmul.f32 %v908_v63, %v508_v6 }
 0x109   : > { %675 = vst [vmem:[%s1088_s29 + $0x20] sm:$0xff] %v444_v0  ;;  %v584_v17 = vmul.f32 %v910_v2, %v583_v11  ;;  %v657_v18 = vmul.f32 %v912_v13, %v370_v59  ;;  %vm662_vm12 = vweird.f32 %v912_v13 }
 0x10a   : > { %v510_v9 = vadd.f32 %v908_v63, %v509_v14  ;;  %vm663_vm14 = vmor %vm661_vm13, %vm662_vm12 }
 0x10b   : > { %v585_v20 = vadd.f32 %v910_v2, %v584_v17  ;;  %v658_v21 = vsub.f32 1.0, %v657_v18 }
 0x10c   : > { %v514_v23 = vsel %vm513_vm9, %v908_v63, %v510_v9 }
 0x10d   : > { %v519_v26 = vsel %vm516_vm7, %v518_v15, %v514_v23  ;;  %v589_v27 = vsel %vm588_vm11, %v910_v2, %v585_v20  ;;  %v659_v28 = vmul.f32 %v912_v13, %v658_v21 }
 0x10e   : > { %680 = vst [vmem:[%s1088_s29 + $0x48] sm:$0xff] %v519_v26  ;;  %v594_v31 = vsel %vm591_vm10, %v593_v24, %v589_v27 }
 0x10f   : > { %685 = vst [vmem:[%s1088_s29 + $0x70] sm:$0xff] %v594_v31  ;;  %v660_v22 = vadd.f32 %v912_v13, %v659_v28 }
 0x111   : > { %v664_v33 = vsel %vm663_vm14, %v912_v13, %v660_v22 }
 0x112   : > { %v669_v29 = vsel %vm666_vm15, %v668_v32, %v664_v33 }
 0x113   : > { %690 = vst [vmem:[%s1088_s29 + $0x98] sm:$0xff] %v669_v29 }
 0x114 PF: > { %s13_s12 = sadd.s32 1, %s919_s12  }
 0x115   : > { %p10_p4 = scmp.ge.s32.totalorder %s13_s12, 4  }
 0x117   :  { %12 = sbr.rel (!%p10_p4) target bundleno = 1 (0x1), region = 62 }

// kernel: model_forward.4
= control target key start
LH: loop header
LB: loop body
LE: loop exit
PB: predicated region body
PF: predicated region fallthrough
CT: control target
= control target key end

     0   :  { %s1115_s12 = smov 0   ;;  %s1653_s0 = inlined_call_operand.vmem [shape: f32[416,128], index: 0, kind: input, shape index: {}]   ;;  %s1654_s1 = inlined_call_operand.vmem [shape: f32[128,128], index: 1, kind: input, shape index: {}]   ;;  %s1655_s2 = inlined_call_operand.vmem [shape: f32[1,128], index: 2, kind: input, shape index: {}]   ;;  %s1656_s3 = inlined_call_operand.vmem [shape: f32[416,128], index: 3, kind: output, shape index: {}]  }
   0x1 LB: > { %s891_s13 = sadd.s32 4294967295, %s1093_s12   ;;  %p895_p0 = scmp.ge.s32.totalorder %s1093_s12, 1  ;;  %s1093_s12 = sphi %s1115_s12, %s13_s12  }
   0x2   : > { %p138_p1 = scmp.lt.s32.totalorder %s1093_s12, 3 }
   0x4   : > { %p139_p2 = pnand %p895_p0, %p138_p1 }
   0x5   : > { %s162_s30 = smul.u32 (!%p139_p2), 26, %s891_s13 }
   0x6   : > { %142 = sbr.rel (%p139_p2) target bundleno = 303 (0x12f), region = 32 }
   0x7   : > { %p163_p3 = scmp.lt.s32.totalorder (!%p139_p2), %s162_s30, 51 }
   0xb   : > { %v215_v0 = vld [vmem:[%s1654_s1 + $0x78] sm:$0xff]  ;;  %v214_v1 = vld [vmem:[%s1654_s1 + $0x70] sm:$0xff]  ;;  %v213_v2 = vld [vmem:[%s1654_s1 + $0x68] sm:$0xff]  ;;  %s1710_s30 = smov (!%p163_p3, %s162_s30), 51 }
   0xc   : > { %927 = vmatpush.msra.mxu2 %v215_v0  ;;  %928 = vmatpush.msra.mxu3 %v215_v0  ;;  %v212_v3 = vld [vmem:[%s1654_s1 + $0x60] sm:$0xff]  ;;  %v211_v4 = vld [vmem:[%s1654_s1 + $0x58] sm:$0xff]  ;;  %v210_v5 = vld [vmem:[%s1654_s1 + $0x50] sm:$0xff]  ;;  %s896_s17 = sshll.u32 %s1710_s30, 3 }
   0xd   : > { %220 = vmatpush.msra.mxu0 %v215_v0  ;;  %926 = vmatpush.msra.mxu1 %v215_v0  ;;  %v209_v6 = vld [vmem:[%s1654_s1 + $0x48] sm:$0xff]  ;;  %v208_v7 = vld [vmem:[%s1654_s1 + $0x40] sm:$0xff]  ;;  %v207_v8 = vld [vmem:[%s1654_s1 + $0x38] sm:$0xff]  ;;  %s1178_s22 = scalar_lea.vmem %s1653_s0, %s896_s17  ;;  %s1277_s29 = scalar_lea.vmem %s1656_s3, %s896_s17 }
   0xe   : > { %930 = vmatpush.msra.mxu2 %v214_v1  ;;  %931 = vmatpush.msra.mxu3 %v214_v1  ;;  %v206_v9 = vld [vmem:[%s1654_s1 + $0x30] sm:$0xff]  ;;  %v205_v10 = vld [vmem:[%s1654_s1 + $0x28] sm:$0xff]  ;;  %v204_v11 = vld [vmem:[%s1654_s1 + $0x20] sm:$0xff] }
   0xf   : > { %221 = vmatpush.msra.mxu0 %v214_v1  ;;  %929 = vmatpush.msra.mxu1 %v214_v1  ;;  %v203_v12 = vld [vmem:[%s1654_s1 + $0x18] sm:$0xff]  ;;  %v202_v13 = vld [vmem:[%s1654_s1 + $0x10] sm:$0xff]  ;;  %v201_v14 = vld [vmem:[%s1654_s1 + $0x8] sm:$0xff] }
  0x10   : > { %933 = vmatpush.msra.mxu2 %v213_v2  ;;  %934 = vmatpush.msra.mxu3 %v213_v2  ;;  %v200_v15 = vld [vmem:[%s1654_s1] sm:$0xff]  ;;  %v193_v17 = vld [vmem:[%s1178_s22 + $0x98] sm:$0xff]  ;;  %v180_v19 = vld [vmem:[%s1178_s22 + $0x30] sm:$0xff] }
  0x11   : > { %222 = vmatpush.msra.mxu0 %v213_v2  ;;  %932 = vmatpush.msra.mxu1 %v213_v2  ;;  %v186_v16 = vld [vmem:[%s1178_s22 + $0x60] sm:$0xff]  ;;  %v187_v20 = vld [vmem:[%s1178_s22 + $0x68] sm:$0xff]  ;;  %v181_v23 = vld [vmem:[%s1178_s22 + $0x38] sm:$0xff] }
  0x12   : > { %936 = vmatpush.msra.mxu2 %v212_v3  ;;  %937 = vmatpush.msra.mxu3 %v212_v3  ;;  %v174_v18 = vld [vmem:[%s1178_s22] sm:$0xff]  ;;  %v175_v22 = vld [vmem:[%s1178_s22 + $0x8] sm:$0xff]  ;;  %v188_v24 = vld [vmem:[%s1178_s22 + $0x70] sm:$0xff] }
  0x13   : > { %223 = vmatpush.msra.mxu0 %v212_v3  ;;  %935 = vmatpush.msra.mxu1 %v212_v3  ;;  %v194_v21 = vld [vmem:[%s1178_s22 + $0xa0] sm:$0xff]  ;;  %v195_v25 = vld [vmem:[%s1178_s22 + $0xa8] sm:$0xff]  ;;  %v176_v26 = vld [vmem:[%s1178_s22 + $0x10] sm:$0xff] }
  0x14   : > { %939 = vmatpush.msra.mxu2 %v211_v4  ;;  %940 = vmatpush.msra.mxu3 %v211_v4  ;;  %v182_v27 = vld [vmem:[%s1178_s22 + $0x40] sm:$0xff]  ;;  %v189_v28 = vld [vmem:[%s1178_s22 + $0x78] sm:$0xff]  ;;  %v196_v29 = vld [vmem:[%s1178_s22 + $0xb0] sm:$0xff] }
  0x15   : > { %224 = vmatpush.msra.mxu0 %v211_v4  ;;  %938 = vmatpush.msra.mxu1 %v211_v4  ;;  %v177_v30 = vld [vmem:[%s1178_s22 + $0x18] sm:$0xff]  ;;  %v183_v31 = vld [vmem:[%s1178_s22 + $0x48] sm:$0xff]  ;;  %v190_v32 = vld [vmem:[%s1178_s22 + $0x80] sm:$0xff] }
  0x16   : > { %942 = vmatpush.msra.mxu2 %v210_v5  ;;  %943 = vmatpush.msra.mxu3 %v210_v5  ;;  %v197_v33 = vld [vmem:[%s1178_s22 + $0xb8] sm:$0xff]  ;;  %v178_v34 = vld [vmem:[%s1178_s22 + $0x20] sm:$0xff]  ;;  %v184_v35 = vld [vmem:[%s1178_s22 + $0x50] sm:$0xff] }
  0x17   : > { %225 = vmatpush.msra.mxu0 %v210_v5  ;;  %941 = vmatpush.msra.mxu1 %v210_v5  ;;  %v191_v36 = vld [vmem:[%s1178_s22 + $0x88] sm:$0xff]  ;;  %v198_v37 = vld [vmem:[%s1178_s22 + $0xc0] sm:$0xff]  ;;  %v185_v39 = vld [vmem:[%s1178_s22 + $0x58] sm:$0xff] }
  0x18   : > { %945 = vmatpush.msra.mxu2 %v209_v6  ;;  %946 = vmatpush.msra.mxu3 %v209_v6  ;;  %v179_v38 = vld [vmem:[%s1178_s22 + $0x28] sm:$0xff]  ;;  %v192_v40 = vld [vmem:[%s1178_s22 + $0x90] sm:$0xff]  ;;  %v1212_v42 = vld [vmem:[%s1655_s2] ss:$0 sm:$0xff] }
  0x19   : > { %226 = vmatpush.msra.mxu0 %v209_v6  ;;  %944 = vmatpush.msra.mxu1 %v209_v6  ;;  %v199_v41 = vld [vmem:[%s1178_s22 + $0xc8] sm:$0xff] }
  0x1a   : > { %948 = vmatpush.msra.mxu2 %v208_v7  ;;  %949 = vmatpush.msra.mxu3 %v208_v7 }
  0x1b   : > { %227 = vmatpush.msra.mxu0 %v208_v7  ;;  %947 = vmatpush.msra.mxu1 %v208_v7 }
  0x1c   : > { %951 = vmatpush.msra.mxu2 %v207_v8  ;;  %952 = vmatpush.msra.mxu3 %v207_v8 }
  0x1d   : > { %228 = vmatpush.msra.mxu0 %v207_v8  ;;  %950 = vmatpush.msra.mxu1 %v207_v8 }
  0x1e   : > { %954 = vmatpush.msra.mxu2 %v206_v9  ;;  %955 = vmatpush.msra.mxu3 %v206_v9 }
  0x1f   : > { %229 = vmatpush.msra.mxu0 %v206_v9  ;;  %953 = vmatpush.msra.mxu1 %v206_v9 }
  0x20   : > { %957 = vmatpush.msra.mxu2 %v205_v10  ;;  %958 = vmatpush.msra.mxu3 %v205_v10 }
  0x21   : > { %230 = vmatpush.msra.mxu0 %v205_v10  ;;  %956 = vmatpush.msra.mxu1 %v205_v10 }
  0x22   : > { %960 = vmatpush.msra.mxu2 %v204_v11  ;;  %961 = vmatpush.msra.mxu3 %v204_v11 }
  0x23   : > { %231 = vmatpush.msra.mxu0 %v204_v11  ;;  %959 = vmatpush.msra.mxu1 %v204_v11 }
  0x24   : > { %963 = vmatpush.msra.mxu2 %v203_v12  ;;  %964 = vmatpush.msra.mxu3 %v203_v12 }
  0x25   : > { %232 = vmatpush.msra.mxu0 %v203_v12  ;;  %962 = vmatpush.msra.mxu1 %v203_v12 }
  0x26   : > { %966 = vmatpush.msra.mxu2 %v202_v13  ;;  %967 = vmatpush.msra.mxu3 %v202_v13 }
  0x27   : > { %233 = vmatpush.msra.mxu0 %v202_v13  ;;  %965 = vmatpush.msra.mxu1 %v202_v13 }
  0x28   : > { %969 = vmatpush.msra.mxu2 %v201_v14  ;;  %970 = vmatpush.msra.mxu3 %v201_v14 }
  0x29   : > { %234 = vmatpush.msra.mxu0 %v201_v14  ;;  %968 = vmatpush.msra.mxu1 %v201_v14 }
  0x2a   : > { %972 = vmatpush.msra.mxu2 %v200_v15  ;;  %973 = vmatpush.msra.mxu3 %v200_v15 }
  0x2b   : > { %235 = vmatpush.msra.mxu0 %v200_v15  ;;  %971 = vmatpush.msra.mxu1 %v200_v15 }
  0x2c   : > { %272 = vmatmul.f32.vlgmr.msra.gmra.mxu2 %v186_v16  ;;  %293 = vmatmul.f32.vlgmr.msra.gmra.mxu3 %v193_v17 }
  0x2d   : > { %236 = vmatmul.f32.vlgmr.msra.gmra.mxu0 %v174_v18  ;;  %254 = vmatmul.f32.vlgmr.msra.gmra.mxu1 %v180_v19 }
  0x34   : > { %275 = vmatmul.f32.gmra.mxu2 %v187_v20  ;;  %296 = vmatmul.f32.gmra.mxu3 %v194_v21 }
  0x35   : > { %239 = vmatmul.f32.gmra.mxu0 %v175_v22  ;;  %257 = vmatmul.f32.gmra.mxu1 %v181_v23 }
  0x3c   : > { %278 = vmatmul.f32.gmra.mxu2 %v188_v24  ;;  %299 = vmatmul.f32.gmra.mxu3 %v195_v25 }
  0x3d   : > { %242 = vmatmul.f32.gmra.mxu0 %v176_v26  ;;  %260 = vmatmul.f32.gmra.mxu1 %v182_v27 }
  0x44   : > { %281 = vmatmul.f32.gmra.mxu2 %v189_v28  ;;  %302 = vmatmul.f32.gmra.mxu3 %v196_v29 }
  0x45   : > { %245 = vmatmul.f32.gmra.mxu0 %v177_v30  ;;  %263 = vmatmul.f32.gmra.mxu1 %v183_v31 }
  0x4c   : > { %284 = vmatmul.f32.gmra.mxu2 %v190_v32  ;;  %305 = vmatmul.f32.gmra.mxu3 %v197_v33 }
  0x4d   : > { %248 = vmatmul.f32.gmra.mxu0 %v178_v34  ;;  %266 = vmatmul.f32.gmra.mxu1 %v184_v35 }
  0x54   : > { %287 = vmatmul.f32.gmra.mxu2 %v191_v36  ;;  %308 = vmatmul.f32.gmra.mxu3 %v198_v37 }
  0x55   : > { %251 = vmatmul.f32.gmra.mxu0 %v179_v38  ;;  %269 = vmatmul.f32.gmra.mxu1 %v185_v39 }
  0x5c   : > { %290 = vmatmul.f32.gmra.mxu2 %v192_v40  ;;  %311 = vmatmul.f32.gmra.mxu3 %v199_v41 }
  0xaa   : > { %v237_v43 = vpop.f32.mrf.mxu0  ;;  %v255_v44 = vpop.f32.mrf.mxu1 }
  0xab   : > { %v238_v45 = vadd.f32 %v1212_v42, %v237_v43  ;;  %v256_v46 = vadd.f32 %v1212_v42, %v255_v44 }
  0xad   : > { %v898_v47 = vmul.f32 -1.442695, %v238_v45  ;;  %v904_v48 = vmul.f32 -1.442695, %v256_v46 }
  0xaf   : > { %983 = vpow2.f32 %v898_v47  ;;  %v273_v49 = vpop.f32.mrf.mxu2  ;;  %v294_v50 = vpop.f32.mrf.mxu3 }
  0xb0   : > { %985 = vpow2.f32 %v904_v48  ;;  %v274_v51 = vadd.f32 %v1212_v42, %v273_v49  ;;  %v295_v52 = vadd.f32 %v1212_v42, %v294_v50 }
  0xb2   : > { %v910_v53 = vmul.f32 -1.442695, %v274_v51  ;;  %v917_v54 = vmul.f32 -1.442695, %v295_v52  ;;  %v240_v55 = vpop.f32.mrf.mxu0  ;;  %v258_v56 = vpop.f32.mrf.mxu1 }
  0xb3   : > { %v241_v57 = vadd.f32 %v1212_v42, %v240_v55  ;;  %v259_v58 = vadd.f32 %v1212_v42, %v258_v56 }
  0xb4   : > { %987 = vpow2.f32 %v910_v53 }
  0xb5   : > { %v984_v59 = vpop.eup %983  ;;  %989 = vpow2.f32 %v917_v54  ;;  %v899_v60 = vmul.f32 -1.442695, %v241_v57  ;;  %v905_v63 = vmul.f32 -1.442695, %v259_v58 }
  0xb6   : > { %v986_v61 = vpop.eup %985  ;;  %v393_v62 = vadd.f32 1.0, %v984_v59 }
  0xb7   : > { %v399_v0 = vadd.f32 1.0, %v986_v61  ;;  %991 = vpow2.f32 %v899_v60  ;;  %v276_v1 = vpop.f32.mrf.mxu2  ;;  %v297_v11 = vpop.f32.mrf.mxu3 }
  0xb8   : > { %993 = vrcp.f32 %v393_v62  ;;  %v428_v2 = vand.u32 2147483647, %v393_v62  ;;  %v430_v3 = vand.u32 2147483648, %v393_v62  ;;  %v277_v7 = vadd.f32 %v1212_v42, %v276_v1 }
  0xb9   : > { %995 = vrcp.f32 %v399_v0  ;;  %v518_v5 = vand.u32 2147483647, %v399_v0  ;;  %v520_v6 = vand.u32 2147483648, %v399_v0  ;;  %vm424_vm0 = vweird.f32 %v393_v62 }
  0xba   : > { %v988_v4 = vpop.eup %987  ;;  %997 = vpow2.f32 %v905_v63  ;;  %v243_v12 = vpop.f32.mrf.mxu0  ;;  %vm1225_vm1 = vcmp.eq.f32.partialorder %v428_v2, 8.507059e+37  ;;  %vm514_vm2 = vweird.f32 %v399_v0  ;;  %v911_v15 = vmul.f32 -1.442695, %v277_v7 }
  0xbb   : > { %v990_v8 = vpop.eup %989  ;;  %v1221_v9 = vadd.f32 1.0, %v988_v4  ;;  %v431_v17 = vor.u32 1.1754944e-38, %v430_v3  ;;  %vm1230_vm3 = vcmp.eq.f32.partialorder %v518_v5, 8.507059e+37  ;;  %v521_v19 = vor.u32 1.1754944e-38, %v520_v6  ;;  %v261_v25 = vpop.f32.mrf.mxu1 }
  0xbc   : > { %v1223_v10 = vadd.f32 1.0, %v990_v8  ;;  %v298_v23 = vadd.f32 %v1212_v42, %v297_v11  ;;  %v244_v24 = vadd.f32 %v1212_v42, %v243_v12  ;;  %v1246_v35 = vadd.f32 %v1212_v42, %v261_v25 }
  0xbd   : > { %v992_v13 = vpop.eup %991  ;;  %999 = vrcp.f32 %v1221_v9  ;;  %v608_v22 = vand.u32 2147483647, %v1221_v9  ;;  %v610_v28 = vand.u32 2147483648, %v1221_v9  ;;  %vm604_vm6 = vweird.f32 %v1221_v9 }
  0xbe   : > { %v994_v16 = vpop.eup %993  ;;  %1001 = vrcp.f32 %v1223_v10  ;;  %v713_v29 = vand.u32 2147483647, %v1223_v10  ;;  %v715_v30 = vand.u32 2147483648, %v1223_v10  ;;  %v1241_v32 = vadd.f32 1.0, %v992_v13 }
  0xbf   : > { %v996_v20 = vpop.eup %995  ;;  %v420_v21 = vmul.f32 %v994_v16, %v393_v62  ;;  %vm425_vm4 = vweird.f32 %v994_v16  ;;  %1003 = vpow2.f32 %v911_v15  ;;  %vm709_vm7 = vweird.f32 %v1223_v10  ;;  %v279_v45 = vpop.f32.mrf.mxu2 }
  0xc0   : > { %v998_v26 = vpop.eup %997  ;;  %v510_v27 = vmul.f32 %v996_v20, %v399_v0  ;;  %vm515_vm5 = vweird.f32 %v996_v20  ;;  %1005 = vrcp.f32 %v1241_v32  ;;  %vm1252_vm8 = vmor %vm424_vm0, %vm425_vm4  ;;  %vm1257_vm9 = vcmp.eq.f32.partialorder %v608_v22, 8.507059e+37  ;;  %v300_v6 = vpop.f32.mrf.mxu3 }
  0xc1   : > { %v421_v31 = vsub.f32 1.0, %v420_v21  ;;  %v1243_v34 = vadd.f32 1.0, %v998_v26  ;;  %v611_v44 = vor.u32 1.1754944e-38, %v610_v28  ;;  %vm1263_vm10 = vmor %vm514_vm2, %vm515_vm5  ;;  %vm1268_vm11 = vcmp.eq.f32.partialorder %v713_v29, 8.507059e+37 }
  0xc2   : > { %v511_v33 = vsub.f32 1.0, %v510_v27  ;;  %v716_v50 = vor.u32 1.1754944e-38, %v715_v30  ;;  %v918_v51 = vmul.f32 -1.442695, %v298_v23  ;;  %v900_v54 = vmul.f32 -1.442695, %v244_v24  ;;  %v246_v15 = vpop.f32.mrf.mxu0 }
  0xc3   : > { %v1000_v36 = vpop.eup %999  ;;  %v422_v37 = vmul.f32 %v994_v16, %v421_v31  ;;  %1007 = vrcp.f32 %v1243_v34  ;;  %v445_v58 = vand.u32 2147483648, %v1241_v32  ;;  %v280_v59 = vadd.f32 %v1212_v42, %v279_v45  ;;  %v264_v27 = vpop.f32.mrf.mxu1 }
  0xc4   : > { %v1002_v38 = vpop.eup %1001  ;;  %v512_v40 = vmul.f32 %v996_v20, %v511_v33  ;;  %v600_v41 = vmul.f32 %v1000_v36, %v1221_v9  ;;  %vm605_vm12 = vweird.f32 %v1000_v36  ;;  %vm439_vm14 = vweird.f32 %v1241_v32 }
  0xc5   : > { %v423_v46 = vadd.f32 %v994_v16, %v422_v37  ;;  %v705_v48 = vmul.f32 %v1002_v38, %v1223_v10  ;;  %v1004_v55 = vpop.eup %1003  ;;  %vm710_vm13 = vweird.f32 %v1002_v38  ;;  %v443_v5 = vand.u32 2147483647, %v1241_v32  ;;  %vm606_vm15 = vmor %vm604_vm6, %vm605_vm12 }
  0xc6   : > { %v513_v52 = vadd.f32 %v996_v20, %v512_v40  ;;  %v601_v53 = vsub.f32 1.0, %v600_v41  ;;  %v1006_v63 = vpop.eup %1005  ;;  %v1291_v2 = vadd.f32 1.0, %v1004_v55  ;;  %v446_v8 = vor.u32 1.1754944e-38, %v445_v58  ;;  %vm711_vm0 = vmor %vm709_vm7, %vm710_vm13 }
  0xc7   : > { %v427_v56 = vsel %vm1252_vm8, %v994_v16, %v423_v46  ;;  %v706_v57 = vsub.f32 1.0, %v705_v48  ;;  %v435_v4 = vmul.f32 %v1006_v63, %v1241_v32  ;;  %v533_v11 = vand.u32 2147483647, %v1243_v34 }
  0xc8   : > { %v432_v60 = vsel %vm1225_vm1, %v431_v17, %v427_v56  ;;  %v517_v61 = vsel %vm1263_vm10, %v996_v20, %v513_v52  ;;  %v602_v62 = vmul.f32 %v1000_v36, %v601_v53  ;;  %1009 = vrcp.f32 %v1291_v2  ;;  %v303_v45 = vpop.f32.mrf.mxu3 }
  0xc9   : > { %809 = vst [vmem:[%s1277_s29] sm:$0xff] %v432_v60  ;;  %v522_v0 = vsel %vm1230_vm3, %v521_v19, %v517_v61  ;;  %v707_v1 = vmul.f32 %v1002_v38, %v706_v57  ;;  %v1008_v12 = vpop.eup %1007  ;;  %v436_v14 = vsub.f32 1.0, %v435_v4  ;;  %vm440_vm1 = vweird.f32 %v1006_v63 }
  0xca   : > { %815 = vst [vmem:[%s1277_s29 + $0x30] sm:$0xff] %v522_v0  ;;  %v603_v3 = vadd.f32 %v1000_v36, %v602_v62  ;;  %1011 = vpow2.f32 %v918_v51  ;;  %v525_v17 = vmul.f32 %v1008_v12, %v1243_v34  ;;  %v535_v18 = vand.u32 2147483648, %v1243_v34  ;;  %vm1315_vm4 = vmor %vm439_vm14, %vm440_vm1  ;;  %v249_v53 = vpop.f32.mrf.mxu0 }
  0xcb   : > { %v708_v7 = vadd.f32 %v1002_v38, %v707_v1  ;;  %v437_v20 = vmul.f32 %v1006_v63, %v436_v14  ;;  %vm529_vm2 = vweird.f32 %v1243_v34  ;;  %vm530_vm3 = vweird.f32 %v1008_v12 }
  0xcc   : > { %v607_v13 = vsel %vm606_vm15, %v1000_v36, %v603_v3  ;;  %v526_v21 = vsub.f32 1.0, %v525_v17  ;;  %1013 = vpow2.f32 %v900_v54  ;;  %v906_v22 = vmul.f32 -1.442695, %v1246_v35  ;;  %vm1331_vm7 = vmor %vm529_vm2, %vm530_vm3 }
  0xcd   : > { %v612_v9 = vsel %vm1257_vm9, %v611_v44, %v607_v13  ;;  %v712_v16 = vsel %vm711_vm0, %v1002_v38, %v708_v7  ;;  %v912_v23 = vmul.f32 -1.442695, %v280_v59  ;;  %v438_v24 = vadd.f32 %v1006_v63, %v437_v20  ;;  %v282_v44 = vpop.f32.mrf.mxu2 }
  0xce   : > { %821 = vst [vmem:[%s1277_s29 + $0x60] sm:$0xff] %v612_v9  ;;  %v717_v19 = vsel %vm1268_vm11, %v716_v50, %v712_v16  ;;  %vm444_vm5 = vcmp.eq.f32.partialorder %v443_v5, 8.507059e+37  ;;  %vm1320_vm6 = vcmp.eq.f32.partialorder %v533_v11, 8.507059e+37  ;;  %v301_v26 = vadd.f32 %v1212_v42, %v300_v6  ;;  %v1010_v28 = vpop.eup %1009  ;;  %v267_v6 = vpop.f32.mrf.mxu1 }
  0xcf   : > { %828 = vst [vmem:[%s1277_s29 + $0x98] sm:$0xff] %v717_v19  ;;  %v527_v29 = vmul.f32 %v1008_v12, %v526_v21  ;;  %v536_v30 = vor.u32 1.1754944e-38, %v535_v18  ;;  %v623_v31 = vand.u32 2147483647, %v1291_v2  ;;  %1015 = vpow2.f32 %v906_v22 }
  0xd0   : > { %v1012_v32 = vpop.eup %1011  ;;  %v442_v33 = vsel %vm1315_vm4, %v1006_v63, %v438_v24  ;;  %v615_v36 = vmul.f32 %v1010_v28, %v1291_v2  ;;  %1017 = vpow2.f32 %v912_v23  ;;  %v247_v37 = vadd.f32 %v1212_v42, %v246_v15 }
  0xd1   : > { %v447_v38 = vsel %vm444_vm5, %v446_v8, %v442_v33  ;;  %v528_v39 = vadd.f32 %v1008_v12, %v527_v29  ;;  %v1337_v40 = vadd.f32 1.0, %v1012_v32  ;;  %v919_v41 = vmul.f32 -1.442695, %v301_v26 }
  0xd2   : > { %810 = vst [vmem:[%s1277_s29 + $0x8] sm:$0xff] %v447_v38  ;;  %v616_v43 = vsub.f32 1.0, %v615_v36  ;;  %vm619_vm8 = vweird.f32 %v1291_v2  ;;  %v625_v34 = vand.u32 2147483648, %v1291_v2  ;;  %v1014_v46 = vpop.eup %1013  ;;  %vm620_vm9 = vweird.f32 %v1010_v28 }
  0xd3   : > { %v532_v47 = vsel %vm1331_vm7, %v1008_v12, %v528_v39  ;;  %1019 = vrcp.f32 %v1337_v40  ;;  %v265_v48 = vadd.f32 %v1212_v42, %v264_v27  ;;  %v1348_v51 = vadd.f32 1.0, %v1014_v46  ;;  %vm621_vm11 = vmor %vm619_vm8, %vm620_vm9 }
  0xd4   : > { %v537_v49 = vsel %vm1320_vm6, %v536_v30, %v532_v47  ;;  %v617_v50 = vmul.f32 %v1010_v28, %v616_v43  ;;  %v901_v52 = vmul.f32 -1.442695, %v247_v37  ;;  %vm1351_vm10 = vcmp.eq.f32.partialorder %v623_v31, 8.507059e+37 }
  0xd5   : > { %v1016_v54 = vpop.eup %1015  ;;  %816 = vst [vmem:[%s1277_s29 + $0x38] sm:$0xff] %v537_v49  ;;  %1021 = vpow2.f32 %v919_v41  ;;  %v283_v56 = vadd.f32 %v1212_v42, %v282_v44  ;;  %v304_v57 = vadd.f32 %v1212_v42, %v303_v45  ;;  %v728_v60 = vand.u32 2147483647, %v1337_v40 }
  0xd6   : > { %v1018_v58 = vpop.eup %1017  ;;  %v618_v59 = vadd.f32 %v1010_v28, %v617_v50  ;;  %v730_v61 = vand.u32 2147483648, %v1337_v40  ;;  %1023 = vrcp.f32 %v1348_v51  ;;  %v626_v62 = vor.u32 1.1754944e-38, %v625_v34 }
  0xd7   : > { %v1363_v63 = vadd.f32 1.0, %v1016_v54  ;;  %v1365_v0 = vadd.f32 1.0, %v1018_v58  ;;  %v250_v1 = vadd.f32 %v1212_v42, %v249_v53  ;;  %v458_v4 = vand.u32 2147483647, %v1348_v51 }
  0xd8   : > { %v622_v3 = vsel %vm621_vm11, %v1010_v28, %v618_v59  ;;  %1025 = vpow2.f32 %v901_v52  ;;  %v907_v5 = vmul.f32 -1.442695, %v265_v48  ;;  %vm724_vm12 = vweird.f32 %v1337_v40 }
  0xd9   : > { %v1020_v7 = vpop.eup %1019  ;;  %v627_v8 = vsel %vm1351_vm10, %v626_v62, %v622_v3  ;;  %v460_v2 = vand.u32 2147483648, %v1348_v51  ;;  %1027 = vrcp.f32 %v1363_v63  ;;  %vm1376_vm13 = vcmp.eq.f32.partialorder %v728_v60, 8.507059e+37 }
  0xda   : > { %822 = vst [vmem:[%s1277_s29 + $0x68] sm:$0xff] %v627_v8  ;;  %v720_v11 = vmul.f32 %v1020_v7, %v1337_v40  ;;  %v731_v13 = vor.u32 1.1754944e-38, %v730_v61  ;;  %v913_v14 = vmul.f32 -1.442695, %v283_v56  ;;  %v1380_v15 = vmul.f32 -1.442695, %v304_v57 }
  0xdb   : > { %v1022_v9 = vpop.eup %1021  ;;  %vm454_vm14 = vweird.f32 %v1348_v51  ;;  %1029 = vrcp.f32 %v1365_v0  ;;  %v1384_v16 = vmul.f32 -1.442695, %v250_v1  ;;  %v1387_v17 = vadd.f32 %v1212_v42, %v267_v6 }
  0xdc   : > { %v1024_v18 = vpop.eup %1023  ;;  %v721_v19 = vsub.f32 1.0, %v720_v11  ;;  %vm1389_vm15 = vcmp.eq.f32.partialorder %v458_v4, 8.507059e+37  ;;  %v548_v10 = vand.u32 2147483647, %v1363_v63  ;;  %v1394_v21 = vadd.f32 1.0, %v1022_v9 }
  0xdd   : > { %v450_v22 = vmul.f32 %v1024_v18, %v1348_v51  ;;  %v461_v23 = vor.u32 1.1754944e-38, %v460_v2  ;;  %v550_v24 = vand.u32 2147483648, %v1363_v63  ;;  %v640_v25 = vand.u32 2147483648, %v1365_v0 }
  0xde   : > { %v1026_v26 = vpop.eup %1025  ;;  %v722_v27 = vmul.f32 %v1020_v7, %v721_v19  ;;  %vm725_vm0 = vweird.f32 %v1020_v7  ;;  %v638_v28 = vand.u32 2147483647, %v1365_v0  ;;  %1031 = vrcp.f32 %v1394_v21 }
  0xdf   : > { %v1028_v29 = vpop.eup %1027  ;;  %v451_v30 = vsub.f32 1.0, %v450_v22  ;;  %vm455_vm1 = vweird.f32 %v1024_v18  ;;  %vm544_vm2 = vweird.f32 %v1363_v63  ;;  %v1402_v31 = vadd.f32 1.0, %v1026_v26  ;;  %vm726_vm5 = vmor %vm724_vm12, %vm725_vm0 }
  0xe0   : > { %v723_v32 = vadd.f32 %v1020_v7, %v722_v27  ;;  %v540_v33 = vmul.f32 %v1028_v29, %v1363_v63  ;;  %vm1405_vm3 = vcmp.eq.f32.partialorder %v548_v10, 8.507059e+37  ;;  %vm634_vm4 = vweird.f32 %v1365_v0  ;;  %vm1416_vm6 = vmor %vm454_vm14, %vm455_vm1 }
  0xe1   : > { %1033 = vpow2.f32 %v907_v5  ;;  %v1030_v36 = vpop.eup %1029  ;;  %v452_v37 = vmul.f32 %v1024_v18, %v451_v30  ;;  %v551_v38 = vor.u32 1.1754944e-38, %v550_v24  ;;  %v641_v39 = vor.u32 1.1754944e-38, %v640_v25  ;;  %v306_v24 = vpop.f32.mrf.mxu3 }
  0xe2   : > { %1035 = vrcp.f32 %v1402_v31  ;;  %v727_v41 = vsel %vm726_vm5, %v1020_v7, %v723_v32  ;;  %v541_v34 = vsub.f32 1.0, %v540_v33  ;;  %vm545_vm7 = vweird.f32 %v1028_v29 }
  0xe3   : > { %v630_v44 = vmul.f32 %v1030_v36, %v1365_v0  ;;  %vm1421_vm8 = vcmp.eq.f32.partialorder %v638_v28, 8.507059e+37  ;;  %v732_v45 = vsel %vm1376_vm13, %v731_v13, %v727_v41  ;;  %v453_v46 = vadd.f32 %v1024_v18, %v452_v37  ;;  %vm1435_vm10 = vmor %vm544_vm2, %vm545_vm7 }
  0xe4   : > { %vm739_vm9 = vweird.f32 %v1394_v21  ;;  %v743_v47 = vand.u32 2147483647, %v1394_v21  ;;  %v1032_v48 = vpop.eup %1031  ;;  %829 = vst [vmem:[%s1277_s29 + $0xa0] sm:$0xff] %v732_v45  ;;  %v542_v49 = vmul.f32 %v1028_v29, %v541_v34  ;;  %v745_v51 = vand.u32 2147483648, %v1394_v21 }
  0xe5   : > { %v631_v50 = vsub.f32 1.0, %v630_v44  ;;  %1037 = vpow2.f32 %v913_v14  ;;  %v457_v52 = vsel %vm1416_vm6, %v1024_v18, %v453_v46  ;;  %vm635_vm11 = vweird.f32 %v1030_v36  ;;  %v285_v18 = vpop.f32.mrf.mxu2 }
  0xe6   : > { %v735_v54 = vmul.f32 %v1032_v48, %v1394_v21  ;;  %vm469_vm12 = vweird.f32 %v1402_v31  ;;  %v462_v56 = vsel %vm1389_vm15, %v461_v23, %v457_v52  ;;  %v543_v57 = vadd.f32 %v1028_v29, %v542_v49  ;;  %vm636_vm13 = vmor %vm634_vm4, %vm635_vm11 }
  0xe7   : > { %v1034_v55 = vpop.eup %1033  ;;  %v632_v58 = vmul.f32 %v1030_v36, %v631_v50  ;;  %v473_v59 = vand.u32 2147483647, %v1402_v31  ;;  %811 = vst [vmem:[%s1277_s29 + $0x10] sm:$0xff] %v462_v56  ;;  %v475_v62 = vand.u32 2147483648, %v1402_v31  ;;  %1039 = vpow2.f32 %v1380_v15 }
  0xe8   : > { %v1036_v60 = vpop.eup %1035  ;;  %v736_v61 = vsub.f32 1.0, %v735_v54  ;;  %v1446_v63 = vadd.f32 1.0, %v1034_v55  ;;  %v547_v1 = vsel %vm1435_vm10, %v1028_v29, %v543_v57  ;;  %v908_v5 = vmul.f32 -1.442695, %v1387_v17 }
  0xe9   : > { %v633_v3 = vadd.f32 %v1030_v36, %v632_v58  ;;  %v465_v4 = vmul.f32 %v1036_v60, %v1402_v31  ;;  %v552_v6 = vsel %vm1405_vm3, %v551_v38, %v547_v1  ;;  %vm740_vm14 = vweird.f32 %v1032_v48  ;;  %v252_v31 = vpop.f32.mrf.mxu0 }
  0xea   : > { %v737_v7 = vmul.f32 %v1032_v48, %v736_v61  ;;  %1041 = vrcp.f32 %v1446_v63  ;;  %817 = vst [vmem:[%s1277_s29 + $0x40] sm:$0xff] %v552_v6  ;;  %vm470_vm15 = vweird.f32 %v1036_v60  ;;  %v563_v12 = vand.u32 2147483647, %v1446_v63  ;;  %vm741_vm0 = vmor %vm739_vm9, %vm740_vm14 }
  0xeb   : > { %v1038_v8 = vpop.eup %1037  ;;  %v637_v2 = vsel %vm636_vm13, %v1030_v36, %v633_v3  ;;  %v466_v11 = vsub.f32 1.0, %v465_v4  ;;  %1043 = vpow2.f32 %v1384_v16  ;;  %v746_v0 = vor.u32 1.1754944e-38, %v745_v51  ;;  %vm1473_vm2 = vmor %vm469_vm12, %vm470_vm15  ;;  %v309_v4 = vpop.f32.mrf.mxu3 }
  0xec   : > { %v642_v13 = vsel %vm1421_vm8, %v641_v39, %v637_v2  ;;  %v738_v14 = vadd.f32 %v1032_v48, %v737_v7  ;;  %v1463_v15 = vadd.f32 1.0, %v1038_v8  ;;  %v565_v17 = vand.u32 2147483648, %v1446_v63 }
  0xed   : > { %823 = vst [vmem:[%s1277_s29 + $0x70] sm:$0xff] %v642_v13  ;;  %v467_v9 = vmul.f32 %v1036_v60, %v466_v11  ;;  %1045 = vpow2.f32 %v908_v5  ;;  %v1040_v19 = vpop.eup %1039  ;;  %vm744_vm1 = vcmp.eq.f32.partialorder %v743_v47, 8.507059e+37  ;;  %v476_v16 = vor.u32 1.1754944e-38, %v475_v62  ;;  %v288_v56 = vpop.f32.mrf.mxu2 }
  0xee   : > { %v742_v20 = vsel %vm741_vm0, %v1032_v48, %v738_v14  ;;  %1047 = vrcp.f32 %v1463_v15  ;;  %vm474_vm3 = vcmp.eq.f32.partialorder %v473_v59, 8.507059e+37  ;;  %v1478_v23 = vadd.f32 1.0, %v1040_v19 }
  0xef   : > { %v747_v21 = vsel %vm744_vm1, %v746_v0, %v742_v20  ;;  %v468_v22 = vadd.f32 %v1036_v60, %v467_v9  ;;  %vm559_vm4 = vweird.f32 %v1446_v63  ;;  %vm1482_vm5 = vcmp.eq.f32.partialorder %v563_v12, 8.507059e+37 }
  0xf0   : > { %v1042_v25 = vpop.eup %1041  ;;  %830 = vst [vmem:[%s1277_s29 + $0xa8] sm:$0xff] %v747_v21  ;;  %v566_v29 = vor.u32 1.1754944e-38, %v565_v17  ;;  %v653_v30 = vand.u32 2147483647, %v1463_v15  ;;  %v655_v35 = vand.u32 2147483648, %v1463_v15  ;;  %1049 = vrcp.f32 %v1478_v23 }
  0xf1   : > { %v472_v27 = vsel %vm1473_vm2, %v1036_v60, %v468_v22  ;;  %v555_v28 = vmul.f32 %v1042_v25, %v1446_v63  ;;  %v1044_v32 = vpop.eup %1043  ;;  %v286_v36 = vadd.f32 %v1212_v42, %v285_v18  ;;  %vm560_vm6 = vweird.f32 %v1042_v25  ;;  %v270_v60 = vpop.f32.mrf.mxu1 }
  0xf2   : > { %v477_v33 = vsel %vm474_vm3, %v476_v16, %v472_v27  ;;  %v1494_v39 = vadd.f32 1.0, %v1044_v32  ;;  %v307_v41 = vadd.f32 %v1212_v42, %v306_v24  ;;  %vm649_vm7 = vweird.f32 %v1463_v15  ;;  %vm1510_vm9 = vmor %vm559_vm4, %vm560_vm6 }
  0xf3   : > { %v1046_v37 = vpop.eup %1045  ;;  %812 = vst [vmem:[%s1277_s29 + $0x18] sm:$0xff] %v477_v33  ;;  %v556_v38 = vsub.f32 1.0, %v555_v28  ;;  %v760_v34 = vand.u32 2147483648, %v1478_v23  ;;  %v253_v40 = vadd.f32 %v1212_v42, %v252_v31  ;;  %vm1503_vm8 = vcmp.eq.f32.partialorder %v653_v30, 8.507059e+37 }
  0xf4   : > { %v1048_v43 = vpop.eup %1047  ;;  %v1499_v44 = vadd.f32 1.0, %v1046_v37  ;;  %v758_v48 = vand.u32 2147483647, %v1478_v23  ;;  %v656_v50 = vor.u32 1.1754944e-38, %v655_v35  ;;  %1051 = vrcp.f32 %v1494_v39 }
  0xf5   : > { %v557_v45 = vmul.f32 %v1042_v25, %v556_v38  ;;  %v645_v46 = vmul.f32 %v1048_v43, %v1463_v15  ;;  %v490_v51 = vand.u32 2147483648, %v1494_v39  ;;  %v914_v52 = vmul.f32 -1.442695, %v286_v36  ;;  %v291_v31 = vpop.f32.mrf.mxu2 }
  0xf6   : > { %vm754_vm10 = vweird.f32 %v1478_v23  ;;  %1053 = vrcp.f32 %v1499_v44  ;;  %v921_v55 = vmul.f32 -1.442695, %v307_v41  ;;  %v1050_v57 = vpop.eup %1049  ;;  %vm650_vm11 = vweird.f32 %v1048_v43 }
  0xf7   : > { %v558_v53 = vadd.f32 %v1042_v25, %v557_v45  ;;  %v646_v54 = vsub.f32 1.0, %v645_v46  ;;  %v761_v58 = vor.u32 1.1754944e-38, %v760_v34  ;;  %vm484_vm12 = vweird.f32 %v1494_v39  ;;  %vm651_vm15 = vmor %vm649_vm7, %vm650_vm11 }
  0xf8   : > { %v903_v59 = vmul.f32 -1.442695, %v253_v40  ;;  %v750_v63 = vmul.f32 %v1050_v57, %v1478_v23  ;;  %vm1522_vm13 = vcmp.eq.f32.partialorder %v758_v48, 8.507059e+37  ;;  %v488_v3 = vand.u32 2147483647, %v1494_v39 }
  0xf9   : > { %v562_v61 = vsel %vm1510_vm9, %v1042_v25, %v558_v53  ;;  %v647_v62 = vmul.f32 %v1048_v43, %v646_v54  ;;  %v491_v6 = vor.u32 1.1754944e-38, %v490_v51  ;;  %vm574_vm14 = vweird.f32 %v1499_v44  ;;  %v312_v51 = vpop.f32.mrf.mxu3 }
  0xfa   : > { %v567_v5 = vsel %vm1482_vm5, %v566_v29, %v562_v61  ;;  %1055 = vpow2.f32 %v914_v52  ;;  %v751_v8 = vsub.f32 1.0, %v750_v63  ;;  %v271_v2 = vadd.f32 %v1212_v42, %v270_v60  ;;  %v1052_v11 = vpop.eup %1051 }
  0xfb   : > { %818 = vst [vmem:[%s1277_s29 + $0x48] sm:$0xff] %v567_v5  ;;  %v648_v7 = vadd.f32 %v1048_v43, %v647_v62  ;;  %1057 = vpow2.f32 %v921_v55  ;;  %vm755_vm0 = vweird.f32 %v1050_v57  ;;  %v580_v12 = vand.u32 2147483648, %v1499_v44 }
  0xfc   : > { %v289_v13 = vadd.f32 %v1212_v42, %v288_v56  ;;  %v310_v14 = vadd.f32 %v1212_v42, %v309_v4  ;;  %v1054_v0 = vpop.eup %1053  ;;  %v752_v17 = vmul.f32 %v1050_v57, %v751_v8  ;;  %v480_v18 = vmul.f32 %v1052_v11, %v1494_v39  ;;  %vm756_vm2 = vmor %vm754_vm10, %vm755_vm0 }
  0xfd   : > { %v652_v9 = vsel %vm651_vm15, %v1048_v43, %v648_v7  ;;  %1059 = vpow2.f32 %v903_v59  ;;  %vm485_vm1 = vweird.f32 %v1052_v11  ;;  %v570_v15 = vmul.f32 %v1054_v0, %v1499_v44 }
  0xfe   : > { %v657_v19 = vsel %vm1503_vm8, %v656_v50, %v652_v9  ;;  %v909_v20 = vmul.f32 -1.442695, %v271_v2  ;;  %v753_v10 = vadd.f32 %v1050_v57, %v752_v17  ;;  %v481_v16 = vsub.f32 1.0, %v480_v18  ;;  %vm1554_vm4 = vmor %vm484_vm12, %vm485_vm1 }
  0xff   : > { %824 = vst [vmem:[%s1277_s29 + $0x78] sm:$0xff] %v657_v19  ;;  %v915_v21 = vmul.f32 -1.442695, %v289_v13  ;;  %v922_v22 = vmul.f32 -1.442695, %v310_v14  ;;  %v571_v25 = vsub.f32 1.0, %v570_v15  ;;  %vm575_vm3 = vweird.f32 %v1054_v0 }
 0x100   : > { %v1056_v24 = vpop.eup %1055  ;;  %v578_v26 = vand.u32 2147483647, %v1499_v44  ;;  %1061 = vpow2.f32 %v909_v20  ;;  %v757_v28 = vsel %vm756_vm2, %v1050_v57, %v753_v10  ;;  %v482_v29 = vmul.f32 %v1052_v11, %v481_v16  ;;  %vm576_vm6 = vmor %vm574_vm14, %vm575_vm3 }
 0x101   : > { %v1058_v27 = vpop.eup %1057  ;;  %v1547_v30 = vadd.f32 1.0, %v1056_v24  ;;  %1063 = vpow2.f32 %v915_v21  ;;  %v762_v32 = vsel %vm1522_vm13, %v761_v58, %v757_v28  ;;  %v572_v33 = vmul.f32 %v1054_v0, %v571_v25 }
 0x102   : > { %v1558_v35 = vadd.f32 1.0, %v1058_v27  ;;  %1065 = vpow2.f32 %v922_v22  ;;  %831 = vst [vmem:[%s1277_s29 + $0xb0] sm:$0xff] %v762_v32  ;;  %v483_v37 = vadd.f32 %v1052_v11, %v482_v29  ;;  %vm489_vm5 = vcmp.eq.f32.partialorder %v488_v3, 8.507059e+37 }
 0x103   : > { %v1060_v36 = vpop.eup %1059  ;;  %v581_v38 = vor.u32 1.1754944e-38, %v580_v12  ;;  %1067 = vrcp.f32 %v1547_v30  ;;  %v573_v39 = vadd.f32 %v1054_v0, %v572_v33  ;;  %vm579_vm7 = vcmp.eq.f32.partialorder %v578_v26, 8.507059e+37 }
 0x104   : > { %1069 = vrcp.f32 %v1558_v35  ;;  %v292_v41 = vadd.f32 %v1212_v42, %v291_v31  ;;  %v487_v43 = vsel %vm1554_vm4, %v1052_v11, %v483_v37  ;;  %v1569_v46 = vadd.f32 1.0, %v1060_v36 }
 0x105   : > { %v492_v40 = vsel %vm489_vm5, %v491_v6, %v487_v43  ;;  %v577_v45 = vsel %vm576_vm6, %v1054_v0, %v573_v39  ;;  %v668_v48 = vand.u32 2147483647, %v1547_v30  ;;  %v670_v49 = vand.u32 2147483648, %v1547_v30 }
 0x106   : > { %v1062_v34 = vpop.eup %1061  ;;  %813 = vst [vmem:[%s1277_s29 + $0x20] sm:$0xff] %v492_v40  ;;  %v582_v47 = vsel %vm579_vm7, %v581_v38, %v577_v45  ;;  %v773_v53 = vand.u32 2147483647, %v1558_v35  ;;  %1071 = vrcp.f32 %v1569_v46  ;;  %v916_v54 = vmul.f32 -1.442695, %v292_v41 }
 0x107   : > { %v1064_v44 = vpop.eup %1063  ;;  %v1574_v50 = vadd.f32 1.0, %v1062_v34  ;;  %819 = vst [vmem:[%s1277_s29 + $0x50] sm:$0xff] %v582_v47  ;;  %v775_v56 = vand.u32 2147483648, %v1558_v35  ;;  %vm664_vm8 = vweird.f32 %v1547_v30  ;;  %v313_v59 = vadd.f32 %v1212_v42, %v312_v51 }
 0x108   : > { %v1066_v52 = vpop.eup %1065  ;;  %vm1584_vm9 = vcmp.eq.f32.partialorder %v668_v48, 8.507059e+37  ;;  %v671_v61 = vor.u32 1.1754944e-38, %v670_v49  ;;  %vm769_vm10 = vweird.f32 %v1558_v35  ;;  %vm1590_vm11 = vcmp.eq.f32.partialorder %v773_v53, 8.507059e+37 }
 0x109   : > { %v1068_v55 = vpop.eup %1067  ;;  %1073 = vrcp.f32 %v1574_v50  ;;  %v1594_v3 = vadd.f32 1.0, %v1064_v44  ;;  %v776_v5 = vor.u32 1.1754944e-38, %v775_v56  ;;  %vm499_vm12 = vweird.f32 %v1569_v46 }
 0x10a   : > { %v1070_v57 = vpop.eup %1069  ;;  %v660_v58 = vmul.f32 %v1068_v55, %v1547_v30  ;;  %1075 = vpow2.f32 %v916_v54  ;;  %v1597_v42 = vadd.f32 1.0, %v1066_v52  ;;  %vm665_vm13 = vweird.f32 %v1068_v55 }
 0x10b   : > { %v765_v62 = vmul.f32 %v1070_v57, %v1558_v35  ;;  %v503_v8 = vand.u32 2147483647, %v1569_v46  ;;  %1077 = vrcp.f32 %v1594_v3  ;;  %vm770_vm14 = vweird.f32 %v1070_v57  ;;  %vm666_vm0 = vmor %vm664_vm8, %vm665_vm13 }
 0x10c   : > { %v661_v63 = vsub.f32 1.0, %v660_v58  ;;  %v1072_v6 = vpop.eup %1071  ;;  %v505_v13 = vand.u32 2147483648, %v1569_v46  ;;  %vm589_vm15 = vweird.f32 %v1574_v50  ;;  %v595_v9 = vand.u32 2147483648, %v1574_v50  ;;  %vm771_vm2 = vmor %vm769_vm10, %vm770_vm14 }
 0x10d   : > { %v766_v4 = vsub.f32 1.0, %v765_v62  ;;  %v495_v12 = vmul.f32 %v1072_v6, %v1569_v46  ;;  %vm500_vm1 = vweird.f32 %v1072_v6  ;;  %1079 = vrcp.f32 %v1597_v42 }
 0x10e   : > { %v662_v7 = vmul.f32 %v1068_v55, %v661_v63  ;;  %v593_v10 = vand.u32 2147483647, %v1574_v50  ;;  %v923_v24 = vmul.f32 -1.442695, %v313_v59  ;;  %vm1620_vm4 = vmor %vm499_vm12, %vm500_vm1  ;;  %v506_v28 = vor.u32 1.1754944e-38, %v505_v13 }
 0x10f   : > { %v1074_v2 = vpop.eup %1073  ;;  %v767_v11 = vmul.f32 %v1070_v57, %v766_v4  ;;  %v496_v18 = vsub.f32 1.0, %v495_v12  ;;  %vm504_vm5 = vcmp.eq.f32.partialorder %v503_v8, 8.507059e+37  ;;  %v596_v23 = vor.u32 1.1754944e-38, %v595_v9 }
 0x110   : > { %v663_v14 = vadd.f32 %v1068_v55, %v662_v7  ;;  %v585_v0 = vmul.f32 %v1074_v2, %v1574_v50  ;;  %v1076_v19 = vpop.eup %1075  ;;  %vm590_vm3 = vweird.f32 %v1074_v2  ;;  %vm594_vm7 = vcmp.eq.f32.partialorder %v593_v10, 8.507059e+37 }
 0x111   : > { %v768_v17 = vadd.f32 %v1070_v57, %v767_v11  ;;  %v497_v22 = vmul.f32 %v1072_v6, %v496_v18  ;;  %v1078_v25 = vpop.eup %1077  ;;  %v411_v30 = vadd.f32 1.0, %v1076_v19  ;;  %vm1628_vm6 = vmor %vm589_vm15, %vm590_vm3  ;;  %v685_v43 = vand.u32 2147483648, %v1594_v3 }
 0x112   : > { %v667_v15 = vsel %vm666_vm0, %v1068_v55, %v663_v14  ;;  %v586_v20 = vsub.f32 1.0, %v585_v0  ;;  %v675_v33 = vmul.f32 %v1078_v25, %v1594_v3  ;;  %vm680_vm8 = vweird.f32 %v1078_v25 }
 0x113   : > { %v672_v16 = vsel %vm1584_vm9, %v671_v61, %v667_v15  ;;  %v772_v21 = vsel %vm771_vm2, %v1070_v57, %v768_v17  ;;  %v498_v31 = vadd.f32 %v1072_v6, %v497_v22  ;;  %1081 = vrcp.f32 %v411_v30  ;;  %v1080_v36 = vpop.eup %1079 }
 0x114   : > { %825 = vst [vmem:[%s1277_s29 + $0x80] sm:$0xff] %v672_v16  ;;  %v777_v26 = vsel %vm1590_vm11, %v776_v5, %v772_v21  ;;  %v587_v29 = vmul.f32 %v1074_v2, %v586_v20  ;;  %v676_v38 = vsub.f32 1.0, %v675_v33  ;;  %1083 = vpow2.f32 %v923_v24 }
 0x115   : > { %832 = vst [vmem:[%s1277_s29 + $0xb8] sm:$0xff] %v777_v26  ;;  %v502_v37 = vsel %vm1620_vm4, %v1072_v6, %v498_v31  ;;  %v780_v34 = vmul.f32 %v1080_v36, %v1597_v42  ;;  %v683_v46 = vand.u32 2147483647, %v1594_v3  ;;  %vm679_vm9 = vweird.f32 %v1594_v3 }
 0x116   : > { %v588_v35 = vadd.f32 %v1074_v2, %v587_v29  ;;  %v507_v39 = vsel %vm504_vm5, %v506_v28, %v502_v37  ;;  %v677_v45 = vmul.f32 %v1078_v25, %v676_v38  ;;  %v790_v48 = vand.u32 2147483648, %v1597_v42  ;;  %vm681_vm10 = vmor %vm679_vm9, %vm680_vm8 }
 0x117   : > { %814 = vst [vmem:[%s1277_s29 + $0x28] sm:$0xff] %v507_v39  ;;  %v781_v44 = vsub.f32 1.0, %v780_v34  ;;  %v686_v50 = vor.u32 1.1754944e-38, %v685_v43  ;;  %vm785_vm11 = vweird.f32 %v1080_v36  ;;  %v788_v52 = vand.u32 2147483647, %v1597_v42 }
 0x118   : > { %v592_v41 = vsel %vm1628_vm6, %v1074_v2, %v588_v35  ;;  %v678_v47 = vadd.f32 %v1078_v25, %v677_v45  ;;  %vm684_vm12 = vcmp.eq.f32.partialorder %v683_v46, 8.507059e+37  ;;  %vm784_vm13 = vweird.f32 %v1597_v42 }
 0x119   : > { %v597_v40 = vsel %vm594_vm7, %v596_v23, %v592_v41  ;;  %v1082_v49 = vpop.eup %1081  ;;  %v782_v51 = vmul.f32 %v1080_v36, %v781_v44  ;;  %vm786_vm14 = vmor %vm784_vm13, %vm785_vm11  ;;  %v791_v59 = vor.u32 1.1754944e-38, %v790_v48  ;;  %vm789_vm15 = vcmp.eq.f32.partialorder %v788_v52, 8.507059e+37 }
 0x11a   : > { %820 = vst [vmem:[%s1277_s29 + $0x58] sm:$0xff] %v597_v40  ;;  %v1084_v53 = vpop.eup %1083  ;;  %v682_v54 = vsel %vm681_vm10, %v1078_v25, %v678_v47  ;;  %v690_v55 = vmul.f32 %v1082_v49, %v411_v30  ;;  %v700_v62 = vand.u32 2147483648, %v411_v30  ;;  %vm695_vm0 = vweird.f32 %v1082_v49 }
 0x11b   : > { %v687_v56 = vsel %vm684_vm12, %v686_v50, %v682_v54  ;;  %v783_v57 = vadd.f32 %v1080_v36, %v782_v51  ;;  %v418_v58 = vadd.f32 1.0, %v1084_v53  ;;  %v698_v3 = vand.u32 2147483647, %v411_v30 }
 0x11c   : > { %826 = vst [vmem:[%s1277_s29 + $0x88] sm:$0xff] %v687_v56  ;;  %v691_v60 = vsub.f32 1.0, %v690_v55  ;;  %vm694_vm1 = vweird.f32 %v411_v30  ;;  %v701_v5 = vor.u32 1.1754944e-38, %v700_v62 }
 0x11d   : > { %v787_v61 = vsel %vm786_vm14, %v1080_v36, %v783_v57  ;;  %1085 = vrcp.f32 %v418_v58  ;;  %vm696_vm2 = vmor %vm694_vm1, %vm695_vm0  ;;  %vm699_vm3 = vcmp.eq.f32.partialorder %v698_v3, 8.507059e+37  ;;  %v805_v11 = vand.u32 2147483648, %v418_v58 }
 0x11e   : > { %v792_v63 = vsel %vm789_vm15, %v791_v59, %v787_v61  ;;  %v692_v1 = vmul.f32 %v1082_v49, %v691_v60  ;;  %v803_v13 = vand.u32 2147483647, %v418_v58  ;;  %vm799_vm5 = vweird.f32 %v418_v58 }
 0x11f   : > { %833 = vst [vmem:[%s1277_s29 + $0xc0] sm:$0xff] %v792_v63  ;;  %v806_v0 = vor.u32 1.1754944e-38, %v805_v11 }
 0x120   : > { %v693_v4 = vadd.f32 %v1082_v49, %v692_v1  ;;  %vm804_vm7 = vcmp.eq.f32.partialorder %v803_v13, 8.507059e+37 }
 0x122   : > { %v697_v42 = vsel %vm696_vm2, %v1082_v49, %v693_v4 }
 0x123   : > { %v1086_v6 = vpop.eup %1085  ;;  %v702_v7 = vsel %vm699_vm3, %v701_v5, %v697_v42 }
 0x124   : > { %827 = vst [vmem:[%s1277_s29 + $0x90] sm:$0xff] %v702_v7  ;;  %v795_v8 = vmul.f32 %v1086_v6, %v418_v58  ;;  %vm800_vm4 = vweird.f32 %v1086_v6 }
 0x125   : > { %vm801_vm6 = vmor %vm799_vm5, %vm800_vm4 }
 0x126   : > { %v796_v2 = vsub.f32 1.0, %v795_v8 }
 0x128   : > { %v797_v12 = vmul.f32 %v1086_v6, %v796_v2 }
 0x12a   : > { %v798_v14 = vadd.f32 %v1086_v6, %v797_v12 }
 0x12c   : > { %v802_v9 = vsel %vm801_vm6, %v1086_v6, %v798_v14 }
 0x12d   : > { %v807_v17 = vsel %vm804_vm7, %v806_v0, %v802_v9 }
 0x12e   : > { %834 = vst [vmem:[%s1277_s29 + $0xc8] sm:$0xff] %v807_v17 }
 0x12f PF: > { %s13_s12 = sadd.s32 1, %s1093_s12  }
 0x130   : > { %p10_p4 = scmp.ge.s32.totalorder %s13_s12, 4  }
 0x132   :  { %12 = sbr.rel (!%p10_p4) target bundleno = 1 (0x1), region = 62 }

// kernel: model_forward.5
= control target key start
LH: loop header
LB: loop body
LE: loop exit
PB: predicated region body
PF: predicated region fallthrough
CT: control target
= control target key end

     0   :  { %s3284_s12 = smov 0   ;;  %s5045_s0 = inlined_call_operand.vmem [shape: f32[6160,384], index: 0, kind: input, shape index: {}]   ;;  %s5046_s1 = inlined_call_operand.vmem [shape: f32[384,128], index: 1, kind: input, shape index: {}]   ;;  %s5047_s2 = inlined_call_operand.vmem [shape: f32[1,128], index: 2, kind: input, shape index: {}]   ;;  %s5048_s3 = inlined_call_operand.vmem [shape: f32[6160,128], index: 3, kind: output, shape index: {}]  }
   0x1 LB: > { %s2800_s13 = sadd.s32 4294967295, %s3262_s12   ;;  %p2804_p0 = scmp.ge.s32.totalorder %s3262_s12, 1  ;;  %s3262_s12 = sphi %s3284_s12, %s13_s12  }
   0x2   : > { %p139_p1 = scmp.lt.s32.totalorder %s3262_s12, 11 }
   0x4   : > { %p140_p2 = pnand %p2804_p0, %p139_p1 }
   0x5   : > { %s3390_s29 = smul.u32 (!%p140_p2), 77, %s2800_s13 }
   0x6   : > { %143 = sbr.rel (%p140_p2) target bundleno = 678 (0x2a6), region = 32 }
   0x7   : > { %p165_p3 = scmp.lt.s32.totalorder (!%p140_p2), %s3390_s29, 769 }
   0xb   : > { %v423_v0 = vld [vmem:[%s5046_s1 + $0x78] sm:$0xff]  ;;  %v422_v2 = vld [vmem:[%s5046_s1 + $0x70] sm:$0xff]  ;;  %v421_v5 = vld [vmem:[%s5046_s1 + $0x68] sm:$0xff]  ;;  %s5116_s29 = smov (!%p165_p3, %s3390_s29), 769 }
   0xc   : > { %v3298_v1 = vld [vmem:[%s5046_s1 + $0x178] sm:$0xff]  ;;  %2886 = vmatpush.msra.mxu3 %v423_v0  ;;  %v3307_v3 = vld [vmem:[%s5046_s1 + $0x170] sm:$0xff]  ;;  %460 = vmatpush.msra.mxu0 %v423_v0  ;;  %v3321_v6 = vld [vmem:[%s5046_s1 + $0x168] sm:$0xff]  ;;  %s2934_s15 = smul.u32 24, %s5116_s29  ;;  %s2806_s16 = sshll.u32 %s5116_s29, 3 }
   0xd   : > { %956 = vmatpush.msra.mxu2 %v3298_v1  ;;  %v3312_v4 = vld [vmem:[%s5046_s1 + $0xf8] sm:$0xff]  ;;  %v3326_v7 = vld [vmem:[%s5046_s1 + $0xf0] sm:$0xff]  ;;  %v3332_v8 = vld [vmem:[%s5046_s1 + $0xe8] sm:$0xff]  ;;  %s3682_s19 = scalar_lea.vmem %s5048_s3, %s2806_s16 }
   0xe   : > { %708 = vmatpush.msra.mxu1 %v3312_v4  ;;  %2887 = vmatpush.msra.mxu3 %v422_v2  ;;  %v420_v9 = vld [vmem:[%s5046_s1 + $0x60] sm:$0xff]  ;;  %v419_v12 = vld [vmem:[%s5046_s1 + $0x58] sm:$0xff]  ;;  %v418_v15 = vld [vmem:[%s5046_s1 + $0x50] sm:$0xff]  ;;  %s3522_s4 = scalar_lea.vmem %s5045_s0, %s2934_s15 }
   0xf   : > { %957 = vmatpush.msra.mxu2 %v3307_v3  ;;  %461 = vmatpush.msra.mxu0 %v422_v2  ;;  %v3341_v10 = vld [vmem:[%s5046_s1 + $0x160] sm:$0xff]  ;;  %v3356_v13 = vld [vmem:[%s5046_s1 + $0x158] sm:$0xff]  ;;  %v3371_v16 = vld [vmem:[%s5046_s1 + $0x150] sm:$0xff] }
  0x10   : > { %709 = vmatpush.msra.mxu1 %v3326_v7  ;;  %2888 = vmatpush.msra.mxu3 %v421_v5  ;;  %v3347_v11 = vld [vmem:[%s5046_s1 + $0xe0] sm:$0xff]  ;;  %v3362_v14 = vld [vmem:[%s5046_s1 + $0xd8] sm:$0xff]  ;;  %v3377_v17 = vld [vmem:[%s5046_s1 + $0xd0] sm:$0xff] }
  0x11   : > { %958 = vmatpush.msra.mxu2 %v3321_v6  ;;  %462 = vmatpush.msra.mxu0 %v421_v5  ;;  %v417_v18 = vld [vmem:[%s5046_s1 + $0x48] sm:$0xff]  ;;  %v416_v21 = vld [vmem:[%s5046_s1 + $0x40] sm:$0xff]  ;;  %v415_v24 = vld [vmem:[%s5046_s1 + $0x38] sm:$0xff] }
  0x12   : > { %710 = vmatpush.msra.mxu1 %v3332_v8  ;;  %2889 = vmatpush.msra.mxu3 %v420_v9  ;;  %v3386_v19 = vld [vmem:[%s5046_s1 + $0x148] sm:$0xff]  ;;  %v3405_v22 = vld [vmem:[%s5046_s1 + $0x140] sm:$0xff]  ;;  %v3420_v25 = vld [vmem:[%s5046_s1 + $0x138] sm:$0xff] }
  0x13   : > { %959 = vmatpush.msra.mxu2 %v3341_v10  ;;  %463 = vmatpush.msra.mxu0 %v420_v9  ;;  %v3396_v20 = vld [vmem:[%s5046_s1 + $0xc8] sm:$0xff]  ;;  %v3411_v23 = vld [vmem:[%s5046_s1 + $0xc0] sm:$0xff]  ;;  %v3427_v26 = vld [vmem:[%s5046_s1 + $0xb8] sm:$0xff] }
  0x14   : > { %711 = vmatpush.msra.mxu1 %v3347_v11  ;;  %2890 = vmatpush.msra.mxu3 %v419_v12  ;;  %v414_v27 = vld [vmem:[%s5046_s1 + $0x30] sm:$0xff]  ;;  %v413_v30 = vld [vmem:[%s5046_s1 + $0x28] sm:$0xff]  ;;  %v412_v33 = vld [vmem:[%s5046_s1 + $0x20] sm:$0xff] }
  0x15   : > { %960 = vmatpush.msra.mxu2 %v3356_v13  ;;  %464 = vmatpush.msra.mxu0 %v419_v12  ;;  %v3436_v28 = vld [vmem:[%s5046_s1 + $0x130] sm:$0xff]  ;;  %v3451_v31 = vld [vmem:[%s5046_s1 + $0x128] sm:$0xff]  ;;  %v3471_v34 = vld [vmem:[%s5046_s1 + $0x120] sm:$0xff] }
  0x16   : > { %712 = vmatpush.msra.mxu1 %v3362_v14  ;;  %2891 = vmatpush.msra.mxu3 %v418_v15  ;;  %v3442_v29 = vld [vmem:[%s5046_s1 + $0xb0] sm:$0xff]  ;;  %v3462_v32 = vld [vmem:[%s5046_s1 + $0xa8] sm:$0xff]  ;;  %v3477_v35 = vld [vmem:[%s5046_s1 + $0xa0] sm:$0xff] }
  0x17   : > { %961 = vmatpush.msra.mxu2 %v3371_v16  ;;  %465 = vmatpush.msra.mxu0 %v418_v15  ;;  %v411_v36 = vld [vmem:[%s5046_s1 + $0x18] sm:$0xff]  ;;  %v410_v39 = vld [vmem:[%s5046_s1 + $0x10] sm:$0xff]  ;;  %v409_v42 = vld [vmem:[%s5046_s1 + $0x8] sm:$0xff] }
  0x18   : > { %713 = vmatpush.msra.mxu1 %v3377_v17  ;;  %2892 = vmatpush.msra.mxu3 %v417_v18  ;;  %v3486_v37 = vld [vmem:[%s5046_s1 + $0x118] sm:$0xff]  ;;  %v3502_v40 = vld [vmem:[%s5046_s1 + $0x110] sm:$0xff]  ;;  %v3517_v43 = vld [vmem:[%s5046_s1 + $0x108] sm:$0xff] }
  0x19   : > { %962 = vmatpush.msra.mxu2 %v3386_v19  ;;  %466 = vmatpush.msra.mxu0 %v417_v18  ;;  %v3493_v38 = vld [vmem:[%s5046_s1 + $0x98] sm:$0xff]  ;;  %v3508_v41 = vld [vmem:[%s5046_s1 + $0x90] sm:$0xff]  ;;  %v3528_v44 = vld [vmem:[%s5046_s1 + $0x88] sm:$0xff] }
  0x1a   : > { %714 = vmatpush.msra.mxu1 %v3396_v20  ;;  %2893 = vmatpush.msra.mxu3 %v416_v21  ;;  %v408_v45 = vld [vmem:[%s5046_s1] sm:$0xff]  ;;  %v351_v47 = vld [vmem:[%s3522_s4 + $0x570] sm:$0xff]  ;;  %v178_v51 = vld [vmem:[%s3522_s4 + $0x8] sm:$0xff] }
  0x1b   : > { %963 = vmatpush.msra.mxu2 %v3405_v22  ;;  %467 = vmatpush.msra.mxu0 %v416_v21  ;;  %v3537_v46 = vld [vmem:[%s5046_s1 + $0x100] sm:$0xff]  ;;  %v179_v48 = vld [vmem:[%s3522_s4 + $0x10] sm:$0xff]  ;;  %v354_v52 = vld [vmem:[%s3522_s4 + $0x588] sm:$0xff] }
  0x1c   : > { %715 = vmatpush.msra.mxu1 %v3411_v23  ;;  %2894 = vmatpush.msra.mxu3 %v415_v24  ;;  %v424_v49 = vld [vmem:[%s5046_s1 + $0x80] sm:$0xff]  ;;  %v182_v53 = vld [vmem:[%s3522_s4 + $0x28] sm:$0xff]  ;;  %v180_v54 = vld [vmem:[%s3522_s4 + $0x18] sm:$0xff] }
  0x1d   : > { %964 = vmatpush.msra.mxu2 %v3420_v25  ;;  %468 = vmatpush.msra.mxu0 %v415_v24  ;;  %v177_v50 = vld [vmem:[%s3522_s4] sm:$0xff]  ;;  %v183_v58 = vld [vmem:[%s3522_s4 + $0x30] sm:$0xff]  ;;  %v184_v59 = vld [vmem:[%s3522_s4 + $0x38] sm:$0xff] }
  0x1e   : > { %716 = vmatpush.msra.mxu1 %v3427_v26  ;;  %2895 = vmatpush.msra.mxu3 %v414_v27  ;;  %v181_v55 = vld [vmem:[%s3522_s4 + $0x20] sm:$0xff]  ;;  %v360_v60 = vld [vmem:[%s3522_s4 + $0x5b8] sm:$0xff]  ;;  %v186_v62 = vld [vmem:[%s3522_s4 + $0x48] sm:$0xff] }
  0x1f   : > { %965 = vmatpush.msra.mxu2 %v3436_v28  ;;  %469 = vmatpush.msra.mxu0 %v414_v27  ;;  %v357_v56 = vld [vmem:[%s3522_s4 + $0x5a0] sm:$0xff]  ;;  %v188_v61 = vld [vmem:[%s3522_s4 + $0x58] sm:$0xff]  ;;  %v187_v63 = vld [vmem:[%s3522_s4 + $0x50] sm:$0xff] }
  0x20   : > { %717 = vmatpush.msra.mxu1 %v3442_v29  ;;  %2896 = vmatpush.msra.mxu3 %v413_v30  ;;  %v185_v57 = vld [vmem:[%s3522_s4 + $0x40] sm:$0xff]  ;;  %v363_v0 = vld [vmem:[%s3522_s4 + $0x5d0] sm:$0xff]  ;;  %v190_v5 = vld [vmem:[%s3522_s4 + $0x68] sm:$0xff] }
  0x21   : > { %966 = vmatpush.msra.mxu2 %v3451_v31  ;;  %470 = vmatpush.msra.mxu0 %v413_v30  ;;  %v191_v2 = vld [vmem:[%s3522_s4 + $0x70] sm:$0xff]  ;;  %v192_v9 = vld [vmem:[%s3522_s4 + $0x78] sm:$0xff]  ;;  %v197_v12 = vld [vmem:[%s3522_s4 + $0xa0] sm:$0xff] }
  0x22   : > { %718 = vmatpush.msra.mxu1 %v3462_v32  ;;  %2897 = vmatpush.msra.mxu3 %v412_v33  ;;  %v199_v15 = vld [vmem:[%s3522_s4 + $0xb0] sm:$0xff]  ;;  %v201_v18 = vld [vmem:[%s3522_s4 + $0xc0] sm:$0xff]  ;;  %v206_v21 = vld [vmem:[%s3522_s4 + $0xe8] sm:$0xff] }
  0x23   : > { %967 = vmatpush.msra.mxu2 %v3471_v34  ;;  %471 = vmatpush.msra.mxu0 %v412_v33  ;;  %v381_v24 = vld [vmem:[%s3522_s4 + $0x660] sm:$0xff]  ;;  %v208_v27 = vld [vmem:[%s3522_s4 + $0xf8] sm:$0xff]  ;;  %v210_v30 = vld [vmem:[%s3522_s4 + $0x108] sm:$0xff] }
  0x24   : > { %719 = vmatpush.msra.mxu1 %v3477_v35  ;;  %2898 = vmatpush.msra.mxu3 %v411_v36  ;;  %v215_v33 = vld [vmem:[%s3522_s4 + $0x130] sm:$0xff] }
  0x25   : > { %968 = vmatpush.msra.mxu2 %v3486_v37  ;;  %472 = vmatpush.msra.mxu0 %v411_v36  ;;  %v390_v36 = vld [vmem:[%s3522_s4 + $0x6a8] sm:$0xff] }
  0x26   : > { %720 = vmatpush.msra.mxu1 %v3493_v38  ;;  %2899 = vmatpush.msra.mxu3 %v410_v39 }
  0x27   : > { %969 = vmatpush.msra.mxu2 %v3502_v40  ;;  %473 = vmatpush.msra.mxu0 %v410_v39  ;;  %v217_v39 = vld [vmem:[%s3522_s4 + $0x140] sm:$0xff] }
  0x28   : > { %721 = vmatpush.msra.mxu1 %v3508_v41  ;;  %2900 = vmatpush.msra.mxu3 %v409_v42 }
  0x29   : > { %970 = vmatpush.msra.mxu2 %v3517_v43  ;;  %474 = vmatpush.msra.mxu0 %v409_v42  ;;  %v219_v42 = vld [vmem:[%s3522_s4 + $0x150] sm:$0xff] }
  0x2a   : > { %722 = vmatpush.msra.mxu1 %v3528_v44  ;;  %2901 = vmatpush.msra.mxu3 %v408_v45 }
  0x2b   : > { %971 = vmatpush.msra.mxu2 %v3537_v46  ;;  %650 = vmatmul.f32.vlgmr.msra.gmra.mxu3 %v351_v47  ;;  %v223_v47 = vld [vmem:[%s3522_s4 + $0x170] sm:$0xff] }
  0x2c   : > { %972 = vmatmul.f32.vlgmr.msra.gmra.mxu2 %v179_v48  ;;  %475 = vmatpush.msra.mxu0 %v408_v45  ;;  %v224_v45 = vld [vmem:[%s3522_s4 + $0x178] sm:$0xff]  ;;  %v3643_v48 = vld [vmem:[%s5047_s2] ss:$0 sm:$0xff] }
  0x2d   : > { %723 = vmatpush.msra.mxu1 %v424_v49  ;;  %476 = vmatmul.f32.vlgmr.msra.gmra.mxu0 %v177_v50  ;;  %v227_v50 = vld [vmem:[%s3522_s4 + $0x190] sm:$0xff] }
  0x2e   : > { %724 = vmatmul.f32.vlgmr.msra.gmra.mxu1 %v178_v51  ;;  %2902 = vmatpush.msrb.mxu3 %v3312_v4  ;;  %v189_v4 = vld [vmem:[%s3522_s4 + $0x60] sm:$0xff] }
  0x30   : > { %2903 = vmatpush.msrb.mxu3 %v3326_v7  ;;  %v366_v7 = vld [vmem:[%s3522_s4 + $0x5e8] sm:$0xff] }
  0x32   : > { %2904 = vmatpush.msrb.mxu3 %v3332_v8  ;;  %v194_v8 = vld [vmem:[%s3522_s4 + $0x88] sm:$0xff] }
  0x33   : > { %653 = vmatmul.f32.gmra.mxu3 %v354_v52 }
  0x34   : > { %975 = vmatmul.f32.gmra.mxu2 %v182_v53  ;;  %2905 = vmatpush.msrb.mxu3 %v3347_v11  ;;  %v193_v11 = vld [vmem:[%s3522_s4 + $0x80] sm:$0xff] }
  0x35   : > { %479 = vmatmul.f32.gmra.mxu0 %v180_v54  ;;  %v225_v53 = vld [vmem:[%s3522_s4 + $0x180] sm:$0xff]  ;;  %v226_v54 = vld [vmem:[%s3522_s4 + $0x188] sm:$0xff] }
  0x36   : > { %727 = vmatmul.f32.gmra.mxu1 %v181_v55  ;;  %2906 = vmatpush.msrb.mxu3 %v3362_v14  ;;  %v196_v14 = vld [vmem:[%s3522_s4 + $0x98] sm:$0xff] }
  0x38   : > { %2907 = vmatpush.msrb.mxu3 %v3377_v17  ;;  %v203_v17 = vld [vmem:[%s3522_s4 + $0xd0] sm:$0xff] }
  0x3a   : > { %2908 = vmatpush.msrb.mxu3 %v3396_v20  ;;  %v378_v20 = vld [vmem:[%s3522_s4 + $0x648] sm:$0xff] }
  0x3b   : > { %656 = vmatmul.f32.gmra.mxu3 %v357_v56 }
  0x3c   : > { %978 = vmatmul.f32.gmra.mxu2 %v185_v57  ;;  %2909 = vmatpush.msrb.mxu3 %v3411_v23  ;;  %v205_v23 = vld [vmem:[%s3522_s4 + $0xe0] sm:$0xff] }
  0x3d   : > { %482 = vmatmul.f32.gmra.mxu0 %v183_v58 }
  0x3e   : > { %730 = vmatmul.f32.gmra.mxu1 %v184_v59  ;;  %2910 = vmatpush.msrb.mxu3 %v3427_v26  ;;  %v207_v26 = vld [vmem:[%s3522_s4 + $0xf0] sm:$0xff] }
  0x40   : > { %2911 = vmatpush.msrb.mxu3 %v3442_v29  ;;  %v212_v29 = vld [vmem:[%s3522_s4 + $0x118] sm:$0xff] }
  0x42   : > { %2912 = vmatpush.msrb.mxu3 %v3462_v32  ;;  %v387_v32 = vld [vmem:[%s3522_s4 + $0x690] sm:$0xff] }
  0x43   : > { %659 = vmatmul.f32.gmra.mxu3 %v360_v60  ;;  %v402_v60 = vld [vmem:[%s3522_s4 + $0x708] sm:$0xff] }
  0x44   : > { %981 = vmatmul.f32.gmra.mxu2 %v188_v61  ;;  %2913 = vmatpush.msrb.mxu3 %v3477_v35  ;;  %v214_v35 = vld [vmem:[%s3522_s4 + $0x128] sm:$0xff] }
  0x45   : > { %485 = vmatmul.f32.gmra.mxu0 %v186_v62  ;;  %v230_v61 = vld [vmem:[%s3522_s4 + $0x1a8] sm:$0xff] }
  0x46   : > { %733 = vmatmul.f32.gmra.mxu1 %v187_v63  ;;  %2914 = vmatpush.msrb.mxu3 %v3493_v38  ;;  %v216_v38 = vld [vmem:[%s3522_s4 + $0x138] sm:$0xff] }
  0x48   : > { %2915 = vmatpush.msrb.mxu3 %v3508_v41  ;;  %v221_v41 = vld [vmem:[%s3522_s4 + $0x160] sm:$0xff] }
  0x4a   : > { %2916 = vmatpush.msrb.mxu3 %v3528_v44  ;;  %v396_v44 = vld [vmem:[%s3522_s4 + $0x6d8] sm:$0xff] }
  0x4b   : > { %662 = vmatmul.f32.gmra.mxu3 %v363_v0 }
  0x4c   : > { %984 = vmatmul.f32.gmra.mxu2 %v191_v2  ;;  %2917 = vmatpush.msrb.mxu3 %v424_v49  ;;  %v399_v49 = vld [vmem:[%s3522_s4 + $0x6f0] sm:$0xff]  ;;  %v228_v2 = vld [vmem:[%s3522_s4 + $0x198] sm:$0xff] }
  0x4d   : > { %488 = vmatmul.f32.gmra.mxu0 %v189_v4  ;;  %v229_v4 = vld [vmem:[%s3522_s4 + $0x1a0] sm:$0xff] }
  0x4e   : > { %736 = vmatmul.f32.gmra.mxu1 %v190_v5  ;;  %2918 = vmatpush.msra.mxu3 %v3298_v1  ;;  %v369_v1 = vld [vmem:[%s3522_s4 + $0x600] sm:$0xff] }
  0x50   : > { %2919 = vmatpush.msra.mxu3 %v3307_v3  ;;  %v195_v3 = vld [vmem:[%s3522_s4 + $0x90] sm:$0xff] }
  0x52   : > { %2920 = vmatpush.msra.mxu3 %v3321_v6  ;;  %v372_v6 = vld [vmem:[%s3522_s4 + $0x618] sm:$0xff] }
  0x53   : > { %665 = vmatmul.f32.gmra.mxu3 %v366_v7 }
  0x54   : > { %987 = vmatmul.f32.gmra.mxu2 %v194_v8  ;;  %2921 = vmatpush.msra.mxu3 %v3341_v10  ;;  %v200_v10 = vld [vmem:[%s3522_s4 + $0xb8] sm:$0xff] }
  0x55   : > { %491 = vmatmul.f32.gmra.mxu0 %v192_v9 }
  0x56   : > { %739 = vmatmul.f32.gmra.mxu1 %v193_v11  ;;  %2922 = vmatpush.msra.mxu3 %v3356_v13  ;;  %v198_v13 = vld [vmem:[%s3522_s4 + $0xa8] sm:$0xff] }
  0x58   : > { %2923 = vmatpush.msra.mxu3 %v3371_v16  ;;  %v375_v16 = vld [vmem:[%s3522_s4 + $0x630] sm:$0xff] }
  0x5a   : > { %2924 = vmatpush.msra.mxu3 %v3386_v19  ;;  %v202_v19 = vld [vmem:[%s3522_s4 + $0xc8] sm:$0xff] }
  0x5b   : > { %668 = vmatmul.f32.gmra.mxu3 %v369_v1  ;;  %v405_v1 = vld [vmem:[%s3522_s4 + $0x720] sm:$0xff] }
  0x5c   : > { %990 = vmatmul.f32.gmra.mxu2 %v197_v12  ;;  %2925 = vmatpush.msra.mxu3 %v3405_v22  ;;  %v204_v22 = vld [vmem:[%s3522_s4 + $0xd8] sm:$0xff]  ;;  %v233_v12 = vld [vmem:[%s3522_s4 + $0x1c0] sm:$0xff] }
  0x5d   : > { %494 = vmatmul.f32.gmra.mxu0 %v195_v3 }
  0x5e   : > { %742 = vmatmul.f32.gmra.mxu1 %v196_v14  ;;  %2926 = vmatpush.msra.mxu3 %v3420_v25  ;;  %v209_v25 = vld [vmem:[%s3522_s4 + $0x100] sm:$0xff] }
  0x60   : > { %2927 = vmatpush.msra.mxu3 %v3436_v28  ;;  %v384_v28 = vld [vmem:[%s3522_s4 + $0x678] sm:$0xff] }
  0x62   : > { %2928 = vmatpush.msra.mxu3 %v3451_v31  ;;  %v211_v31 = vld [vmem:[%s3522_s4 + $0x110] sm:$0xff] }
  0x63   : > { %671 = vmatmul.f32.gmra.mxu3 %v372_v6 }
  0x64   : > { %993 = vmatmul.f32.gmra.mxu2 %v200_v10  ;;  %2929 = vmatpush.msra.mxu3 %v3471_v34  ;;  %v213_v34 = vld [vmem:[%s3522_s4 + $0x120] sm:$0xff] }
  0x65   : > { %497 = vmatmul.f32.gmra.mxu0 %v198_v13 }
  0x66   : > { %745 = vmatmul.f32.gmra.mxu1 %v199_v15  ;;  %2930 = vmatpush.msra.mxu3 %v3486_v37  ;;  %v218_v37 = vld [vmem:[%s3522_s4 + $0x148] sm:$0xff]  ;;  %v231_v15 = vld [vmem:[%s3522_s4 + $0x1b0] sm:$0xff] }
  0x68   : > { %2931 = vmatpush.msra.mxu3 %v3502_v40  ;;  %v393_v40 = vld [vmem:[%s3522_s4 + $0x6c0] sm:$0xff] }
  0x6a   : > { %2932 = vmatpush.msra.mxu3 %v3517_v43  ;;  %v220_v43 = vld [vmem:[%s3522_s4 + $0x158] sm:$0xff] }
  0x6b   : > { %674 = vmatmul.f32.gmra.mxu3 %v375_v16  ;;  %v232_v16 = vld [vmem:[%s3522_s4 + $0x1b8] sm:$0xff] }
  0x6c   : > { %996 = vmatmul.f32.gmra.mxu2 %v203_v17  ;;  %2933 = vmatpush.msra.mxu3 %v3537_v46  ;;  %v222_v46 = vld [vmem:[%s3522_s4 + $0x168] sm:$0xff] }
  0x6d   : > { %500 = vmatmul.f32.gmra.mxu0 %v201_v18 }
  0x6e   : > { %748 = vmatmul.f32.gmra.mxu1 %v202_v19 }
  0x73   : > { %677 = vmatmul.f32.gmra.mxu3 %v378_v20 }
  0x74   : > { %999 = vmatmul.f32.gmra.mxu2 %v206_v21 }
  0x75   : > { %503 = vmatmul.f32.gmra.mxu0 %v204_v22  ;;  %v352_v22 = vld [vmem:[%s3522_s4 + $0x578] sm:$0xff] }
  0x76   : > { %751 = vmatmul.f32.gmra.mxu1 %v205_v23  ;;  %v236_v23 = vld [vmem:[%s3522_s4 + $0x1d8] sm:$0xff] }
  0x7b   : > { %680 = vmatmul.f32.gmra.mxu3 %v381_v24 }
  0x7c   : > { %1002 = vmatmul.f32.gmra.mxu2 %v209_v25 }
  0x7d   : > { %506 = vmatmul.f32.gmra.mxu0 %v207_v26 }
  0x7e   : > { %754 = vmatmul.f32.gmra.mxu1 %v208_v27 }
  0x83   : > { %683 = vmatmul.f32.gmra.mxu3 %v384_v28 }
  0x84   : > { %1005 = vmatmul.f32.gmra.mxu2 %v212_v29 }
  0x85   : > { %509 = vmatmul.f32.gmra.mxu0 %v210_v30  ;;  %v234_v30 = vld [vmem:[%s3522_s4 + $0x1c8] sm:$0xff] }
  0x86   : > { %757 = vmatmul.f32.gmra.mxu1 %v211_v31  ;;  %v235_v31 = vld [vmem:[%s3522_s4 + $0x1d0] sm:$0xff] }
  0x8b   : > { %686 = vmatmul.f32.gmra.mxu3 %v387_v32 }
  0x8c   : > { %1008 = vmatmul.f32.gmra.mxu2 %v215_v33 }
  0x8d   : > { %512 = vmatmul.f32.gmra.mxu0 %v213_v34 }
  0x8e   : > { %760 = vmatmul.f32.gmra.mxu1 %v214_v35 }
  0x93   : > { %689 = vmatmul.f32.gmra.mxu3 %v390_v36 }
  0x94   : > { %1011 = vmatmul.f32.gmra.mxu2 %v218_v37 }
  0x95   : > { %515 = vmatmul.f32.gmra.mxu0 %v216_v38 }
  0x96   : > { %763 = vmatmul.f32.gmra.mxu1 %v217_v39 }
  0x9b   : > { %692 = vmatmul.f32.gmra.mxu3 %v393_v40 }
  0x9c   : > { %1014 = vmatmul.f32.gmra.mxu2 %v221_v41 }
  0x9d   : > { %518 = vmatmul.f32.gmra.mxu0 %v219_v42  ;;  %v355_v42 = vld [vmem:[%s3522_s4 + $0x590] sm:$0xff] }
  0x9e   : > { %766 = vmatmul.f32.gmra.mxu1 %v220_v43  ;;  %v239_v43 = vld [vmem:[%s3522_s4 + $0x1f0] sm:$0xff] }
  0xa3   : > { %695 = vmatmul.f32.gmra.mxu3 %v396_v44 }
  0xa4   : > { %1017 = vmatmul.f32.gmra.mxu2 %v224_v45 }
  0xa5   : > { %521 = vmatmul.f32.gmra.mxu0 %v222_v46 }
  0xa6   : > { %769 = vmatmul.f32.gmra.mxu1 %v223_v47 }
  0xaa   : > { %v477_v51 = vpop.f32.mrf.mxu0 }
  0xab   : > { %v725_v52 = vpop.f32.mrf.mxu1  ;;  %v478_v55 = vadd.f32 %v3643_v48, %v477_v51  ;;  %698 = vmatmul.f32.gmra.mxu3 %v399_v49 }
  0xac   : > { %1020 = vmatmul.f32.gmra.mxu2 %v227_v50 }
  0xad   : > { %v726_v56 = vadd.f32 %v725_v52, %v478_v55  ;;  %524 = vmatmul.f32.gmra.mxu0 %v225_v53  ;;  %v237_v53 = vld [vmem:[%s3522_s4 + $0x1e0] sm:$0xff] }
  0xae   : > { %772 = vmatmul.f32.gmra.mxu1 %v226_v54  ;;  %v3650_v57 = vpop.f32.mrf.mxu3  ;;  %v238_v54 = vld [vmem:[%s3522_s4 + $0x1e8] sm:$0xff] }
  0xaf   : > { %v973_v58 = vpop.f32.mrf.mxu2 }
  0xb0   : > { %v974_v59 = vadd.f32 %v973_v58, %v726_v56 }
  0xb2   : > { %v2807_v62 = vmul.f32 -1.442695, %v974_v59  ;;  %v480_v63 = vpop.f32.mrf.mxu0 }
  0xb3   : > { %v728_v0 = vpop.f32.mrf.mxu1  ;;  %v481_v5 = vadd.f32 %v3643_v48, %v480_v63  ;;  %701 = vmatmul.f32.gmra.mxu3 %v402_v60 }
  0xb4   : > { %2944 = vpow2.f32 %v2807_v62  ;;  %1023 = vmatmul.f32.gmra.mxu2 %v230_v61 }
  0xb5   : > { %v729_v7 = vadd.f32 %v728_v0, %v481_v5  ;;  %527 = vmatmul.f32.gmra.mxu0 %v228_v2  ;;  %v358_v5 = vld [vmem:[%s3522_s4 + $0x5a8] sm:$0xff] }
  0xb6   : > { %775 = vmatmul.f32.gmra.mxu1 %v229_v4  ;;  %v3657_v8 = vpop.f32.mrf.mxu3 }
  0xb7   : > { %v976_v9 = vpop.f32.mrf.mxu2 }
  0xb8   : > { %v977_v11 = vadd.f32 %v976_v9, %v729_v7  ;;  %v242_v7 = vld [vmem:[%s3522_s4 + $0x208] sm:$0xff] }
  0xba   : > { %v2945_v3 = vpop.eup %2944  ;;  %v2808_v14 = vmul.f32 -1.442695, %v977_v11  ;;  %v483_v10 = vpop.f32.mrf.mxu0 }
  0xbb   : > { %v1435_v6 = vadd.f32 1.0, %v2945_v3  ;;  %v731_v13 = vpop.f32.mrf.mxu1  ;;  %v484_v17 = vadd.f32 %v3643_v48, %v483_v10  ;;  %704 = vmatmul.f32.gmra.mxu3 %v405_v1 }
  0xbc   : > { %2946 = vpow2.f32 %v2808_v14  ;;  %1026 = vmatmul.f32.gmra.mxu2 %v233_v12 }
  0xbd   : > { %2948 = vrcp.f32 %v1435_v6  ;;  %v732_v18 = vadd.f32 %v731_v13, %v484_v17  ;;  %530 = vmatmul.f32.gmra.mxu0 %v231_v15  ;;  %v1523_v36 = vand.u32 2147483648, %v1435_v6  ;;  %v1521_v40 = vand.u32 2147483647, %v1435_v6  ;;  %v240_v13 = vld [vmem:[%s3522_s4 + $0x1f8] sm:$0xff]  ;;  %v241_v15 = vld [vmem:[%s3522_s4 + $0x200] sm:$0xff] }
  0xbe   : > { %778 = vmatmul.f32.gmra.mxu1 %v232_v16  ;;  %v3664_v19 = vpop.f32.mrf.mxu3  ;;  %vm1517_vm1 = vweird.f32 %v1435_v6 }
  0xbf   : > { %v979_v20 = vpop.f32.mrf.mxu2  ;;  %v1524_v49 = vor.u32 1.1754944e-38, %v1523_v36  ;;  %vm1522_vm3 = vcmp.eq.f32.partialorder %v1521_v40, 8.507059e+37 }
  0xc0   : > { %v980_v21 = vadd.f32 %v979_v20, %v732_v18 }
  0xc2   : > { %v2947_v24 = vpop.eup %2946  ;;  %v2809_v25 = vmul.f32 -1.442695, %v980_v21  ;;  %v486_v28 = vpop.f32.mrf.mxu0 }
  0xc3   : > { %v2949_v26 = vpop.eup %2948  ;;  %v3668_v27 = vadd.f32 1.0, %v2947_v24  ;;  %v734_v29 = vpop.f32.mrf.mxu1  ;;  %v487_v33 = vadd.f32 %v3643_v48, %v486_v28  ;;  %898 = vmatmul.f32.vlgmr.msrb.gmra.mxu3 %v352_v22 }
  0xc4   : > { %v1513_v32 = vmul.f32 %v2949_v26, %v1435_v6  ;;  %2950 = vpow2.f32 %v2809_v25  ;;  %1029 = vmatmul.f32.gmra.mxu2 %v236_v23  ;;  %vm1518_vm0 = vweird.f32 %v2949_v26 }
  0xc5   : > { %2952 = vrcp.f32 %v3668_v27  ;;  %v735_v35 = vadd.f32 %v734_v29, %v487_v33  ;;  %533 = vmatmul.f32.gmra.mxu0 %v234_v30  ;;  %vm1519_vm2 = vmor %vm1517_vm1, %vm1518_vm0  ;;  %v1538_v61 = vand.u32 2147483648, %v3668_v27  ;;  %v1536_v2 = vand.u32 2147483647, %v3668_v27  ;;  %v361_v29 = vld [vmem:[%s3522_s4 + $0x5c0] sm:$0xff] }
  0xc6   : > { %v1514_v34 = vsub.f32 1.0, %v1513_v32  ;;  %781 = vmatmul.f32.gmra.mxu1 %v235_v31  ;;  %v3674_v37 = vpop.f32.mrf.mxu3  ;;  %vm1532_vm5 = vweird.f32 %v3668_v27  ;;  %v245_v30 = vld [vmem:[%s3522_s4 + $0x220] sm:$0xff] }
  0xc7   : > { %v982_v38 = vpop.f32.mrf.mxu2  ;;  %v1539_v3 = vor.u32 1.1754944e-38, %v1538_v61  ;;  %vm1537_vm7 = vcmp.eq.f32.partialorder %v1536_v2, 8.507059e+37  ;;  %v247_v2 = vld [vmem:[%s3522_s4 + $0x230] sm:$0xff] }
  0xc8   : > { %v1515_v39 = vmul.f32 %v2949_v26, %v1514_v34  ;;  %v983_v41 = vadd.f32 %v982_v38, %v735_v35  ;;  %v243_v38 = vld [vmem:[%s3522_s4 + $0x210] sm:$0xff] }
  0xca   : > { %v2951_v44 = vpop.eup %2950  ;;  %v1516_v45 = vadd.f32 %v2949_v26, %v1515_v39  ;;  %v2810_v46 = vmul.f32 -1.442695, %v983_v41  ;;  %v489_v51 = vpop.f32.mrf.mxu0  ;;  %v244_v39 = vld [vmem:[%s3522_s4 + $0x218] sm:$0xff] }
  0xcb   : > { %v2953_v47 = vpop.eup %2952  ;;  %v3684_v50 = vadd.f32 1.0, %v2951_v44  ;;  %v737_v52 = vpop.f32.mrf.mxu1  ;;  %901 = vmatmul.f32.gmra.mxu3 %v355_v42  ;;  %v490_v60 = vadd.f32 %v3643_v48, %v489_v51 }
  0xcc   : > { %v1520_v55 = vsel %vm1519_vm2, %v2949_v26, %v1516_v45  ;;  %v1528_v56 = vmul.f32 %v2953_v47, %v3668_v27  ;;  %2954 = vpow2.f32 %v2810_v46  ;;  %1032 = vmatmul.f32.gmra.mxu2 %v239_v43  ;;  %vm1533_vm4 = vweird.f32 %v2953_v47 }
  0xcd   : > { %v1525_v58 = vsel %vm1522_vm3, %v1524_v49, %v1520_v55  ;;  %2956 = vrcp.f32 %v3684_v50  ;;  %536 = vmatmul.f32.gmra.mxu0 %v237_v53  ;;  %v738_v4 = vadd.f32 %v737_v52, %v490_v60  ;;  %vm1534_vm6 = vmor %vm1532_vm5, %vm1533_vm4  ;;  %v1553_v23 = vand.u32 2147483648, %v3684_v50  ;;  %v364_v55 = vld [vmem:[%s3522_s4 + $0x5d8] sm:$0xff] }
  0xce   : > { %2667 = vst [vmem:[%s3682_s19] sm:$0xff] %v1525_v58  ;;  %v1529_v59 = vsub.f32 1.0, %v1528_v56  ;;  %784 = vmatmul.f32.gmra.mxu1 %v238_v54  ;;  %v3693_v62 = vpop.f32.mrf.mxu3  ;;  %v1551_v27 = vand.u32 2147483647, %v3684_v50  ;;  %vm1547_vm9 = vweird.f32 %v3684_v50  ;;  %v248_v56 = vld [vmem:[%s3522_s4 + $0x238] sm:$0xff] }
  0xcf   : > { %v985_v63 = vpop.f32.mrf.mxu2  ;;  %v1554_v34 = vor.u32 1.1754944e-38, %v1553_v23 }
  0xd0   : > { %v1530_v0 = vmul.f32 %v2953_v47, %v1529_v59  ;;  %v986_v1 = vadd.f32 %v985_v63, %v738_v4  ;;  %vm1552_vm11 = vcmp.eq.f32.partialorder %v1551_v27, 8.507059e+37  ;;  %v250_v27 = vld [vmem:[%s3522_s4 + $0x248] sm:$0xff] }
  0xd2   : > { %v2955_v9 = vpop.eup %2954  ;;  %v1531_v11 = vadd.f32 %v2953_v47, %v1530_v0  ;;  %v492_v6 = vpop.f32.mrf.mxu0  ;;  %v2811_v18 = vmul.f32 -1.442695, %v986_v1  ;;  %v246_v0 = vld [vmem:[%s3522_s4 + $0x228] sm:$0xff] }
  0xd3   : > { %v2957_v12 = vpop.eup %2956  ;;  %v3699_v14 = vadd.f32 1.0, %v2955_v9  ;;  %v740_v10 = vpop.f32.mrf.mxu1  ;;  %904 = vmatmul.f32.gmra.mxu3 %v358_v5  ;;  %v493_v22 = vadd.f32 %v3643_v48, %v492_v6 }
  0xd4   : > { %v1535_v16 = vsel %vm1534_vm6, %v2953_v47, %v1531_v11  ;;  %v1543_v17 = vmul.f32 %v2957_v12, %v3684_v50  ;;  %1035 = vmatmul.f32.gmra.mxu2 %v242_v7  ;;  %vm1548_vm8 = vweird.f32 %v2957_v12 }
  0xd5   : > { %v1540_v20 = vsel %vm1537_vm7, %v1539_v3, %v1535_v16  ;;  %2958 = vrcp.f32 %v3699_v14  ;;  %539 = vmatmul.f32.gmra.mxu0 %v240_v13  ;;  %v741_v28 = vadd.f32 %v740_v10, %v493_v22  ;;  %vm1549_vm10 = vmor %vm1547_vm9, %vm1548_vm8  ;;  %v1568_v49 = vand.u32 2147483648, %v3699_v14 }
  0xd6   : > { %2668 = vst [vmem:[%s3682_s19 + $0x8] sm:$0xff] %v1540_v20  ;;  %v1544_v21 = vsub.f32 1.0, %v1543_v17  ;;  %2960 = vpow2.f32 %v2811_v18  ;;  %787 = vmatmul.f32.gmra.mxu1 %v241_v15  ;;  %v3708_v24 = vpop.f32.mrf.mxu3  ;;  %v1566_v53 = vand.u32 2147483647, %v3699_v14  ;;  %vm1562_vm13 = vweird.f32 %v3699_v14  ;;  %v367_v17 = vld [vmem:[%s3522_s4 + $0x5f0] sm:$0xff] }
  0xd7   : > { %v988_v25 = vpop.f32.mrf.mxu2  ;;  %v1569_v60 = vor.u32 1.1754944e-38, %v1568_v49  ;;  %v251_v18 = vld [vmem:[%s3522_s4 + $0x250] sm:$0xff] }
  0xd8   : > { %v1545_v26 = vmul.f32 %v2957_v12, %v1544_v21  ;;  %v989_v32 = vadd.f32 %v988_v25, %v741_v28  ;;  %vm1567_vm15 = vcmp.eq.f32.partialorder %v1566_v53, 8.507059e+37 }
  0xda   : > { %v1546_v31 = vadd.f32 %v2957_v12, %v1545_v26  ;;  %v495_v35 = vpop.f32.mrf.mxu0  ;;  %v2812_v43 = vmul.f32 -1.442695, %v989_v32  ;;  %v249_v26 = vld [vmem:[%s3522_s4 + $0x240] sm:$0xff] }
  0xdb   : > { %v2959_v33 = vpop.eup %2958  ;;  %v743_v36 = vpop.f32.mrf.mxu1  ;;  %907 = vmatmul.f32.gmra.mxu3 %v361_v29  ;;  %v496_v46 = vadd.f32 %v3643_v48, %v495_v35 }
  0xdc   : > { %v2961_v40 = vpop.eup %2960  ;;  %v1550_v41 = vsel %vm1549_vm10, %v2957_v12, %v1546_v31  ;;  %v1558_v42 = vmul.f32 %v2959_v33, %v3699_v14  ;;  %1038 = vmatmul.f32.gmra.mxu2 %v245_v30  ;;  %2962 = vpow2.f32 %v2812_v43  ;;  %vm1563_vm12 = vweird.f32 %v2959_v33 }
  0xdd   : > { %v1555_v44 = vsel %vm1552_vm11, %v1554_v34, %v1550_v41  ;;  %v3717_v45 = vadd.f32 1.0, %v2961_v40  ;;  %542 = vmatmul.f32.gmra.mxu0 %v243_v38  ;;  %v744_v54 = vadd.f32 %v743_v36, %v496_v46  ;;  %vm1564_vm14 = vmor %vm1562_vm13, %vm1563_vm12 }
  0xde   : > { %2669 = vst [vmem:[%s3682_s19 + $0x10] sm:$0xff] %v1555_v44  ;;  %v1559_v47 = vsub.f32 1.0, %v1558_v42  ;;  %790 = vmatmul.f32.gmra.mxu1 %v244_v39  ;;  %v3723_v50 = vpop.f32.mrf.mxu3  ;;  %v370_v44 = vld [vmem:[%s3522_s4 + $0x608] sm:$0xff] }
  0xdf   : > { %2964 = vrcp.f32 %v3717_v45  ;;  %v991_v51 = vpop.f32.mrf.mxu2  ;;  %v1583_v16 = vand.u32 2147483648, %v3717_v45  ;;  %v1581_v21 = vand.u32 2147483647, %v3717_v45  ;;  %vm1577_vm1 = vweird.f32 %v3717_v45 }
  0xe0   : > { %v1560_v52 = vmul.f32 %v2959_v33, %v1559_v47  ;;  %v992_v59 = vadd.f32 %v991_v51, %v744_v54 }
  0xe1   : > { %v1584_v32 = vor.u32 1.1754944e-38, %v1583_v16  ;;  %vm1582_vm3 = vcmp.eq.f32.partialorder %v1581_v21, 8.507059e+37  ;;  %v255_v21 = vld [vmem:[%s3522_s4 + $0x270] sm:$0xff] }
  0xe2   : > { %v1561_v58 = vadd.f32 %v2959_v33, %v1560_v52  ;;  %v498_v61 = vpop.f32.mrf.mxu0  ;;  %v2963_v4 = vpop.eup %2962  ;;  %v2813_v7 = vmul.f32 -1.442695, %v992_v59 }
  0xe3   : > { %v746_v63 = vpop.f32.mrf.mxu1  ;;  %v499_v9 = vadd.f32 %v3643_v48, %v498_v61  ;;  %910 = vmatmul.f32.gmra.mxu3 %v364_v55  ;;  %v3732_v12 = vadd.f32 1.0, %v2963_v4  ;;  %v252_v55 = vld [vmem:[%s3522_s4 + $0x258] sm:$0xff] }
  0xe4   : > { %v1565_v5 = vsel %vm1564_vm14, %v2959_v33, %v1561_v58  ;;  %1041 = vmatmul.f32.gmra.mxu2 %v248_v56  ;;  %2966 = vpow2.f32 %v2813_v7  ;;  %v253_v56 = vld [vmem:[%s3522_s4 + $0x260] sm:$0xff] }
  0xe5   : > { %v2965_v11 = vpop.eup %2964  ;;  %v1570_v1 = vsel %vm1567_vm15, %v1569_v60, %v1565_v5  ;;  %v747_v14 = vadd.f32 %v746_v63, %v499_v9  ;;  %545 = vmatmul.f32.gmra.mxu0 %v246_v0  ;;  %2968 = vrcp.f32 %v3732_v12  ;;  %v1598_v43 = vand.u32 2147483648, %v3732_v12 }
  0xe6   : > { %2670 = vst [vmem:[%s3682_s19 + $0x18] sm:$0xff] %v1570_v1  ;;  %v1573_v3 = vmul.f32 %v2965_v11, %v3717_v45  ;;  %793 = vmatmul.f32.gmra.mxu1 %v247_v2  ;;  %v3737_v6 = vpop.f32.mrf.mxu3  ;;  %vm1578_vm0 = vweird.f32 %v2965_v11  ;;  %v254_v45 = vld [vmem:[%s3522_s4 + $0x268] sm:$0xff]  ;;  %v1596_v49 = vand.u32 2147483647, %v3732_v12  ;;  %vm1592_vm5 = vweird.f32 %v3732_v12 }
  0xe7   : > { %v994_v10 = vpop.f32.mrf.mxu2  ;;  %vm1579_vm2 = vmor %vm1577_vm1, %vm1578_vm0  ;;  %v1599_v61 = vor.u32 1.1754944e-38, %v1598_v43 }
  0xe8   : > { %v1574_v13 = vsub.f32 1.0, %v1573_v3  ;;  %v995_v15 = vadd.f32 %v994_v10, %v747_v14  ;;  %vm1597_vm7 = vcmp.eq.f32.partialorder %v1596_v49, 8.507059e+37  ;;  %v257_v3 = vld [vmem:[%s3522_s4 + $0x280] sm:$0xff] }
  0xea   : > { %v1575_v20 = vmul.f32 %v2965_v11, %v1574_v13  ;;  %v2814_v22 = vmul.f32 -1.442695, %v995_v15  ;;  %v501_v23 = vpop.f32.mrf.mxu0  ;;  %v2967_v28 = vpop.eup %2966 }
  0xeb   : > { %v749_v25 = vpop.f32.mrf.mxu1  ;;  %v502_v30 = vadd.f32 %v3643_v48, %v501_v23  ;;  %913 = vmatmul.f32.gmra.mxu3 %v367_v17  ;;  %v2969_v31 = vpop.eup %2968  ;;  %v3748_v33 = vadd.f32 1.0, %v2967_v28 }
  0xec   : > { %v1576_v29 = vadd.f32 %v2965_v11, %v1575_v20  ;;  %2970 = vpow2.f32 %v2814_v22  ;;  %1044 = vmatmul.f32.gmra.mxu2 %v251_v18  ;;  %v1588_v35 = vmul.f32 %v2969_v31, %v3732_v12  ;;  %vm1593_vm4 = vweird.f32 %v2969_v31  ;;  %v373_v12 = vld [vmem:[%s3522_s4 + $0x620] sm:$0xff]  ;;  %v256_v22 = vld [vmem:[%s3522_s4 + $0x278] sm:$0xff] }
  0xed   : > { %v750_v36 = vadd.f32 %v749_v25, %v502_v30  ;;  %548 = vmatmul.f32.gmra.mxu0 %v249_v26  ;;  %2972 = vrcp.f32 %v3748_v33  ;;  %vm1594_vm6 = vmor %vm1592_vm5, %vm1593_vm4  ;;  %v1613_v1 = vand.u32 2147483648, %v3748_v33  ;;  %v1611_v13 = vand.u32 2147483647, %v3748_v33 }
  0xee   : > { %v1580_v34 = vsel %vm1579_vm2, %v2965_v11, %v1576_v29  ;;  %796 = vmatmul.f32.gmra.mxu1 %v250_v27  ;;  %v3752_v39 = vpop.f32.mrf.mxu3  ;;  %v1589_v41 = vsub.f32 1.0, %v1588_v35  ;;  %vm1607_vm9 = vweird.f32 %v3748_v33 }
  0xef   : > { %v1585_v38 = vsel %vm1582_vm3, %v1584_v32, %v1580_v34  ;;  %v997_v40 = vpop.f32.mrf.mxu2  ;;  %v1614_v26 = vor.u32 1.1754944e-38, %v1613_v1  ;;  %vm1612_vm11 = vcmp.eq.f32.partialorder %v1611_v13, 8.507059e+37  ;;  %v261_v13 = vld [vmem:[%s3522_s4 + $0x2a0] sm:$0xff] }
  0xf0   : > { %2671 = vst [vmem:[%s3682_s19 + $0x20] sm:$0xff] %v1585_v38  ;;  %v998_v42 = vadd.f32 %v997_v40, %v750_v36  ;;  %v1590_v47 = vmul.f32 %v2969_v31, %v1589_v41  ;;  %v376_v38 = vld [vmem:[%s3522_s4 + $0x638] sm:$0xff] }
  0xf1   : > { %v260_v40 = vld [vmem:[%s3522_s4 + $0x298] sm:$0xff] }
  0xf2   : > { %v2971_v46 = vpop.eup %2970  ;;  %v2815_v51 = vmul.f32 -1.442695, %v998_v42  ;;  %v504_v53 = vpop.f32.mrf.mxu0  ;;  %v1591_v58 = vadd.f32 %v2969_v31, %v1590_v47 }
  0xf3   : > { %v3759_v52 = vadd.f32 1.0, %v2971_v46  ;;  %v752_v54 = vpop.f32.mrf.mxu1  ;;  %v505_v59 = vadd.f32 %v3643_v48, %v504_v53  ;;  %916 = vmatmul.f32.gmra.mxu3 %v370_v44  ;;  %v2973_v60 = vpop.eup %2972  ;;  %v259_v53 = vld [vmem:[%s3522_s4 + $0x290] sm:$0xff] }
  0xf4   : > { %2974 = vpow2.f32 %v2815_v51  ;;  %1047 = vmatmul.f32.gmra.mxu2 %v254_v45  ;;  %v1595_v63 = vsel %vm1594_vm6, %v2969_v31, %v1591_v58  ;;  %v1603_v0 = vmul.f32 %v2973_v60, %v3748_v33  ;;  %vm1608_vm8 = vweird.f32 %v2973_v60  ;;  %v258_v51 = vld [vmem:[%s3522_s4 + $0x288] sm:$0xff] }
  0xf5   : > { %2976 = vrcp.f32 %v3759_v52  ;;  %v753_v2 = vadd.f32 %v752_v54, %v505_v59  ;;  %551 = vmatmul.f32.gmra.mxu0 %v252_v55  ;;  %v1600_v4 = vsel %vm1597_vm7, %v1599_v61, %v1595_v63  ;;  %vm1609_vm10 = vmor %vm1607_vm9, %vm1608_vm8  ;;  %v1628_v31 = vand.u32 2147483648, %v3759_v52 }
  0xf6   : > { %799 = vmatmul.f32.gmra.mxu1 %v253_v56  ;;  %v3768_v5 = vpop.f32.mrf.mxu3  ;;  %2672 = vst [vmem:[%s3682_s19 + $0x28] sm:$0xff] %v1600_v4  ;;  %v1604_v9 = vsub.f32 1.0, %v1603_v0  ;;  %v1626_v35 = vand.u32 2147483647, %v3759_v52  ;;  %vm1622_vm13 = vweird.f32 %v3759_v52 }
  0xf7   : > { %v1000_v7 = vpop.f32.mrf.mxu2  ;;  %v1629_v45 = vor.u32 1.1754944e-38, %v1628_v31 }
  0xf8   : > { %v1001_v11 = vadd.f32 %v1000_v7, %v753_v2  ;;  %v1605_v10 = vmul.f32 %v2973_v60, %v1604_v9  ;;  %vm1627_vm15 = vcmp.eq.f32.partialorder %v1626_v35, 8.507059e+37  ;;  %v379_v7 = vld [vmem:[%s3522_s4 + $0x650] sm:$0xff] }
  0xf9   : > { %v263_v9 = vld [vmem:[%s3522_s4 + $0x2b0] sm:$0xff] }
  0xfa   : > { %v2975_v14 = vpop.eup %2974  ;;  %v2816_v15 = vmul.f32 -1.442695, %v1001_v11  ;;  %v507_v18 = vpop.f32.mrf.mxu0  ;;  %v1606_v23 = vadd.f32 %v2973_v60, %v1605_v10 }
  0xfb   : > { %v2977_v16 = vpop.eup %2976  ;;  %v3775_v17 = vadd.f32 1.0, %v2975_v14  ;;  %v755_v20 = vpop.f32.mrf.mxu1  ;;  %919 = vmatmul.f32.gmra.mxu3 %v373_v12  ;;  %v508_v29 = vadd.f32 %v3643_v48, %v507_v18 }
  0xfc   : > { %v1618_v25 = vmul.f32 %v2977_v16, %v3759_v52  ;;  %2978 = vpow2.f32 %v2816_v15  ;;  %1050 = vmatmul.f32.gmra.mxu2 %v257_v3  ;;  %v1610_v27 = vsel %vm1609_vm10, %v2973_v60, %v1606_v23  ;;  %vm1623_vm12 = vweird.f32 %v2977_v16  ;;  %v262_v15 = vld [vmem:[%s3522_s4 + $0x2a8] sm:$0xff] }
  0xfd   : > { %2980 = vrcp.f32 %v3775_v17  ;;  %554 = vmatmul.f32.gmra.mxu0 %v255_v21  ;;  %v1615_v30 = vsel %vm1612_vm11, %v1614_v26, %v1610_v27  ;;  %v756_v36 = vadd.f32 %v755_v20, %v508_v29  ;;  %vm1624_vm14 = vmor %vm1622_vm13, %vm1623_vm12  ;;  %v1643_v60 = vand.u32 2147483648, %v3775_v17 }
  0xfe   : > { %v1619_v28 = vsub.f32 1.0, %v1618_v25  ;;  %802 = vmatmul.f32.gmra.mxu1 %v256_v22  ;;  %v3785_v32 = vpop.f32.mrf.mxu3  ;;  %2673 = vst [vmem:[%s3682_s19 + $0x30] sm:$0xff] %v1615_v30  ;;  %v1641_v2 = vand.u32 2147483647, %v3775_v17  ;;  %vm1637_vm1 = vweird.f32 %v3775_v17 }
  0xff   : > { %v1003_v33 = vpop.f32.mrf.mxu2  ;;  %v1644_v3 = vor.u32 1.1754944e-38, %v1643_v60 }
 0x100   : > { %v1620_v34 = vmul.f32 %v2977_v16, %v1619_v28  ;;  %v1004_v43 = vadd.f32 %v1003_v33, %v756_v36  ;;  %vm1642_vm3 = vcmp.eq.f32.partialorder %v1641_v2, 8.507059e+37  ;;  %v382_v33 = vld [vmem:[%s3522_s4 + $0x668] sm:$0xff] }
 0x102   : > { %v2979_v41 = vpop.eup %2978  ;;  %v1621_v42 = vadd.f32 %v2977_v16, %v1620_v34  ;;  %v510_v47 = vpop.f32.mrf.mxu0  ;;  %v2817_v56 = vmul.f32 -1.442695, %v1004_v43  ;;  %v266_v34 = vld [vmem:[%s3522_s4 + $0x2c8] sm:$0xff]  ;;  %v265_v43 = vld [vmem:[%s3522_s4 + $0x2c0] sm:$0xff] }
 0x103   : > { %v2981_v44 = vpop.eup %2980  ;;  %v3792_v46 = vadd.f32 1.0, %v2979_v41  ;;  %v758_v49 = vpop.f32.mrf.mxu1  ;;  %922 = vmatmul.f32.gmra.mxu3 %v376_v38  ;;  %v511_v59 = vadd.f32 %v3643_v48, %v510_v47 }
 0x104   : > { %v1625_v54 = vsel %vm1624_vm14, %v2977_v16, %v1621_v42  ;;  %v1633_v55 = vmul.f32 %v2981_v44, %v3775_v17  ;;  %1053 = vmatmul.f32.gmra.mxu2 %v260_v40  ;;  %vm1638_vm0 = vweird.f32 %v2981_v44  ;;  %v264_v42 = vld [vmem:[%s3522_s4 + $0x2b8] sm:$0xff] }
 0x105   : > { %v1630_v52 = vsel %vm1627_vm15, %v1629_v45, %v1625_v54  ;;  %2982 = vrcp.f32 %v3792_v46  ;;  %557 = vmatmul.f32.gmra.mxu0 %v258_v51  ;;  %v759_v4 = vadd.f32 %v758_v49, %v511_v59  ;;  %vm1639_vm2 = vmor %vm1637_vm1, %vm1638_vm0  ;;  %v1658_v26 = vand.u32 2147483648, %v3792_v46 }
 0x106   : > { %2674 = vst [vmem:[%s3682_s19 + $0x38] sm:$0xff] %v1630_v52  ;;  %v1634_v58 = vsub.f32 1.0, %v1633_v55  ;;  %2984 = vpow2.f32 %v2817_v56  ;;  %805 = vmatmul.f32.gmra.mxu1 %v259_v53  ;;  %v3801_v61 = vpop.f32.mrf.mxu3  ;;  %v1656_v30 = vand.u32 2147483647, %v3792_v46  ;;  %vm1652_vm5 = vweird.f32 %v3792_v46 }
 0x107   : > { %v1006_v63 = vpop.f32.mrf.mxu2  ;;  %v1659_v38 = vor.u32 1.1754944e-38, %v1658_v26 }
 0x108   : > { %v1635_v0 = vmul.f32 %v2981_v44, %v1634_v58  ;;  %v1007_v1 = vadd.f32 %v1006_v63, %v759_v4  ;;  %vm1657_vm7 = vcmp.eq.f32.partialorder %v1656_v30, 8.507059e+37  ;;  %v385_v63 = vld [vmem:[%s3522_s4 + $0x680] sm:$0xff]  ;;  %v272_v30 = vld [vmem:[%s3522_s4 + $0x2f8] sm:$0xff] }
 0x10a   : > { %v1636_v11 = vadd.f32 %v2981_v44, %v1635_v0  ;;  %v513_v14 = vpop.f32.mrf.mxu0  ;;  %v2818_v21 = vmul.f32 -1.442695, %v1007_v1  ;;  %v269_v0 = vld [vmem:[%s3522_s4 + $0x2e0] sm:$0xff]  ;;  %v267_v1 = vld [vmem:[%s3522_s4 + $0x2d0] sm:$0xff] }
 0x10b   : > { %v2983_v12 = vpop.eup %2982  ;;  %v761_v10 = vpop.f32.mrf.mxu1  ;;  %925 = vmatmul.f32.gmra.mxu3 %v379_v7  ;;  %v514_v23 = vadd.f32 %v3643_v48, %v513_v14 }
 0x10c   : > { %v2985_v16 = vpop.eup %2984  ;;  %v1640_v18 = vsel %vm1639_vm2, %v2981_v44, %v1636_v11  ;;  %v1648_v20 = vmul.f32 %v2983_v12, %v3792_v46  ;;  %1056 = vmatmul.f32.gmra.mxu2 %v263_v9  ;;  %2986 = vpow2.f32 %v2818_v21  ;;  %vm1653_vm4 = vweird.f32 %v2983_v12 }
 0x10d   : > { %v1645_v22 = vsel %vm1642_vm3, %v1644_v3, %v1640_v18  ;;  %v3810_v17 = vadd.f32 1.0, %v2985_v16  ;;  %560 = vmatmul.f32.gmra.mxu0 %v261_v13  ;;  %v762_v31 = vadd.f32 %v761_v10, %v514_v23  ;;  %vm1654_vm6 = vmor %vm1652_vm5, %vm1653_vm4 }
 0x10e   : > { %2675 = vst [vmem:[%s3682_s19 + $0x40] sm:$0xff] %v1645_v22  ;;  %v1649_v25 = vsub.f32 1.0, %v1648_v20  ;;  %808 = vmatmul.f32.gmra.mxu1 %v262_v15  ;;  %v3816_v27 = vpop.f32.mrf.mxu3 }
 0x10f   : > { %2988 = vrcp.f32 %v3810_v17  ;;  %v1009_v28 = vpop.f32.mrf.mxu2  ;;  %v1673_v60 = vand.u32 2147483648, %v3810_v17  ;;  %v1671_v4 = vand.u32 2147483647, %v3810_v17  ;;  %vm1667_vm9 = vweird.f32 %v3810_v17 }
 0x110   : > { %v1650_v29 = vmul.f32 %v2983_v12, %v1649_v25  ;;  %v1010_v36 = vadd.f32 %v1009_v28, %v762_v31 }
 0x111   : > { %v1674_v15 = vor.u32 1.1754944e-38, %v1673_v60  ;;  %vm1672_vm11 = vcmp.eq.f32.partialorder %v1671_v4, 8.507059e+37  ;;  %v275_v60 = vld [vmem:[%s3522_s4 + $0x310] sm:$0xff] }
 0x112   : > { %v1651_v35 = vadd.f32 %v2983_v12, %v1650_v29  ;;  %v516_v40 = vpop.f32.mrf.mxu0  ;;  %v2987_v44 = vpop.eup %2986  ;;  %v2819_v47 = vmul.f32 -1.442695, %v1010_v36  ;;  %v388_v29 = vld [vmem:[%s3522_s4 + $0x698] sm:$0xff] }
 0x113   : > { %v764_v41 = vpop.f32.mrf.mxu1  ;;  %v517_v49 = vadd.f32 %v3643_v48, %v516_v40  ;;  %928 = vmatmul.f32.gmra.mxu3 %v382_v33  ;;  %v3825_v53 = vadd.f32 1.0, %v2987_v44 }
 0x114   : > { %v1655_v45 = vsel %vm1654_vm6, %v2983_v12, %v1651_v35  ;;  %1059 = vmatmul.f32.gmra.mxu2 %v266_v34  ;;  %2990 = vpow2.f32 %v2819_v47  ;;  %v268_v12 = vld [vmem:[%s3522_s4 + $0x2d8] sm:$0xff] }
 0x115   : > { %v2989_v51 = vpop.eup %2988  ;;  %v1660_v46 = vsel %vm1657_vm7, %v1659_v38, %v1655_v45  ;;  %v765_v55 = vadd.f32 %v764_v41, %v517_v49  ;;  %563 = vmatmul.f32.gmra.mxu0 %v264_v42  ;;  %2992 = vrcp.f32 %v3825_v53  ;;  %v1688_v28 = vand.u32 2147483648, %v3825_v53  ;;  %v270_v41 = vld [vmem:[%s3522_s4 + $0x2e8] sm:$0xff]  ;;  %v271_v42 = vld [vmem:[%s3522_s4 + $0x2f0] sm:$0xff] }
 0x116   : > { %2676 = vst [vmem:[%s3682_s19 + $0x48] sm:$0xff] %v1660_v46  ;;  %v1663_v54 = vmul.f32 %v2989_v51, %v3810_v17  ;;  %811 = vmatmul.f32.gmra.mxu1 %v265_v43  ;;  %v3830_v56 = vpop.f32.mrf.mxu3  ;;  %vm1668_vm8 = vweird.f32 %v2989_v51  ;;  %v1686_v34 = vand.u32 2147483647, %v3825_v53  ;;  %vm1682_vm13 = vweird.f32 %v3825_v53 }
 0x117   : > { %v1012_v52 = vpop.f32.mrf.mxu2  ;;  %vm1669_vm10 = vmor %vm1667_vm9, %vm1668_vm8  ;;  %v1689_v47 = vor.u32 1.1754944e-38, %v1688_v28 }
 0x118   : > { %v1664_v58 = vsub.f32 1.0, %v1663_v54  ;;  %v1013_v59 = vadd.f32 %v1012_v52, %v765_v55  ;;  %vm1687_vm15 = vcmp.eq.f32.partialorder %v1686_v34, 8.507059e+37 }
 0x11a   : > { %v1665_v2 = vmul.f32 %v2989_v51, %v1664_v58  ;;  %v2820_v7 = vmul.f32 -1.442695, %v1013_v59  ;;  %v519_v9 = vpop.f32.mrf.mxu0  ;;  %v2991_v3 = vpop.eup %2990  ;;  %v391_v59 = vld [vmem:[%s3522_s4 + $0x6b0] sm:$0xff] }
 0x11b   : > { %v767_v11 = vpop.f32.mrf.mxu1  ;;  %v520_v10 = vadd.f32 %v3643_v48, %v519_v9  ;;  %931 = vmatmul.f32.gmra.mxu3 %v385_v63  ;;  %v2993_v13 = vpop.eup %2992  ;;  %v3841_v16 = vadd.f32 1.0, %v2991_v3  ;;  %v274_v3 = vld [vmem:[%s3522_s4 + $0x308] sm:$0xff] }
 0x11c   : > { %v1666_v14 = vadd.f32 %v2989_v51, %v1665_v2  ;;  %2994 = vpow2.f32 %v2820_v7  ;;  %1062 = vmatmul.f32.gmra.mxu2 %v269_v0  ;;  %v1678_v20 = vmul.f32 %v2993_v13, %v3825_v53  ;;  %vm1683_vm12 = vweird.f32 %v2993_v13 }
 0x11d   : > { %v768_v21 = vadd.f32 %v767_v11, %v520_v10  ;;  %566 = vmatmul.f32.gmra.mxu0 %v267_v1  ;;  %2996 = vrcp.f32 %v3841_v16  ;;  %vm1684_vm14 = vmor %vm1682_vm13, %vm1683_vm12  ;;  %v1703_v58 = vand.u32 2147483648, %v3841_v16  ;;  %v1701_v2 = vand.u32 2147483647, %v3841_v16 }
 0x11e   : > { %v1670_v18 = vsel %vm1669_vm10, %v2989_v51, %v1666_v14  ;;  %814 = vmatmul.f32.gmra.mxu1 %v268_v12  ;;  %v3845_v17 = vpop.f32.mrf.mxu3  ;;  %v1679_v25 = vsub.f32 1.0, %v1678_v20  ;;  %v273_v12 = vld [vmem:[%s3522_s4 + $0x300] sm:$0xff]  ;;  %vm1697_vm1 = vweird.f32 %v3841_v16 }
 0x11f   : > { %v1675_v22 = vsel %vm1672_vm11, %v1674_v15, %v1670_v18  ;;  %v1015_v23 = vpop.f32.mrf.mxu2  ;;  %vm1702_vm3 = vcmp.eq.f32.partialorder %v1701_v2, 8.507059e+37 }
 0x120   : > { %2677 = vst [vmem:[%s3682_s19 + $0x50] sm:$0xff] %v1675_v22  ;;  %v1016_v26 = vadd.f32 %v1015_v23, %v768_v21  ;;  %v1680_v33 = vmul.f32 %v2993_v13, %v1679_v25 }
 0x122   : > { %v2995_v31 = vpop.eup %2994  ;;  %v2821_v35 = vmul.f32 -1.442695, %v1016_v26  ;;  %v522_v38 = vpop.f32.mrf.mxu0  ;;  %v1681_v43 = vadd.f32 %v2993_v13, %v1680_v33 }
 0x123   : > { %v3852_v36 = vadd.f32 1.0, %v2995_v31  ;;  %v770_v40 = vpop.f32.mrf.mxu1  ;;  %v523_v44 = vadd.f32 %v3643_v48, %v522_v38  ;;  %934 = vmatmul.f32.gmra.mxu3 %v388_v29  ;;  %v2997_v45 = vpop.eup %2996  ;;  %v278_v31 = vld [vmem:[%s3522_s4 + $0x328] sm:$0xff] }
 0x124   : > { %2998 = vpow2.f32 %v2821_v35  ;;  %1065 = vmatmul.f32.gmra.mxu2 %v272_v30  ;;  %v1685_v49 = vsel %vm1684_vm14, %v2993_v13, %v1681_v43  ;;  %v1693_v51 = vmul.f32 %v2997_v45, %v3841_v16  ;;  %vm1698_vm0 = vweird.f32 %v2997_v45  ;;  %v3879_v16 = vld [vmem:[%s5047_s2] ss:$0 sm:$0xff]  ;;  %v394_v30 = vld [vmem:[%s3522_s4 + $0x6c8] sm:$0xff] }
 0x125   : > { %3000 = vrcp.f32 %v3852_v36  ;;  %v771_v46 = vadd.f32 %v770_v40, %v523_v44  ;;  %569 = vmatmul.f32.gmra.mxu0 %v270_v41  ;;  %v1690_v53 = vsel %vm1687_vm15, %v1689_v47, %v1685_v49  ;;  %vm1699_vm2 = vmor %vm1697_vm1, %vm1698_vm0  ;;  %v1704_v13 = vor.u32 1.1754944e-38, %v1703_v58  ;;  %v276_v44 = vld [vmem:[%s3522_s4 + $0x318] sm:$0xff] }
 0x126   : > { %817 = vmatmul.f32.gmra.mxu1 %v271_v42  ;;  %v3861_v48 = vpop.f32.mrf.mxu3  ;;  %2678 = vst [vmem:[%s3682_s19 + $0x58] sm:$0xff] %v1690_v53  ;;  %v1694_v55 = vsub.f32 1.0, %v1693_v51  ;;  %v1718_v22 = vand.u32 2147483648, %v3852_v36  ;;  %v1716_v28 = vand.u32 2147483647, %v3852_v36  ;;  %vm1712_vm5 = vweird.f32 %v3852_v36 }
 0x127   : > { %v1018_v54 = vpop.f32.mrf.mxu2 }
 0x128   : > { %v1019_v52 = vadd.f32 %v1018_v54, %v771_v46  ;;  %v1695_v0 = vmul.f32 %v2997_v45, %v1694_v55  ;;  %v1719_v40 = vor.u32 1.1754944e-38, %v1718_v22  ;;  %vm1717_vm7 = vcmp.eq.f32.partialorder %v1716_v28, 8.507059e+37 }
 0x12a   : > { %v2999_v63 = vpop.eup %2998  ;;  %v2822_v4 = vmul.f32 -1.442695, %v1019_v52  ;;  %v525_v11 = vpop.f32.mrf.mxu0  ;;  %v1696_v14 = vadd.f32 %v2997_v45, %v1695_v0  ;;  %v281_v0 = vld [vmem:[%s3522_s4 + $0x340] sm:$0xff] }
 0x12b   : > { %v3001_v7 = vpop.eup %3000  ;;  %v3868_v9 = vadd.f32 1.0, %v2999_v63  ;;  %v773_v1 = vpop.f32.mrf.mxu1  ;;  %937 = vmatmul.f32.gmra.mxu3 %v391_v59  ;;  %v526_v20 = vadd.f32 %v3879_v16, %v525_v11  ;;  %v397_v63 = vld [vmem:[%s3522_s4 + $0x6e0] sm:$0xff] }
 0x12c   : > { %v1708_v10 = vmul.f32 %v3001_v7, %v3852_v36  ;;  %3002 = vpow2.f32 %v2822_v4  ;;  %1068 = vmatmul.f32.gmra.mxu2 %v275_v60  ;;  %v1700_v15 = vsel %vm1699_vm2, %v2997_v45, %v1696_v14  ;;  %vm1713_vm4 = vweird.f32 %v3001_v7  ;;  %v277_v45 = vld [vmem:[%s3522_s4 + $0x320] sm:$0xff]  ;;  %v280_v14 = vld [vmem:[%s3522_s4 + $0x338] sm:$0xff] }
 0x12d   : > { %3004 = vrcp.f32 %v3868_v9  ;;  %572 = vmatmul.f32.gmra.mxu0 %v273_v12  ;;  %v1705_v21 = vsel %vm1702_vm3, %v1704_v13, %v1700_v15  ;;  %v774_v29 = vadd.f32 %v773_v1, %v526_v20  ;;  %vm1714_vm6 = vmor %vm1712_vm5, %vm1713_vm4  ;;  %v1733_v54 = vand.u32 2147483648, %v3868_v9 }
 0x12e   : > { %v1709_v18 = vsub.f32 1.0, %v1708_v10  ;;  %820 = vmatmul.f32.gmra.mxu1 %v274_v3  ;;  %v3883_v23 = vpop.f32.mrf.mxu3  ;;  %2679 = vst [vmem:[%s3682_s19 + $0x60] sm:$0xff] %v1705_v21  ;;  %v1731_v59 = vand.u32 2147483647, %v3868_v9  ;;  %vm1727_vm9 = vweird.f32 %v3868_v9  ;;  %v279_v3 = vld [vmem:[%s3522_s4 + $0x330] sm:$0xff] }
 0x12f   : > { %v1021_v25 = vpop.f32.mrf.mxu2  ;;  %v1734_v11 = vor.u32 1.1754944e-38, %v1733_v54 }
 0x130   : > { %v1710_v26 = vmul.f32 %v3001_v7, %v1709_v18  ;;  %v1022_v35 = vadd.f32 %v1021_v25, %v774_v29  ;;  %vm1732_vm11 = vcmp.eq.f32.partialorder %v1731_v59, 8.507059e+37 }
 0x132   : > { %v3003_v33 = vpop.eup %3002  ;;  %v1711_v34 = vadd.f32 %v3001_v7, %v1710_v26  ;;  %v528_v42 = vpop.f32.mrf.mxu0  ;;  %v2823_v51 = vmul.f32 -1.442695, %v1022_v35 }
 0x133   : > { %v3005_v38 = vpop.eup %3004  ;;  %v3890_v41 = vadd.f32 1.0, %v3003_v33  ;;  %v776_v43 = vpop.f32.mrf.mxu1  ;;  %940 = vmatmul.f32.gmra.mxu3 %v394_v30  ;;  %v529_v53 = vadd.f32 %v3879_v16, %v528_v42  ;;  %v400_v33 = vld [vmem:[%s3522_s4 + $0x6f8] sm:$0xff] }
 0x134   : > { %v1715_v47 = vsel %vm1714_vm6, %v3001_v7, %v1711_v34  ;;  %v1723_v49 = vmul.f32 %v3005_v38, %v3868_v9  ;;  %1071 = vmatmul.f32.gmra.mxu2 %v278_v31  ;;  %vm1728_vm8 = vweird.f32 %v3005_v38  ;;  %v284_v34 = vld [vmem:[%s3522_s4 + $0x358] sm:$0xff] }
 0x135   : > { %v1720_v36 = vsel %vm1717_vm7, %v1719_v40, %v1715_v47  ;;  %3006 = vrcp.f32 %v3890_v41  ;;  %575 = vmatmul.f32.gmra.mxu0 %v276_v44  ;;  %v777_v60 = vadd.f32 %v776_v43, %v529_v53  ;;  %vm1729_vm10 = vmor %vm1727_vm9, %vm1728_vm8  ;;  %v1748_v25 = vand.u32 2147483648, %v3890_v41  ;;  %v283_v47 = vld [vmem:[%s3522_s4 + $0x350] sm:$0xff] }
 0x136   : > { %2680 = vst [vmem:[%s3682_s19 + $0x68] sm:$0xff] %v1720_v36  ;;  %v1724_v46 = vsub.f32 1.0, %v1723_v49  ;;  %3008 = vpow2.f32 %v2823_v51  ;;  %823 = vmatmul.f32.gmra.mxu1 %v277_v45  ;;  %v3899_v55 = vpop.f32.mrf.mxu3  ;;  %v1746_v30 = vand.u32 2147483647, %v3890_v41  ;;  %vm1742_vm13 = vweird.f32 %v3890_v41  ;;  %v282_v45 = vld [vmem:[%s3522_s4 + $0x348] sm:$0xff] }
 0x137   : > { %v1024_v52 = vpop.f32.mrf.mxu2  ;;  %v1749_v42 = vor.u32 1.1754944e-38, %v1748_v25  ;;  %v652_v53 = vadd.f32 %v3879_v16, %v3650_v57  ;;  %v655_v25 = vadd.f32 %v3879_v16, %v3657_v8 }
 0x138   : > { %v1725_v58 = vmul.f32 %v3005_v38, %v1724_v46  ;;  %v1025_v4 = vadd.f32 %v1024_v52, %v777_v60  ;;  %vm1747_vm15 = vcmp.eq.f32.partialorder %v1746_v30, 8.507059e+37 }
 0x13a   : > { %v1726_v2 = vadd.f32 %v3005_v38, %v1725_v58  ;;  %v531_v1 = vpop.f32.mrf.mxu0  ;;  %v2824_v18 = vmul.f32 -1.442695, %v1025_v4 }
 0x13b   : > { %v3007_v7 = vpop.eup %3006  ;;  %v779_v12 = vpop.f32.mrf.mxu1  ;;  %943 = vmatmul.f32.gmra.mxu3 %v397_v63  ;;  %v532_v21 = vadd.f32 %v3879_v16, %v531_v1 }
 0x13c   : > { %v3009_v10 = vpop.eup %3008  ;;  %v1730_v13 = vsel %vm1729_vm10, %v3005_v38, %v1726_v2  ;;  %v1738_v15 = vmul.f32 %v3007_v7, %v3890_v41  ;;  %1074 = vmatmul.f32.gmra.mxu2 %v281_v0  ;;  %3010 = vpow2.f32 %v2824_v18  ;;  %vm1743_vm12 = vweird.f32 %v3007_v7 }
 0x13d   : > { %v1735_v20 = vsel %vm1732_vm11, %v1734_v11, %v1730_v13  ;;  %v3908_v9 = vadd.f32 1.0, %v3009_v10  ;;  %578 = vmatmul.f32.gmra.mxu0 %v279_v3  ;;  %v780_v31 = vadd.f32 %v779_v12, %v532_v21  ;;  %vm3920_vm14 = vmor %vm1742_vm13, %vm1743_vm12  ;;  %v287_v11 = vld [vmem:[%s3522_s4 + $0x370] sm:$0xff]  ;;  %v285_v13 = vld [vmem:[%s3522_s4 + $0x360] sm:$0xff] }
 0x13e   : > { %2681 = vst [vmem:[%s3682_s19 + $0x70] sm:$0xff] %v1735_v20  ;;  %v1739_v22 = vsub.f32 1.0, %v1738_v15  ;;  %826 = vmatmul.f32.gmra.mxu1 %v280_v14  ;;  %v3914_v26 = vpop.f32.mrf.mxu3  ;;  %v286_v15 = vld [vmem:[%s3522_s4 + $0x368] sm:$0xff] }
 0x13f   : > { %3012 = vrcp.f32 %v3908_v9  ;;  %v1027_v28 = vpop.f32.mrf.mxu2  ;;  %v1763_v4 = vand.u32 2147483648, %v3908_v9  ;;  %v1761_v12 = vand.u32 2147483647, %v3908_v9  ;;  %vm1757_vm1 = vweird.f32 %v3908_v9 }
 0x140   : > { %v1740_v29 = vmul.f32 %v3007_v7, %v1739_v22  ;;  %v1028_v38 = vadd.f32 %v1027_v28, %v780_v31 }
 0x141   : > { %v1764_v28 = vor.u32 1.1754944e-38, %v1763_v4  ;;  %vm1762_vm3 = vcmp.eq.f32.partialorder %v1761_v12, 8.507059e+37 }
 0x142   : > { %v1741_v35 = vadd.f32 %v3007_v7, %v1740_v29  ;;  %v534_v43 = vpop.f32.mrf.mxu0  ;;  %v3011_v49 = vpop.eup %3010  ;;  %v2825_v36 = vmul.f32 -1.442695, %v1028_v38 }
 0x143   : > { %v782_v44 = vpop.f32.mrf.mxu1  ;;  %v535_v46 = vadd.f32 %v3879_v16, %v534_v43  ;;  %946 = vmatmul.f32.gmra.mxu3 %v400_v33  ;;  %v3931_v52 = vadd.f32 1.0, %v3011_v49  ;;  %v406_v43 = vld [vmem:[%s3522_s4 + $0x728] sm:$0xff] }
 0x144   : > { %v1745_v51 = vsel %vm3920_vm14, %v3007_v7, %v1741_v35  ;;  %1077 = vmatmul.f32.gmra.mxu2 %v284_v34  ;;  %3014 = vpow2.f32 %v2825_v36  ;;  %v403_v7 = vld [vmem:[%s3522_s4 + $0x710] sm:$0xff] }
 0x145   : > { %v3013_v41 = vpop.eup %3012  ;;  %v1750_v54 = vsel %vm1747_vm15, %v1749_v42, %v1745_v51  ;;  %v783_v59 = vadd.f32 %v782_v44, %v535_v46  ;;  %581 = vmatmul.f32.gmra.mxu0 %v282_v45  ;;  %3016 = vrcp.f32 %v3931_v52  ;;  %v1778_v42 = vand.u32 2147483648, %v3931_v52  ;;  %v290_v44 = vld [vmem:[%s3522_s4 + $0x388] sm:$0xff] }
 0x146   : > { %2682 = vst [vmem:[%s3682_s19 + $0x78] sm:$0xff] %v1750_v54  ;;  %v1753_v58 = vmul.f32 %v3013_v41, %v3908_v9  ;;  %829 = vmatmul.f32.gmra.mxu1 %v283_v47  ;;  %v899_v60 = vpop.f32.mrf.mxu3  ;;  %vm1758_vm0 = vweird.f32 %v3013_v41  ;;  %v1776_v49 = vand.u32 2147483647, %v3931_v52  ;;  %v289_v54 = vld [vmem:[%s3522_s4 + $0x380] sm:$0xff]  ;;  %vm1772_vm5 = vweird.f32 %v3931_v52 }
 0x147   : > { %v1030_v63 = vpop.f32.mrf.mxu2  ;;  %v3936_v57 = vadd.f32 %v899_v60, %v652_v53  ;;  %vm1759_vm2 = vmor %vm1757_vm1, %vm1758_vm0  ;;  %v288_v53 = vld [vmem:[%s3522_s4 + $0x378] sm:$0xff] }
 0x148   : > { %v1754_v0 = vsub.f32 1.0, %v1753_v58  ;;  %v1031_v2 = vadd.f32 %v1030_v63, %v783_v59  ;;  %v658_v63 = vadd.f32 %v3879_v16, %v3664_v19  ;;  %vm1777_vm7 = vcmp.eq.f32.partialorder %v1776_v49, 8.507059e+37 }
 0x14a   : > { %v1755_v1 = vmul.f32 %v3013_v41, %v1754_v0  ;;  %v2826_v3 = vmul.f32 -1.442695, %v1031_v2  ;;  %v537_v14 = vpop.f32.mrf.mxu0  ;;  %v3015_v18 = vpop.eup %3014  ;;  %v1779_v0 = vor.u32 1.1754944e-38, %v1778_v42 }
 0x14b   : > { %v785_v10 = vpop.f32.mrf.mxu1  ;;  %v538_v21 = vadd.f32 %v3879_v16, %v537_v14  ;;  %949 = vmatmul.f32.gmra.mxu3 %v403_v7  ;;  %v3017_v22 = vpop.eup %3016  ;;  %v3949_v29 = vadd.f32 1.0, %v3015_v18 }
 0x14c   : > { %v1756_v20 = vadd.f32 %v3013_v41, %v1755_v1  ;;  %3018 = vpow2.f32 %v2826_v3  ;;  %1080 = vmatmul.f32.gmra.mxu2 %v287_v11  ;;  %v1768_v9 = vmul.f32 %v3017_v22, %v3931_v52  ;;  %vm1773_vm4 = vweird.f32 %v3017_v22 }
 0x14d   : > { %v786_v31 = vadd.f32 %v785_v10, %v538_v21  ;;  %584 = vmatmul.f32.gmra.mxu0 %v285_v13  ;;  %3020 = vrcp.f32 %v3949_v29  ;;  %vm1774_vm6 = vmor %vm1772_vm5, %vm1773_vm4  ;;  %v1793_v14 = vand.u32 2147483648, %v3949_v29  ;;  %v293_v10 = vld [vmem:[%s3522_s4 + $0x3a0] sm:$0xff]  ;;  %vm1787_vm9 = vweird.f32 %v3949_v29 }
 0x14e   : > { %v1760_v30 = vsel %vm1759_vm2, %v3013_v41, %v1756_v20  ;;  %832 = vmatmul.f32.gmra.mxu1 %v286_v15  ;;  %v902_v34 = vpop.f32.mrf.mxu3  ;;  %v1769_v8 = vsub.f32 1.0, %v1768_v9  ;;  %v353_v13 = vld [vmem:[%s3522_s4 + $0x580] sm:$0xff]  ;;  %v1791_v20 = vand.u32 2147483647, %v3949_v29  ;;  %v291_v9 = vld [vmem:[%s3522_s4 + $0x390] sm:$0xff] }
 0x14f   : > { %v1765_v33 = vsel %vm1762_vm3, %v1764_v28, %v1760_v30  ;;  %v1033_v35 = vpop.f32.mrf.mxu2  ;;  %v3954_v38 = vadd.f32 %v902_v34, %v655_v25 }
 0x150   : > { %2683 = vst [vmem:[%s3682_s19 + $0x80] sm:$0xff] %v1765_v33  ;;  %v1034_v40 = vadd.f32 %v1033_v35, %v786_v31  ;;  %v1770_v47 = vmul.f32 %v3017_v22, %v1769_v8  ;;  %v292_v31 = vld [vmem:[%s3522_s4 + $0x398] sm:$0xff]  ;;  %v661_v35 = vadd.f32 %v3879_v16, %v3674_v37  ;;  %v1794_v8 = vor.u32 1.1754944e-38, %v1793_v14 }
 0x151   : > { %vm1792_vm11 = vcmp.eq.f32.partialorder %v1791_v20, 8.507059e+37 }
 0x152   : > { %v3019_v45 = vpop.eup %3018  ;;  %v2827_v51 = vmul.f32 -1.442695, %v1034_v40  ;;  %v540_v46 = vpop.f32.mrf.mxu0  ;;  %v1771_v58 = vadd.f32 %v3017_v22, %v1770_v47 }
 0x153   : > { %v3960_v36 = vadd.f32 1.0, %v3019_v45  ;;  %v788_v41 = vpop.f32.mrf.mxu1  ;;  %v541_v59 = vadd.f32 %v3879_v16, %v540_v46  ;;  %952 = vmatmul.f32.gmra.mxu3 %v406_v43  ;;  %v3021_v60 = vpop.eup %3020 }
 0x154   : > { %3022 = vpow2.f32 %v2827_v51  ;;  %1083 = vmatmul.f32.gmra.mxu2 %v290_v44  ;;  %v1775_v2 = vsel %vm1774_vm6, %v3017_v22, %v1771_v58  ;;  %v1783_v52 = vmul.f32 %v3021_v60, %v3949_v29  ;;  %vm1788_vm8 = vweird.f32 %v3021_v60 }
 0x155   : > { %3024 = vrcp.f32 %v3960_v36  ;;  %v789_v4 = vadd.f32 %v788_v41, %v541_v59  ;;  %587 = vmatmul.f32.gmra.mxu0 %v288_v53  ;;  %v1780_v7 = vsel %vm1777_vm7, %v1779_v0, %v1775_v2  ;;  %vm1789_vm10 = vmor %vm1787_vm9, %vm1788_vm8  ;;  %v1806_v44 = vand.u32 2147483647, %v3960_v36  ;;  %v296_v41 = vld [vmem:[%s3522_s4 + $0x3b8] sm:$0xff] }
 0x156   : > { %835 = vmatmul.f32.gmra.mxu1 %v289_v54  ;;  %v905_v11 = vpop.f32.mrf.mxu3  ;;  %2684 = vst [vmem:[%s3682_s19 + $0x88] sm:$0xff] %v1780_v7  ;;  %v1784_v19 = vsub.f32 1.0, %v1783_v52  ;;  %v1808_v45 = vand.u32 2147483648, %v3960_v36  ;;  %v356_v53 = vld [vmem:[%s3522_s4 + $0x598] sm:$0xff]  ;;  %vm1802_vm13 = vweird.f32 %v3960_v36  ;;  %v295_v7 = vld [vmem:[%s3522_s4 + $0x3b0] sm:$0xff] }
 0x157   : > { %v1036_v1 = vpop.f32.mrf.mxu2  ;;  %v3972_v12 = vadd.f32 %v905_v11, %v658_v63  ;;  %vm1807_vm15 = vcmp.eq.f32.partialorder %v1806_v44, 8.507059e+37 }
 0x158   : > { %v1037_v3 = vadd.f32 %v1036_v1, %v789_v4  ;;  %v1785_v18 = vmul.f32 %v3021_v60, %v1784_v19  ;;  %v1809_v63 = vor.u32 1.1754944e-38, %v1808_v45  ;;  %v294_v4 = vld [vmem:[%s3522_s4 + $0x3a8] sm:$0xff] }
 0x15a   : > { %v3023_v15 = vpop.eup %3022  ;;  %v2828_v21 = vmul.f32 -1.442695, %v1037_v3  ;;  %v543_v28 = vpop.f32.mrf.mxu0  ;;  %v1786_v33 = vadd.f32 %v3021_v60, %v1785_v18 }
 0x15b   : > { %v3025_v22 = vpop.eup %3024  ;;  %v3978_v25 = vadd.f32 1.0, %v3023_v15  ;;  %v791_v30 = vpop.f32.mrf.mxu1  ;;  %1146 = vmatmul.f32.vlgmr.msra.gmra.mxu3 %v353_v13  ;;  %v544_v29 = vadd.f32 %v3879_v16, %v543_v28  ;;  %v299_v28 = vld [vmem:[%s3522_s4 + $0x3d0] sm:$0xff] }
 0x15c   : > { %v1798_v34 = vmul.f32 %v3025_v22, %v3960_v36  ;;  %3026 = vpow2.f32 %v2828_v21  ;;  %1086 = vmatmul.f32.gmra.mxu2 %v293_v10  ;;  %v1790_v40 = vsel %vm1789_vm10, %v3021_v60, %v1786_v33  ;;  %vm1803_vm12 = vweird.f32 %v3025_v22 }
 0x15d   : > { %3028 = vrcp.f32 %v3978_v25  ;;  %590 = vmatmul.f32.gmra.mxu0 %v291_v9  ;;  %v1795_v43 = vsel %vm1792_vm11, %v1794_v8, %v1790_v40  ;;  %v792_v51 = vadd.f32 %v791_v30, %v544_v29  ;;  %vm1804_vm14 = vmor %vm1802_vm13, %vm1803_vm12  ;;  %v664_v36 = vadd.f32 %v3879_v16, %v3693_v62  ;;  %v359_v30 = vld [vmem:[%s3522_s4 + $0x5b0] sm:$0xff]  ;;  %v297_v40 = vld [vmem:[%s3522_s4 + $0x3c0] sm:$0xff] }
 0x15e   : > { %v1799_v42 = vsub.f32 1.0, %v1798_v34  ;;  %838 = vmatmul.f32.gmra.mxu1 %v292_v31  ;;  %v908_v37 = vpop.f32.mrf.mxu3  ;;  %2685 = vst [vmem:[%s3682_s19 + $0x90] sm:$0xff] %v1795_v43  ;;  %v1821_v13 = vand.u32 2147483647, %v3978_v25  ;;  %v1823_v15 = vand.u32 2147483648, %v3978_v25  ;;  %vm1817_vm1 = vweird.f32 %v3978_v25 }
 0x15f   : > { %v1039_v47 = vpop.f32.mrf.mxu2  ;;  %v3992_v46 = vadd.f32 %v908_v37, %v661_v35 }
 0x160   : > { %v1800_v49 = vmul.f32 %v3025_v22, %v1799_v42  ;;  %v1040_v59 = vadd.f32 %v1039_v47, %v792_v51  ;;  %v1824_v34 = vor.u32 1.1754944e-38, %v1823_v15  ;;  %v298_v42 = vld [vmem:[%s3522_s4 + $0x3c8] sm:$0xff]  ;;  %vm1822_vm3 = vcmp.eq.f32.partialorder %v1821_v13, 8.507059e+37 }
 0x162   : > { %v3027_v54 = vpop.eup %3026  ;;  %v1801_v58 = vadd.f32 %v3025_v22, %v1800_v49  ;;  %v546_v2 = vpop.f32.mrf.mxu0  ;;  %v2829_v19 = vmul.f32 -1.442695, %v1040_v59  ;;  %v667_v49 = vadd.f32 %v3879_v16, %v3708_v24 }
 0x163   : > { %v3029_v60 = vpop.eup %3028  ;;  %v3997_v0 = vadd.f32 1.0, %v3027_v54  ;;  %v794_v52 = vpop.f32.mrf.mxu1  ;;  %1149 = vmatmul.f32.gmra.mxu3 %v356_v53  ;;  %v547_v10 = vadd.f32 %v3879_v16, %v546_v2  ;;  %v362_v2 = vld [vmem:[%s3522_s4 + $0x5c8] sm:$0xff] }
 0x164   : > { %v1805_v11 = vsel %vm1804_vm14, %v3025_v22, %v1801_v58  ;;  %v1813_v1 = vmul.f32 %v3029_v60, %v3978_v25  ;;  %1089 = vmatmul.f32.gmra.mxu2 %v296_v41  ;;  %vm1818_vm0 = vweird.f32 %v3029_v60 }
 0x165   : > { %v1810_v3 = vsel %vm1807_vm15, %v1809_v63, %v1805_v11  ;;  %3030 = vrcp.f32 %v3997_v0  ;;  %593 = vmatmul.f32.gmra.mxu0 %v294_v4  ;;  %v795_v22 = vadd.f32 %v794_v52, %v547_v10  ;;  %vm1819_vm2 = vmor %vm1817_vm1, %vm1818_vm0  ;;  %v1836_v41 = vand.u32 2147483647, %v3997_v0  ;;  %v302_v63 = vld [vmem:[%s3522_s4 + $0x3e8] sm:$0xff] }
 0x166   : > { %2686 = vst [vmem:[%s3682_s19 + $0x98] sm:$0xff] %v1810_v3  ;;  %v1814_v14 = vsub.f32 1.0, %v1813_v1  ;;  %3032 = vpow2.f32 %v2829_v19  ;;  %841 = vmatmul.f32.gmra.mxu1 %v295_v7  ;;  %v911_v18 = vpop.f32.mrf.mxu3  ;;  %v1838_v53 = vand.u32 2147483648, %v3997_v0  ;;  %vm1832_vm5 = vweird.f32 %v3997_v0  ;;  %v300_v3 = vld [vmem:[%s3522_s4 + $0x3d8] sm:$0xff] }
 0x167   : > { %v1042_v20 = vpop.f32.mrf.mxu2  ;;  %v4009_v62 = vadd.f32 %v911_v18, %v664_v36  ;;  %v301_v36 = vld [vmem:[%s3522_s4 + $0x3e0] sm:$0xff]  ;;  %vm1837_vm7 = vcmp.eq.f32.partialorder %v1836_v41, 8.507059e+37  ;;  %v670_v18 = vadd.f32 %v3879_v16, %v3723_v50 }
 0x168   : > { %v1815_v21 = vmul.f32 %v3029_v60, %v1814_v14  ;;  %v1043_v31 = vadd.f32 %v1042_v20, %v795_v22  ;;  %v1839_v11 = vor.u32 1.1754944e-38, %v1838_v53  ;;  %v673_v53 = vadd.f32 %v3879_v16, %v3737_v6 }
 0x16a   : > { %v1816_v9 = vadd.f32 %v3029_v60, %v1815_v21  ;;  %v549_v35 = vpop.f32.mrf.mxu0  ;;  %v2830_v45 = vmul.f32 -1.442695, %v1043_v31 }
 0x16b   : > { %v3031_v33 = vpop.eup %3030  ;;  %v797_v8 = vpop.f32.mrf.mxu1  ;;  %1152 = vmatmul.f32.gmra.mxu3 %v359_v30  ;;  %v550_v25 = vadd.f32 %v3879_v16, %v549_v35  ;;  %v305_v35 = vld [vmem:[%s3522_s4 + $0x400] sm:$0xff] }
 0x16c   : > { %v3033_v29 = vpop.eup %3032  ;;  %v1820_v43 = vsel %vm1819_vm2, %v3029_v60, %v1816_v9  ;;  %v1828_v44 = vmul.f32 %v3031_v33, %v3997_v0  ;;  %1092 = vmatmul.f32.gmra.mxu2 %v299_v28  ;;  %3034 = vpow2.f32 %v2830_v45  ;;  %vm1833_vm4 = vweird.f32 %v3031_v33  ;;  %v303_v45 = vld [vmem:[%s3522_s4 + $0x3f0] sm:$0xff] }
 0x16d   : > { %v1825_v37 = vsel %vm1822_vm3, %v1824_v34, %v1820_v43  ;;  %v4017_v47 = vadd.f32 1.0, %v3033_v29  ;;  %596 = vmatmul.f32.gmra.mxu0 %v297_v40  ;;  %v798_v60 = vadd.f32 %v797_v8, %v550_v25  ;;  %vm4031_vm6 = vmor %vm1832_vm5, %vm1833_vm4  ;;  %v365_v8 = vld [vmem:[%s3522_s4 + $0x5e0] sm:$0xff] }
 0x16e   : > { %2687 = vst [vmem:[%s3682_s19 + $0xa0] sm:$0xff] %v1825_v37  ;;  %v1829_v51 = vsub.f32 1.0, %v1828_v44  ;;  %844 = vmatmul.f32.gmra.mxu1 %v298_v42  ;;  %v914_v54 = vpop.f32.mrf.mxu3  ;;  %v304_v37 = vld [vmem:[%s3522_s4 + $0x3f8] sm:$0xff] }
 0x16f   : > { %3036 = vrcp.f32 %v4017_v47  ;;  %v1045_v58 = vpop.f32.mrf.mxu2  ;;  %v4026_v24 = vadd.f32 %v914_v54, %v667_v49  ;;  %v1853_v34 = vand.u32 2147483648, %v4017_v47  ;;  %v1851_v42 = vand.u32 2147483647, %v4017_v47 }
 0x170   : > { %v1830_v59 = vmul.f32 %v3031_v33, %v1829_v51  ;;  %v1046_v4 = vadd.f32 %v1045_v58, %v798_v60  ;;  %vm1847_vm9 = vweird.f32 %v4017_v47 }
 0x171   : > { %v1854_v54 = vor.u32 1.1754944e-38, %v1853_v34  ;;  %vm1852_vm11 = vcmp.eq.f32.partialorder %v1851_v42, 8.507059e+37 }
 0x172   : > { %v1831_v52 = vadd.f32 %v3031_v33, %v1830_v59  ;;  %v552_v1 = vpop.f32.mrf.mxu0  ;;  %v3035_v14 = vpop.eup %3034  ;;  %v2831_v13 = vmul.f32 -1.442695, %v1046_v4 }
 0x173   : > { %v800_v19 = vpop.f32.mrf.mxu1  ;;  %v553_v15 = vadd.f32 %v3879_v16, %v552_v1  ;;  %1155 = vmatmul.f32.gmra.mxu3 %v362_v2  ;;  %v4042_v21 = vadd.f32 1.0, %v3035_v14  ;;  %v308_v1 = vld [vmem:[%s3522_s4 + $0x418] sm:$0xff] }
 0x174   : > { %v1835_v10 = vsel %vm4031_vm6, %v3031_v33, %v1831_v52  ;;  %1095 = vmatmul.f32.gmra.mxu2 %v302_v63  ;;  %3038 = vpow2.f32 %v2831_v13 }
 0x175   : > { %v3037_v0 = vpop.eup %3036  ;;  %v1840_v20 = vsel %vm1837_vm7, %v1839_v11, %v1835_v10  ;;  %v801_v28 = vadd.f32 %v800_v19, %v553_v15  ;;  %599 = vmatmul.f32.gmra.mxu0 %v300_v3  ;;  %3040 = vrcp.f32 %v4042_v21  ;;  %v1868_v11 = vand.u32 2147483648, %v4042_v21  ;;  %v368_v19 = vld [vmem:[%s3522_s4 + $0x5f8] sm:$0xff] }
 0x176   : > { %2688 = vst [vmem:[%s3682_s19 + $0xa8] sm:$0xff] %v1840_v20  ;;  %v1843_v22 = vmul.f32 %v3037_v0, %v4017_v47  ;;  %847 = vmatmul.f32.gmra.mxu1 %v301_v36  ;;  %v917_v30 = vpop.f32.mrf.mxu3  ;;  %vm1848_vm8 = vweird.f32 %v3037_v0  ;;  %v1866_v14 = vand.u32 2147483647, %v4042_v21  ;;  %v307_v20 = vld [vmem:[%s3522_s4 + $0x410] sm:$0xff]  ;;  %vm1862_vm13 = vweird.f32 %v4042_v21 }
 0x177   : > { %v1048_v9 = vpop.f32.mrf.mxu2  ;;  %v4047_v50 = vadd.f32 %v917_v30, %v670_v18  ;;  %vm1849_vm10 = vmor %vm1847_vm9, %vm1848_vm8  ;;  %v306_v18 = vld [vmem:[%s3522_s4 + $0x408] sm:$0xff] }
 0x178   : > { %v1844_v31 = vsub.f32 1.0, %v1843_v22  ;;  %v1049_v33 = vadd.f32 %v1048_v9, %v801_v28  ;;  %v676_v9 = vadd.f32 %v3879_v16, %v3752_v39  ;;  %vm1867_vm15 = vcmp.eq.f32.partialorder %v1866_v14, 8.507059e+37 }
 0x17a   : > { %v1845_v40 = vmul.f32 %v3037_v0, %v1844_v31  ;;  %v2832_v29 = vmul.f32 -1.442695, %v1049_v33  ;;  %v555_v43 = vpop.f32.mrf.mxu0  ;;  %v3039_v25 = vpop.eup %3038  ;;  %v1869_v31 = vor.u32 1.1754944e-38, %v1868_v11 }
 0x17b   : > { %v803_v44 = vpop.f32.mrf.mxu1  ;;  %v556_v51 = vadd.f32 %v3879_v16, %v555_v43  ;;  %1158 = vmatmul.f32.gmra.mxu3 %v365_v8  ;;  %v3041_v41 = vpop.eup %3040  ;;  %v4060_v58 = vadd.f32 1.0, %v3039_v25 }
 0x17c   : > { %v1846_v49 = vadd.f32 %v3037_v0, %v1845_v40  ;;  %3042 = vpow2.f32 %v2832_v29  ;;  %1098 = vmatmul.f32.gmra.mxu2 %v305_v35  ;;  %v1858_v47 = vmul.f32 %v3041_v41, %v4042_v21  ;;  %vm1863_vm12 = vweird.f32 %v3041_v41 }
 0x17d   : > { %v804_v60 = vadd.f32 %v803_v44, %v556_v51  ;;  %602 = vmatmul.f32.gmra.mxu0 %v303_v45  ;;  %3044 = vrcp.f32 %v4060_v58  ;;  %vm1864_vm14 = vmor %vm1862_vm13, %vm1863_vm12  ;;  %v1883_v43 = vand.u32 2147483648, %v4060_v58  ;;  %v311_v44 = vld [vmem:[%s3522_s4 + $0x430] sm:$0xff]  ;;  %vm1877_vm1 = vweird.f32 %v4060_v58 }
 0x17e   : > { %v1850_v59 = vsel %vm1849_vm10, %v3037_v0, %v1846_v49  ;;  %850 = vmatmul.f32.gmra.mxu1 %v304_v37  ;;  %v920_v2 = vpop.f32.mrf.mxu3  ;;  %v1859_v6 = vsub.f32 1.0, %v1858_v47  ;;  %v371_v45 = vld [vmem:[%s3522_s4 + $0x610] sm:$0xff]  ;;  %v1881_v49 = vand.u32 2147483647, %v4060_v58  ;;  %v309_v47 = vld [vmem:[%s3522_s4 + $0x420] sm:$0xff] }
 0x17f   : > { %v1855_v63 = vsel %vm1852_vm11, %v1854_v54, %v1850_v59  ;;  %v1051_v52 = vpop.f32.mrf.mxu2  ;;  %v4065_v4 = vadd.f32 %v920_v2, %v673_v53 }
 0x180   : > { %2689 = vst [vmem:[%s3682_s19 + $0xb0] sm:$0xff] %v1855_v63  ;;  %v1052_v7 = vadd.f32 %v1051_v52, %v804_v60  ;;  %v1860_v36 = vmul.f32 %v3041_v41, %v1859_v6  ;;  %v310_v60 = vld [vmem:[%s3522_s4 + $0x428] sm:$0xff]  ;;  %v679_v52 = vadd.f32 %v3879_v16, %v3768_v5  ;;  %v1884_v6 = vor.u32 1.1754944e-38, %v1883_v43 }
 0x181   : > { %vm1882_vm3 = vcmp.eq.f32.partialorder %v1881_v49, 8.507059e+37 }
 0x182   : > { %v3043_v3 = vpop.eup %3042  ;;  %v2833_v10 = vmul.f32 -1.442695, %v1052_v7  ;;  %v558_v15 = vpop.f32.mrf.mxu0  ;;  %v1861_v22 = vadd.f32 %v3041_v41, %v1860_v36 }
 0x183   : > { %v4071_v13 = vadd.f32 1.0, %v3043_v3  ;;  %v806_v0 = vpop.f32.mrf.mxu1  ;;  %v559_v28 = vadd.f32 %v3879_v16, %v558_v15  ;;  %1161 = vmatmul.f32.gmra.mxu3 %v368_v19  ;;  %v3045_v30 = vpop.eup %3044 }
 0x184   : > { %3046 = vpow2.f32 %v2833_v10  ;;  %1101 = vmatmul.f32.gmra.mxu2 %v308_v1  ;;  %v1865_v33 = vsel %vm1864_vm14, %v3041_v41, %v1861_v22  ;;  %v1873_v21 = vmul.f32 %v3045_v30, %v4060_v58  ;;  %vm1878_vm0 = vweird.f32 %v3045_v30 }
 0x185   : > { %3048 = vrcp.f32 %v4071_v13  ;;  %v807_v34 = vadd.f32 %v806_v0, %v559_v28  ;;  %605 = vmatmul.f32.gmra.mxu0 %v306_v18  ;;  %v1870_v35 = vsel %vm1867_vm15, %v1869_v31, %v1865_v33  ;;  %vm1879_vm2 = vmor %vm1877_vm1, %vm1878_vm0  ;;  %v1896_v19 = vand.u32 2147483647, %v4071_v13  ;;  %v314_v0 = vld [vmem:[%s3522_s4 + $0x448] sm:$0xff] }
 0x186   : > { %853 = vmatmul.f32.gmra.mxu1 %v307_v20  ;;  %v923_v8 = vpop.f32.mrf.mxu3  ;;  %2690 = vst [vmem:[%s3682_s19 + $0xb8] sm:$0xff] %v1870_v35  ;;  %v1874_v39 = vsub.f32 1.0, %v1873_v21  ;;  %v1898_v3 = vand.u32 2147483648, %v4071_v13  ;;  %v374_v18 = vld [vmem:[%s3522_s4 + $0x628] sm:$0xff]  ;;  %vm1892_vm5 = vweird.f32 %v4071_v13  ;;  %v313_v35 = vld [vmem:[%s3522_s4 + $0x440] sm:$0xff] }
 0x187   : > { %v1054_v40 = vpop.f32.mrf.mxu2  ;;  %v4083_v42 = vadd.f32 %v923_v8, %v676_v9  ;;  %vm1897_vm7 = vcmp.eq.f32.partialorder %v1896_v19, 8.507059e+37 }
 0x188   : > { %v1055_v29 = vadd.f32 %v1054_v40, %v807_v34  ;;  %v1875_v25 = vmul.f32 %v3045_v30, %v1874_v39  ;;  %v1899_v9 = vor.u32 1.1754944e-38, %v1898_v3  ;;  %v312_v34 = vld [vmem:[%s3522_s4 + $0x438] sm:$0xff] }
 0x18a   : > { %v3047_v37 = vpop.eup %3046  ;;  %v2834_v51 = vmul.f32 -1.442695, %v1055_v29  ;;  %v561_v54 = vpop.f32.mrf.mxu0  ;;  %v1876_v63 = vadd.f32 %v3045_v30, %v1875_v25 }
 0x18b   : > { %v3049_v41 = vpop.eup %3048  ;;  %v4089_v53 = vadd.f32 1.0, %v3047_v37  ;;  %v809_v59 = vpop.f32.mrf.mxu1  ;;  %1164 = vmatmul.f32.gmra.mxu3 %v371_v45  ;;  %v562_v58 = vadd.f32 %v3879_v16, %v561_v54  ;;  %v317_v54 = vld [vmem:[%s3522_s4 + $0x460] sm:$0xff] }
 0x18c   : > { %v1888_v2 = vmul.f32 %v3049_v41, %v4071_v13  ;;  %3050 = vpow2.f32 %v2834_v51  ;;  %1104 = vmatmul.f32.gmra.mxu2 %v311_v44  ;;  %v1880_v7 = vsel %vm1879_vm2, %v3045_v30, %v1876_v63  ;;  %vm1893_vm4 = vweird.f32 %v3049_v41 }
 0x18d   : > { %3052 = vrcp.f32 %v4089_v53  ;;  %608 = vmatmul.f32.gmra.mxu0 %v309_v47  ;;  %v1885_v1 = vsel %vm1882_vm3, %v1884_v6, %v1880_v7  ;;  %v810_v10 = vadd.f32 %v809_v59, %v562_v58  ;;  %vm1894_vm6 = vmor %vm1892_vm5, %vm1893_vm4  ;;  %v682_v13 = vadd.f32 %v3879_v16, %v3785_v32  ;;  %v377_v59 = vld [vmem:[%s3522_s4 + $0x640] sm:$0xff]  ;;  %v315_v7 = vld [vmem:[%s3522_s4 + $0x450] sm:$0xff] }
 0x18e   : > { %v1889_v11 = vsub.f32 1.0, %v1888_v2  ;;  %856 = vmatmul.f32.gmra.mxu1 %v310_v60  ;;  %v926_v5 = vpop.f32.mrf.mxu3  ;;  %2691 = vst [vmem:[%s3682_s19 + $0xc0] sm:$0xff] %v1885_v1  ;;  %v1911_v45 = vand.u32 2147483647, %v4089_v53  ;;  %v1913_v37 = vand.u32 2147483648, %v4089_v53  ;;  %vm1907_vm9 = vweird.f32 %v4089_v53 }
 0x18f   : > { %v1057_v36 = vpop.f32.mrf.mxu2  ;;  %v4103_v15 = vadd.f32 %v926_v5, %v679_v52 }
 0x190   : > { %v1890_v14 = vmul.f32 %v3049_v41, %v1889_v11  ;;  %v1058_v28 = vadd.f32 %v1057_v36, %v810_v10  ;;  %v1914_v2 = vor.u32 1.1754944e-38, %v1913_v37  ;;  %v316_v11 = vld [vmem:[%s3522_s4 + $0x458] sm:$0xff]  ;;  %vm1912_vm11 = vcmp.eq.f32.partialorder %v1911_v45, 8.507059e+37 }
 0x192   : > { %v3051_v20 = vpop.eup %3050  ;;  %v1891_v22 = vadd.f32 %v3049_v41, %v1890_v14  ;;  %v564_v33 = vpop.f32.mrf.mxu0  ;;  %v2835_v39 = vmul.f32 -1.442695, %v1058_v28  ;;  %v685_v14 = vadd.f32 %v3879_v16, %v3801_v61 }
 0x193   : > { %v3053_v30 = vpop.eup %3052  ;;  %v4108_v31 = vadd.f32 1.0, %v3051_v20  ;;  %v812_v21 = vpop.f32.mrf.mxu1  ;;  %1167 = vmatmul.f32.gmra.mxu3 %v374_v18  ;;  %v565_v44 = vadd.f32 %v3879_v16, %v564_v33 }
 0x194   : > { %v1895_v8 = vsel %vm1894_vm6, %v3049_v41, %v1891_v22  ;;  %v1903_v40 = vmul.f32 %v3053_v30, %v4089_v53  ;;  %1107 = vmatmul.f32.gmra.mxu2 %v314_v0  ;;  %vm1908_vm8 = vweird.f32 %v3053_v30 }
 0x195   : > { %v1900_v29 = vsel %vm1897_vm7, %v1899_v9, %v1895_v8  ;;  %3054 = vrcp.f32 %v4108_v31  ;;  %611 = vmatmul.f32.gmra.mxu0 %v312_v34  ;;  %v813_v41 = vadd.f32 %v812_v21, %v565_v44  ;;  %vm1909_vm10 = vmor %vm1907_vm9, %vm1908_vm8  ;;  %v1926_v0 = vand.u32 2147483647, %v4108_v31  ;;  %v380_v9 = vld [vmem:[%s3522_s4 + $0x658] sm:$0xff] }
 0x196   : > { %2692 = vst [vmem:[%s3682_s19 + $0xc8] sm:$0xff] %v1900_v29  ;;  %v1904_v43 = vsub.f32 1.0, %v1903_v40  ;;  %3056 = vpow2.f32 %v2835_v39  ;;  %859 = vmatmul.f32.gmra.mxu1 %v313_v35  ;;  %v929_v25 = vpop.f32.mrf.mxu3  ;;  %v1928_v18 = vand.u32 2147483648, %v4108_v31  ;;  %vm1922_vm13 = vweird.f32 %v4108_v31  ;;  %v318_v39 = vld [vmem:[%s3522_s4 + $0x468] sm:$0xff]  ;;  %v319_v29 = vld [vmem:[%s3522_s4 + $0x470] sm:$0xff] }
 0x197   : > { %v1060_v49 = vpop.f32.mrf.mxu2  ;;  %v4120_v32 = vadd.f32 %v929_v25, %v682_v13  ;;  %vm1927_vm15 = vcmp.eq.f32.partialorder %v1926_v0, 8.507059e+37 }
 0x198   : > { %v1905_v51 = vmul.f32 %v3053_v30, %v1904_v43  ;;  %v1061_v60 = vadd.f32 %v1060_v49, %v813_v41  ;;  %v1929_v35 = vor.u32 1.1754944e-38, %v1928_v18 }
 0x19a   : > { %v1906_v47 = vadd.f32 %v3053_v30, %v1905_v51  ;;  %v567_v52 = vpop.f32.mrf.mxu0  ;;  %v2836_v3 = vmul.f32 -1.442695, %v1061_v60 }
 0x19b   : > { %v3055_v63 = vpop.eup %3054  ;;  %v815_v6 = vpop.f32.mrf.mxu1  ;;  %1170 = vmatmul.f32.gmra.mxu3 %v377_v59  ;;  %v568_v53 = vadd.f32 %v3879_v16, %v567_v52  ;;  %v320_v16 = vld [vmem:[%s3522_s4 + $0x478] sm:$0xff]  ;;  %v323_v52 = vld [vmem:[%s3522_s4 + $0x490] sm:$0xff] }
 0x19c   : > { %v3057_v58 = vpop.eup %3056  ;;  %v1910_v1 = vsel %vm1909_vm10, %v3053_v30, %v1906_v47  ;;  %v1918_v19 = vmul.f32 %v3055_v63, %v4108_v31  ;;  %1110 = vmatmul.f32.gmra.mxu2 %v317_v54  ;;  %3058 = vpow2.f32 %v2836_v3  ;;  %vm1923_vm12 = vweird.f32 %v3055_v63  ;;  %v4153_v31 = vld [vmem:[%s5047_s2] ss:$0 sm:$0xff] }
 0x19d   : > { %v1915_v5 = vsel %vm1912_vm11, %v1914_v2, %v1910_v1  ;;  %v4128_v36 = vadd.f32 1.0, %v3057_v58  ;;  %614 = vmatmul.f32.gmra.mxu0 %v315_v7  ;;  %v816_v30 = vadd.f32 %v815_v6, %v568_v53  ;;  %vm4142_vm14 = vmor %vm1922_vm13, %vm1923_vm12  ;;  %v688_v25 = vadd.f32 %v4153_v31, %v3816_v27  ;;  %v383_v6 = vld [vmem:[%s3522_s4 + $0x670] sm:$0xff]  ;;  %v321_v3 = vld [vmem:[%s3522_s4 + $0x480] sm:$0xff] }
 0x19e   : > { %2693 = vst [vmem:[%s3682_s19 + $0xd0] sm:$0xff] %v1915_v5  ;;  %v1919_v10 = vsub.f32 1.0, %v1918_v19  ;;  %862 = vmatmul.f32.gmra.mxu1 %v316_v11  ;;  %v932_v20 = vpop.f32.mrf.mxu3  ;;  %v322_v5 = vld [vmem:[%s3522_s4 + $0x488] sm:$0xff]  ;;  %v691_v18 = vadd.f32 %v4153_v31, %v3830_v56 }
 0x19f   : > { %3060 = vrcp.f32 %v4128_v36  ;;  %v1063_v22 = vpop.f32.mrf.mxu2  ;;  %v4137_v61 = vadd.f32 %v932_v20, %v685_v14  ;;  %v1943_v2 = vand.u32 2147483648, %v4128_v36  ;;  %v1941_v11 = vand.u32 2147483647, %v4128_v36 }
 0x1a0   : > { %v1920_v28 = vmul.f32 %v3055_v63, %v1919_v10  ;;  %v1064_v21 = vadd.f32 %v1063_v22, %v816_v30  ;;  %vm1937_vm1 = vweird.f32 %v4128_v36 }
 0x1a1   : > { %v1944_v20 = vor.u32 1.1754944e-38, %v1943_v2  ;;  %vm1942_vm3 = vcmp.eq.f32.partialorder %v1941_v11, 8.507059e+37 }
 0x1a2   : > { %v1921_v33 = vadd.f32 %v3055_v63, %v1920_v28  ;;  %v570_v8 = vpop.f32.mrf.mxu0  ;;  %v3059_v13 = vpop.eup %3058  ;;  %v2837_v44 = vmul.f32 -1.442695, %v1064_v21 }
 0x1a3   : > { %v818_v40 = vpop.f32.mrf.mxu1  ;;  %v571_v45 = vadd.f32 %v4153_v31, %v570_v8  ;;  %1173 = vmatmul.f32.gmra.mxu3 %v380_v9  ;;  %v4158_v51 = vadd.f32 1.0, %v3059_v13  ;;  %v326_v8 = vld [vmem:[%s3522_s4 + $0x4a8] sm:$0xff] }
 0x1a4   : > { %v1925_v43 = vsel %vm4142_vm14, %v3055_v63, %v1921_v33  ;;  %1113 = vmatmul.f32.gmra.mxu2 %v320_v16  ;;  %3062 = vpow2.f32 %v2837_v44 }
 0x1a5   : > { %v3061_v37 = vpop.eup %3060  ;;  %v1930_v49 = vsel %vm1927_vm15, %v1929_v35, %v1925_v43  ;;  %v819_v54 = vadd.f32 %v818_v40, %v571_v45  ;;  %617 = vmatmul.f32.gmra.mxu0 %v318_v39  ;;  %3064 = vrcp.f32 %v4158_v51  ;;  %v1958_v35 = vand.u32 2147483648, %v4158_v51  ;;  %v386_v40 = vld [vmem:[%s3522_s4 + $0x688] sm:$0xff] }
 0x1a6   : > { %2694 = vst [vmem:[%s3682_s19 + $0xd8] sm:$0xff] %v1930_v49  ;;  %v1933_v41 = vmul.f32 %v3061_v37, %v4128_v36  ;;  %865 = vmatmul.f32.gmra.mxu1 %v319_v29  ;;  %v935_v59 = vpop.f32.mrf.mxu3  ;;  %vm1938_vm0 = vweird.f32 %v3061_v37  ;;  %v1956_v13 = vand.u32 2147483647, %v4158_v51  ;;  %v325_v49 = vld [vmem:[%s3522_s4 + $0x4a0] sm:$0xff]  ;;  %vm1952_vm5 = vweird.f32 %v4158_v51 }
 0x1a7   : > { %v1066_v47 = vpop.f32.mrf.mxu2  ;;  %v4163_v27 = vadd.f32 %v935_v59, %v688_v25  ;;  %vm1939_vm2 = vmor %vm1937_vm1, %vm1938_vm0  ;;  %v324_v25 = vld [vmem:[%s3522_s4 + $0x498] sm:$0xff] }
 0x1a8   : > { %v1934_v60 = vsub.f32 1.0, %v1933_v41  ;;  %v1067_v63 = vadd.f32 %v1066_v47, %v819_v54  ;;  %v694_v47 = vadd.f32 %v4153_v31, %v3845_v17  ;;  %vm1957_vm7 = vcmp.eq.f32.partialorder %v1956_v13, 8.507059e+37 }
 0x1aa   : > { %v1935_v7 = vmul.f32 %v3061_v37, %v1934_v60  ;;  %v2838_v58 = vmul.f32 -1.442695, %v1067_v63  ;;  %v573_v1 = vpop.f32.mrf.mxu0  ;;  %v3063_v53 = vpop.eup %3062  ;;  %v1959_v60 = vor.u32 1.1754944e-38, %v1958_v35 }
 0x1ab   : > { %v821_v19 = vpop.f32.mrf.mxu1  ;;  %v574_v10 = vadd.f32 %v4153_v31, %v573_v1  ;;  %1176 = vmatmul.f32.gmra.mxu3 %v383_v6  ;;  %v3065_v0 = vpop.eup %3064  ;;  %v4176_v22 = vadd.f32 1.0, %v3063_v53 }
 0x1ac   : > { %v1936_v14 = vadd.f32 %v3061_v37, %v1935_v7  ;;  %3066 = vpow2.f32 %v2838_v58  ;;  %1116 = vmatmul.f32.gmra.mxu2 %v323_v52  ;;  %v1948_v36 = vmul.f32 %v3065_v0, %v4158_v51  ;;  %vm1953_vm4 = vweird.f32 %v3065_v0 }
 0x1ad   : > { %v822_v30 = vadd.f32 %v821_v19, %v574_v10  ;;  %620 = vmatmul.f32.gmra.mxu0 %v321_v3  ;;  %3068 = vrcp.f32 %v4176_v22  ;;  %vm1954_vm6 = vmor %vm1952_vm5, %vm1953_vm4  ;;  %v1973_v1 = vand.u32 2147483648, %v4176_v22  ;;  %v329_v19 = vld [vmem:[%s3522_s4 + $0x4c0] sm:$0xff]  ;;  %vm1967_vm9 = vweird.f32 %v4176_v22 }
 0x1ae   : > { %v1940_v28 = vsel %vm1939_vm2, %v3061_v37, %v1936_v14  ;;  %868 = vmatmul.f32.gmra.mxu1 %v322_v5  ;;  %v938_v9 = vpop.f32.mrf.mxu3  ;;  %v1949_v56 = vsub.f32 1.0, %v1948_v36  ;;  %v389_v3 = vld [vmem:[%s3522_s4 + $0x6a0] sm:$0xff]  ;;  %v1971_v14 = vand.u32 2147483647, %v4176_v22  ;;  %v327_v36 = vld [vmem:[%s3522_s4 + $0x4b0] sm:$0xff] }
 0x1af   : > { %v1945_v16 = vsel %vm1942_vm3, %v1944_v20, %v1940_v28  ;;  %v1069_v33 = vpop.f32.mrf.mxu2  ;;  %v4181_v21 = vadd.f32 %v938_v9, %v691_v18 }
 0x1b0   : > { %2695 = vst [vmem:[%s3682_s19 + $0xe0] sm:$0xff] %v1945_v16  ;;  %v1070_v34 = vadd.f32 %v1069_v33, %v822_v30  ;;  %v1950_v29 = vmul.f32 %v3065_v0, %v1949_v56  ;;  %v328_v30 = vld [vmem:[%s3522_s4 + $0x4b8] sm:$0xff]  ;;  %v697_v33 = vadd.f32 %v4153_v31, %v3861_v48  ;;  %v1974_v56 = vor.u32 1.1754944e-38, %v1973_v1 }
 0x1b1   : > { %vm1972_vm11 = vcmp.eq.f32.partialorder %v1971_v14, 8.507059e+37 }
 0x1b2   : > { %v3067_v39 = vpop.eup %3066  ;;  %v2839_v43 = vmul.f32 -1.442695, %v1070_v34  ;;  %v576_v45 = vpop.f32.mrf.mxu0  ;;  %v1951_v41 = vadd.f32 %v3065_v0, %v1950_v29 }
 0x1b3   : > { %v4187_v44 = vadd.f32 1.0, %v3067_v39  ;;  %v824_v37 = vpop.f32.mrf.mxu1  ;;  %v577_v54 = vadd.f32 %v4153_v31, %v576_v45  ;;  %1179 = vmatmul.f32.gmra.mxu3 %v386_v40  ;;  %v3069_v59 = vpop.eup %3068 }
 0x1b4   : > { %3070 = vpow2.f32 %v2839_v43  ;;  %1119 = vmatmul.f32.gmra.mxu2 %v326_v8  ;;  %v1955_v63 = vsel %vm1954_vm6, %v3065_v0, %v1951_v41  ;;  %v1963_v51 = vmul.f32 %v3069_v59, %v4176_v22  ;;  %vm1968_vm8 = vweird.f32 %v3069_v59 }
 0x1b5   : > { %3072 = vrcp.f32 %v4187_v44  ;;  %v825_v2 = vadd.f32 %v824_v37, %v577_v54  ;;  %623 = vmatmul.f32.gmra.mxu0 %v324_v25  ;;  %v1960_v52 = vsel %vm1957_vm7, %v1959_v60, %v1955_v63  ;;  %vm1969_vm10 = vmor %vm1967_vm9, %vm1968_vm8  ;;  %v1986_v40 = vand.u32 2147483647, %v4187_v44  ;;  %v332_v37 = vld [vmem:[%s3522_s4 + $0x4d8] sm:$0xff] }
 0x1b6   : > { %871 = vmatmul.f32.gmra.mxu1 %v325_v49  ;;  %v941_v6 = vpop.f32.mrf.mxu3  ;;  %2696 = vst [vmem:[%s3682_s19 + $0xe8] sm:$0xff] %v1960_v52  ;;  %v1964_v17 = vsub.f32 1.0, %v1963_v51  ;;  %v1988_v39 = vand.u32 2147483648, %v4187_v44  ;;  %v392_v25 = vld [vmem:[%s3522_s4 + $0x6b8] sm:$0xff]  ;;  %vm1982_vm13 = vweird.f32 %v4187_v44  ;;  %v331_v52 = vld [vmem:[%s3522_s4 + $0x4d0] sm:$0xff] }
 0x1b7   : > { %v1072_v7 = vpop.f32.mrf.mxu2  ;;  %v4199_v11 = vadd.f32 %v941_v6, %v694_v47  ;;  %vm1987_vm15 = vcmp.eq.f32.partialorder %v1986_v40, 8.507059e+37 }
 0x1b8   : > { %v1073_v58 = vadd.f32 %v1072_v7, %v825_v2  ;;  %v1965_v53 = vmul.f32 %v3069_v59, %v1964_v17  ;;  %v1989_v47 = vor.u32 1.1754944e-38, %v1988_v39  ;;  %v330_v2 = vld [vmem:[%s3522_s4 + $0x4c8] sm:$0xff] }
 0x1ba   : > { %v3071_v5 = vpop.eup %3070  ;;  %v2840_v10 = vmul.f32 -1.442695, %v1073_v58  ;;  %v579_v20 = vpop.f32.mrf.mxu0  ;;  %v1966_v16 = vadd.f32 %v3069_v59, %v1965_v53 }
 0x1bb   : > { %v3073_v0 = vpop.eup %3072  ;;  %v4205_v18 = vadd.f32 1.0, %v3071_v5  ;;  %v827_v28 = vpop.f32.mrf.mxu1  ;;  %1182 = vmatmul.f32.gmra.mxu3 %v389_v3  ;;  %v580_v22 = vadd.f32 %v4153_v31, %v579_v20  ;;  %v335_v20 = vld [vmem:[%s3522_s4 + $0x4f0] sm:$0xff] }
 0x1bc   : > { %v1978_v9 = vmul.f32 %v3073_v0, %v4187_v44  ;;  %3074 = vpow2.f32 %v2840_v10  ;;  %1122 = vmatmul.f32.gmra.mxu2 %v329_v19  ;;  %v1970_v34 = vsel %vm1969_vm10, %v3069_v59, %v1966_v16  ;;  %vm1983_vm12 = vweird.f32 %v3073_v0 }
 0x1bd   : > { %3076 = vrcp.f32 %v4205_v18  ;;  %626 = vmatmul.f32.gmra.mxu0 %v327_v36  ;;  %v1975_v8 = vsel %vm1972_vm11, %v1974_v56, %v1970_v34  ;;  %v828_v43 = vadd.f32 %v827_v28, %v580_v22  ;;  %vm1984_vm14 = vmor %vm1982_vm13, %vm1983_vm12  ;;  %v700_v44 = vadd.f32 %v4153_v31, %v3883_v23  ;;  %v395_v28 = vld [vmem:[%s3522_s4 + $0x6d0] sm:$0xff]  ;;  %v333_v34 = vld [vmem:[%s3522_s4 + $0x4e0] sm:$0xff] }
 0x1be   : > { %v1979_v35 = vsub.f32 1.0, %v1978_v9  ;;  %874 = vmatmul.f32.gmra.mxu1 %v328_v30  ;;  %v944_v48 = vpop.f32.mrf.mxu3  ;;  %2697 = vst [vmem:[%s3682_s19 + $0xf0] sm:$0xff] %v1975_v8  ;;  %v2001_v3 = vand.u32 2147483647, %v4205_v18  ;;  %v2003_v5 = vand.u32 2147483648, %v4205_v18  ;;  %vm1997_vm1 = vweird.f32 %v4205_v18 }
 0x1bf   : > { %v1075_v29 = vpop.f32.mrf.mxu2  ;;  %v4219_v45 = vadd.f32 %v944_v48, %v697_v33 }
 0x1c0   : > { %v1980_v13 = vmul.f32 %v3073_v0, %v1979_v35  ;;  %v1076_v54 = vadd.f32 %v1075_v29, %v828_v43  ;;  %v2004_v9 = vor.u32 1.1754944e-38, %v2003_v5  ;;  %v334_v35 = vld [vmem:[%s3522_s4 + $0x4e8] sm:$0xff]  ;;  %vm2002_vm3 = vcmp.eq.f32.partialorder %v2001_v3, 8.507059e+37 }
 0x1c2   : > { %v3075_v49 = vpop.eup %3074  ;;  %v1981_v41 = vadd.f32 %v3073_v0, %v1980_v13  ;;  %v582_v63 = vpop.f32.mrf.mxu0  ;;  %v2841_v17 = vmul.f32 -1.442695, %v1076_v54  ;;  %v703_v13 = vadd.f32 %v4153_v31, %v3899_v55 }
 0x1c3   : > { %v3077_v59 = vpop.eup %3076  ;;  %v4224_v60 = vadd.f32 1.0, %v3075_v49  ;;  %v830_v51 = vpop.f32.mrf.mxu1  ;;  %1185 = vmatmul.f32.gmra.mxu3 %v392_v25  ;;  %v583_v19 = vadd.f32 %v4153_v31, %v582_v63  ;;  %v398_v63 = vld [vmem:[%s3522_s4 + $0x6e8] sm:$0xff] }
 0x1c4   : > { %v1985_v6 = vsel %vm1984_vm14, %v3073_v0, %v1981_v41  ;;  %v1993_v7 = vmul.f32 %v3077_v59, %v4205_v18  ;;  %1125 = vmatmul.f32.gmra.mxu2 %v332_v37  ;;  %vm1998_vm0 = vweird.f32 %v3077_v59 }
 0x1c5   : > { %v1990_v58 = vsel %vm1987_vm15, %v1989_v47, %v1985_v6  ;;  %3078 = vrcp.f32 %v4224_v60  ;;  %629 = vmatmul.f32.gmra.mxu0 %v330_v2  ;;  %v831_v0 = vadd.f32 %v830_v51, %v583_v19  ;;  %vm1999_vm2 = vmor %vm1997_vm1, %vm1998_vm0  ;;  %v2016_v37 = vand.u32 2147483647, %v4224_v60  ;;  %v338_v47 = vld [vmem:[%s3522_s4 + $0x508] sm:$0xff] }
 0x1c6   : > { %2698 = vst [vmem:[%s3682_s19 + $0xf8] sm:$0xff] %v1990_v58  ;;  %v1994_v1 = vsub.f32 1.0, %v1993_v7  ;;  %3080 = vpow2.f32 %v2841_v17  ;;  %877 = vmatmul.f32.gmra.mxu1 %v331_v52  ;;  %v947_v53 = vpop.f32.mrf.mxu3  ;;  %v2018_v25 = vand.u32 2147483648, %v4224_v60  ;;  %vm2012_vm5 = vweird.f32 %v4224_v60  ;;  %v336_v58 = vld [vmem:[%s3522_s4 + $0x4f8] sm:$0xff] }
 0x1c7   : > { %v1078_v14 = vpop.f32.mrf.mxu2  ;;  %v4236_v23 = vadd.f32 %v947_v53, %v700_v44  ;;  %v337_v44 = vld [vmem:[%s3522_s4 + $0x500] sm:$0xff]  ;;  %vm2017_vm7 = vcmp.eq.f32.partialorder %v2016_v37, 8.507059e+37  ;;  %v706_v53 = vadd.f32 %v4153_v31, %v3914_v26 }
 0x1c8   : > { %v1995_v10 = vmul.f32 %v3077_v59, %v1994_v1  ;;  %v1079_v30 = vadd.f32 %v1078_v14, %v831_v0  ;;  %v2019_v6 = vor.u32 1.1754944e-38, %v2018_v25 }
 0x1ca   : > { %v1996_v36 = vadd.f32 %v3077_v59, %v1995_v10  ;;  %v585_v33 = vpop.f32.mrf.mxu0  ;;  %v2842_v39 = vmul.f32 -1.442695, %v1079_v30 }
 0x1cb   : > { %v3079_v16 = vpop.eup %3078  ;;  %v833_v56 = vpop.f32.mrf.mxu1  ;;  %1188 = vmatmul.f32.gmra.mxu3 %v395_v28  ;;  %v586_v18 = vadd.f32 %v4153_v31, %v585_v33  ;;  %v341_v33 = vld [vmem:[%s3522_s4 + $0x520] sm:$0xff] }
 0x1cc   : > { %v3081_v22 = vpop.eup %3080  ;;  %v2000_v8 = vsel %vm1999_vm2, %v3077_v59, %v1996_v36  ;;  %v2008_v40 = vmul.f32 %v3079_v16, %v4224_v60  ;;  %1128 = vmatmul.f32.gmra.mxu2 %v335_v20  ;;  %3082 = vpow2.f32 %v2842_v39  ;;  %vm2013_vm4 = vweird.f32 %v3079_v16  ;;  %v339_v39 = vld [vmem:[%s3522_s4 + $0x510] sm:$0xff] }
 0x1cd   : > { %v2005_v48 = vsel %vm2002_vm3, %v2004_v9, %v2000_v8  ;;  %v4244_v29 = vadd.f32 1.0, %v3081_v22  ;;  %632 = vmatmul.f32.gmra.mxu0 %v333_v34  ;;  %v834_v59 = vadd.f32 %v833_v56, %v586_v18  ;;  %vm4258_vm6 = vmor %vm2012_vm5, %vm2013_vm4  ;;  %v401_v56 = vld [vmem:[%s3522_s4 + $0x700] sm:$0xff] }
 0x1ce   : > { %2699 = vst [vmem:[%s3682_s19 + $0x100] sm:$0xff] %v2005_v48  ;;  %v2009_v43 = vsub.f32 1.0, %v2008_v40  ;;  %880 = vmatmul.f32.gmra.mxu1 %v334_v35  ;;  %v950_v49 = vpop.f32.mrf.mxu3  ;;  %v340_v48 = vld [vmem:[%s3522_s4 + $0x518] sm:$0xff] }
 0x1cf   : > { %3084 = vrcp.f32 %v4244_v29  ;;  %v1081_v41 = vpop.f32.mrf.mxu2  ;;  %v4253_v55 = vadd.f32 %v950_v49, %v703_v13  ;;  %v2033_v9 = vand.u32 2147483648, %v4244_v29  ;;  %v2031_v35 = vand.u32 2147483647, %v4244_v29 }
 0x1d0   : > { %v2010_v54 = vmul.f32 %v3079_v16, %v2009_v43  ;;  %v1082_v2 = vadd.f32 %v1081_v41, %v834_v59  ;;  %vm2027_vm9 = vweird.f32 %v4244_v29 }
 0x1d1   : > { %v2034_v25 = vor.u32 1.1754944e-38, %v2033_v9  ;;  %vm2032_vm11 = vcmp.eq.f32.partialorder %v2031_v35, 8.507059e+37 }
 0x1d2   : > { %v2011_v51 = vadd.f32 %v3079_v16, %v2010_v54  ;;  %v588_v7 = vpop.f32.mrf.mxu0  ;;  %v3083_v1 = vpop.eup %3082  ;;  %v2843_v3 = vmul.f32 -1.442695, %v1082_v2 }
 0x1d3   : > { %v836_v17 = vpop.f32.mrf.mxu1  ;;  %v589_v5 = vadd.f32 %v4153_v31, %v588_v7  ;;  %1191 = vmatmul.f32.gmra.mxu3 %v398_v63  ;;  %v4269_v10 = vadd.f32 1.0, %v3083_v1 }
 0x1d4   : > { %v2015_v19 = vsel %vm4258_vm6, %v3079_v16, %v2011_v51  ;;  %1131 = vmatmul.f32.gmra.mxu2 %v338_v47  ;;  %3086 = vpow2.f32 %v2843_v3 }
 0x1d5   : > { %v3085_v60 = vpop.eup %3084  ;;  %v2020_v14 = vsel %vm2017_vm7, %v2019_v6, %v2015_v19  ;;  %v837_v20 = vadd.f32 %v836_v17, %v589_v5  ;;  %635 = vmatmul.f32.gmra.mxu0 %v336_v58  ;;  %3088 = vrcp.f32 %v4269_v10  ;;  %v2046_v6 = vand.u32 2147483647, %v4269_v10  ;;  %v344_v17 = vld [vmem:[%s3522_s4 + $0x538] sm:$0xff] }
 0x1d6   : > { %2700 = vst [vmem:[%s3682_s19 + $0x108] sm:$0xff] %v2020_v14  ;;  %v2023_v0 = vmul.f32 %v3085_v60, %v4244_v29  ;;  %883 = vmatmul.f32.gmra.mxu1 %v337_v44  ;;  %v953_v28 = vpop.f32.mrf.mxu3  ;;  %vm2028_vm8 = vweird.f32 %v3085_v60  ;;  %v2048_v7 = vand.u32 2147483648, %v4269_v10  ;;  %v404_v58 = vld [vmem:[%s3522_s4 + $0x718] sm:$0xff]  ;;  %v342_v14 = vld [vmem:[%s3522_s4 + $0x528] sm:$0xff]  ;;  %vm2042_vm13 = vweird.f32 %v4269_v10 }
 0x1d7   : > { %v1084_v36 = vpop.f32.mrf.mxu2  ;;  %v4274_v26 = vadd.f32 %v953_v28, %v706_v53  ;;  %vm2029_vm10 = vmor %vm2027_vm9, %vm2028_vm8  ;;  %vm2047_vm15 = vcmp.eq.f32.partialorder %v2046_v6, 8.507059e+37 }
 0x1d8   : > { %v2024_v30 = vsub.f32 1.0, %v2023_v0  ;;  %v1085_v16 = vadd.f32 %v1084_v36, %v837_v20  ;;  %v343_v0 = vld [vmem:[%s3522_s4 + $0x530] sm:$0xff]  ;;  %v2049_v36 = vor.u32 1.1754944e-38, %v2048_v7 }
 0x1da   : > { %v2025_v34 = vmul.f32 %v3085_v60, %v2024_v30  ;;  %v2844_v22 = vmul.f32 -1.442695, %v1085_v16  ;;  %v591_v8 = vpop.f32.mrf.mxu0  ;;  %v3087_v18 = vpop.eup %3086 }
 0x1db   : > { %v839_v40 = vpop.f32.mrf.mxu1  ;;  %v592_v43 = vadd.f32 %v4153_v31, %v591_v8  ;;  %1194 = vmatmul.f32.gmra.mxu3 %v401_v56  ;;  %v3089_v37 = vpop.eup %3088  ;;  %v4285_v49 = vadd.f32 1.0, %v3087_v18 }
 0x1dc   : > { %v2026_v13 = vadd.f32 %v3085_v60, %v2025_v34  ;;  %3090 = vpow2.f32 %v2844_v22  ;;  %1134 = vmatmul.f32.gmra.mxu2 %v341_v33  ;;  %v2038_v54 = vmul.f32 %v3089_v37, %v4269_v10  ;;  %vm2043_vm12 = vweird.f32 %v3089_v37 }
 0x1dd   : > { %v840_v59 = vadd.f32 %v839_v40, %v592_v43  ;;  %638 = vmatmul.f32.gmra.mxu0 %v339_v39  ;;  %3092 = vrcp.f32 %v4285_v49  ;;  %vm2044_vm14 = vmor %vm2042_vm13, %vm2043_vm12  ;;  %v2061_v22 = vand.u32 2147483647, %v4285_v49  ;;  %v2063_v8 = vand.u32 2147483648, %v4285_v49  ;;  %v347_v39 = vld [vmem:[%s3522_s4 + $0x550] sm:$0xff] }
 0x1de   : > { %v2030_v41 = vsel %vm2029_vm10, %v3085_v60, %v2026_v13  ;;  %886 = vmatmul.f32.gmra.mxu1 %v340_v48  ;;  %v1147_v63 = vpop.f32.mrf.mxu3  ;;  %v2039_v51 = vsub.f32 1.0, %v2038_v54  ;;  %v407_v48 = vld [vmem:[%s3522_s4 + $0x730] sm:$0xff]  ;;  %vm2057_vm1 = vweird.f32 %v4285_v49 }
 0x1df   : > { %v2035_v29 = vsel %vm2032_vm11, %v2034_v25, %v2030_v41  ;;  %v1087_v47 = vpop.f32.mrf.mxu2  ;;  %v1148_v52 = vadd.f32 %v1147_v63, %v3936_v57  ;;  %vm2062_vm3 = vcmp.eq.f32.partialorder %v2061_v22, 8.507059e+37 }
 0x1e0   : > { %2701 = vst [vmem:[%s3682_s19 + $0x110] sm:$0xff] %v2035_v29  ;;  %v1088_v2 = vadd.f32 %v1087_v47, %v840_v59  ;;  %v2040_v1 = vmul.f32 %v3089_v37, %v2039_v51  ;;  %v345_v29 = vld [vmem:[%s3522_s4 + $0x540] sm:$0xff] }
 0x1e1   : > { %v2865_v3 = vmul.f32 -1.442695, %v1148_v52 }
 0x1e2   : > { %v3091_v44 = vpop.eup %3090  ;;  %v2845_v19 = vmul.f32 -1.442695, %v1088_v2  ;;  %v594_v60 = vpop.f32.mrf.mxu0  ;;  %v2041_v20 = vadd.f32 %v3089_v37, %v2040_v1  ;;  %v2064_v2 = vor.u32 1.1754944e-38, %v2063_v8 }
 0x1e3   : > { %v4295_v5 = vadd.f32 1.0, %v3091_v44  ;;  %v842_v53 = vpop.f32.mrf.mxu1  ;;  %v595_v57 = vadd.f32 %v4153_v31, %v594_v60  ;;  %1197 = vmatmul.f32.gmra.mxu3 %v404_v58  ;;  %v3093_v28 = vpop.eup %3092 }
 0x1e4   : > { %3094 = vpow2.f32 %v2845_v19  ;;  %1137 = vmatmul.f32.gmra.mxu2 %v344_v17  ;;  %v2045_v30 = vsel %vm2044_vm14, %v3089_v37, %v2041_v20  ;;  %v2053_v16 = vmul.f32 %v3093_v28, %v4285_v49  ;;  %vm2058_vm0 = vweird.f32 %v3093_v28 }
 0x1e5   : > { %3096 = vrcp.f32 %v4295_v5  ;;  %641 = vmatmul.f32.gmra.mxu0 %v342_v14  ;;  %v2050_v10 = vsel %vm2047_vm15, %v2049_v36, %v2045_v30  ;;  %v843_v9 = vadd.f32 %v842_v53, %v595_v57  ;;  %vm2059_vm2 = vmor %vm2057_vm1, %vm2058_vm0  ;;  %v2076_v52 = vand.u32 2147483647, %v4295_v5  ;;  %v350_v14 = vld [vmem:[%s3522_s4 + $0x568] sm:$0xff]  ;;  %v349_v36 = vld [vmem:[%s3522_s4 + $0x560] sm:$0xff] }
 0x1e6   : > { %3098 = vpow2.f32 %v2865_v3  ;;  %889 = vmatmul.f32.gmra.mxu1 %v343_v0  ;;  %v1150_v56 = vpop.f32.mrf.mxu3  ;;  %2702 = vst [vmem:[%s3682_s19 + $0x118] sm:$0xff] %v2050_v10  ;;  %v2054_v34 = vsub.f32 1.0, %v2053_v16  ;;  %v2078_v58 = vand.u32 2147483648, %v4295_v5  ;;  %vm2072_vm5 = vweird.f32 %v4295_v5 }
 0x1e7   : > { %v1090_v33 = vpop.f32.mrf.mxu2  ;;  %v1151_v35 = vadd.f32 %v1150_v56, %v3954_v38  ;;  %v346_v38 = vld [vmem:[%s3522_s4 + $0x548] sm:$0xff]  ;;  %vm4328_vm6 = vcmp.eq.f32.partialorder %v2076_v52, 8.507059e+37 }
 0x1e8   : > { %v1091_v40 = vadd.f32 %v1090_v33, %v843_v9  ;;  %v2055_v13 = vmul.f32 %v3093_v28, %v2054_v34  ;;  %v2079_v16 = vor.u32 1.1754944e-38, %v2078_v58 }
 0x1e9   : > { %v2866_v43 = vmul.f32 -1.442695, %v1151_v35 }
 0x1ea   : > { %v3095_v18 = vpop.eup %3094  ;;  %v2846_v41 = vmul.f32 -1.442695, %v1091_v40  ;;  %v597_v54 = vpop.f32.mrf.mxu0  ;;  %v2056_v63 = vadd.f32 %v3093_v28, %v2055_v13 }
 0x1eb   : > { %v3097_v37 = vpop.eup %3096  ;;  %v4310_v25 = vadd.f32 1.0, %v3095_v18  ;;  %v845_v59 = vpop.f32.mrf.mxu1  ;;  %3100 = vpow2.f32 %v2866_v43  ;;  %1200 = vmatmul.f32.gmra.mxu3 %v407_v48  ;;  %v598_v44 = vadd.f32 %v4153_v31, %v597_v54 }
 0x1ec   : > { %v3099_v47 = vpop.eup %3098  ;;  %v2068_v51 = vmul.f32 %v3097_v37, %v4295_v5  ;;  %1140 = vmatmul.f32.gmra.mxu2 %v347_v39  ;;  %v2060_v6 = vsel %vm2059_vm2, %v3093_v28, %v2056_v63  ;;  %vm2073_vm4 = vweird.f32 %v3097_v37  ;;  %v348_v28 = vld [vmem:[%s3522_s4 + $0x558] sm:$0xff] }
 0x1ed   : > { %3102 = vrcp.f32 %v4310_v25  ;;  %v4319_v17 = vadd.f32 1.0, %v3099_v47  ;;  %644 = vmatmul.f32.gmra.mxu0 %v345_v29  ;;  %v2065_v49 = vsel %vm2062_vm3, %v2064_v2, %v2060_v6  ;;  %v846_v60 = vadd.f32 %v845_v59, %v598_v44  ;;  %vm2074_vm7 = vmor %vm2072_vm5, %vm2073_vm4 }
 0x1ee   : > { %v2069_v7 = vsub.f32 1.0, %v2068_v51  ;;  %3104 = vpow2.f32 %v2846_v41  ;;  %892 = vmatmul.f32.gmra.mxu1 %v346_v38  ;;  %v1153_v19 = vpop.f32.mrf.mxu3  ;;  %2703 = vst [vmem:[%s3682_s19 + $0x120] sm:$0xff] %v2065_v49  ;;  %v2091_v10 = vand.u32 2147483647, %v4310_v25  ;;  %v2093_v22 = vand.u32 2147483648, %v4310_v25 }
 0x1ef   : > { %v1093_v1 = vpop.f32.mrf.mxu2  ;;  %3106 = vrcp.f32 %v4319_v17  ;;  %v1154_v53 = vadd.f32 %v1153_v19, %v3972_v12  ;;  %v2391_v43 = vand.u32 2147483647, %v4319_v17  ;;  %vm2087_vm8 = vweird.f32 %v4310_v25 }
 0x1f0   : > { %v2070_v3 = vmul.f32 %v3097_v37, %v2069_v7  ;;  %v1094_v8 = vadd.f32 %v1093_v1, %v846_v60  ;;  %vm4351_vm10 = vcmp.eq.f32.partialorder %v2091_v10, 8.507059e+37  ;;  %v2094_v47 = vor.u32 1.1754944e-38, %v2093_v22 }
 0x1f1   : > { %v3101_v0 = vpop.eup %3100  ;;  %v2867_v12 = vmul.f32 -1.442695, %v1154_v53  ;;  %vm2387_vm11 = vweird.f32 %v4319_v17  ;;  %vm4356_vm12 = vcmp.eq.f32.partialorder %v2391_v43, 8.507059e+37 }
 0x1f2   : > { %v2071_v20 = vadd.f32 %v3097_v37, %v2070_v3  ;;  %v4335_v9 = vadd.f32 1.0, %v3101_v0  ;;  %v600_v33 = vpop.f32.mrf.mxu0  ;;  %v2847_v51 = vmul.f32 -1.442695, %v1094_v8 }
 0x1f3   : > { %v3103_v30 = vpop.eup %3102  ;;  %v848_v56 = vpop.f32.mrf.mxu1  ;;  %v601_v48 = vadd.f32 %v4153_v31, %v600_v33 }
 0x1f4   : > { %v3105_v34 = vpop.eup %3104  ;;  %v2075_v35 = vsel %vm2074_vm7, %v3097_v37, %v2071_v20  ;;  %v2083_v5 = vmul.f32 %v3103_v30, %v4310_v25  ;;  %1143 = vmatmul.f32.gmra.mxu2 %v350_v14  ;;  %3108 = vrcp.f32 %v4335_v9  ;;  %v2393_v37 = vand.u32 2147483648, %v4319_v17 }
 0x1f5   : > { %v2080_v40 = vsel %vm4328_vm6, %v2079_v16, %v2075_v35  ;;  %v4341_v39 = vadd.f32 1.0, %v3105_v34  ;;  %v3107_v18 = vpop.eup %3106  ;;  %3110 = vpow2.f32 %v2867_v12  ;;  %647 = vmatmul.f32.gmra.mxu0 %v348_v28  ;;  %vm2088_vm9 = vweird.f32 %v3103_v30 }
 0x1f6   : > { %2704 = vst [vmem:[%s3682_s19 + $0x128] sm:$0xff] %v2080_v40  ;;  %v2084_v13 = vsub.f32 1.0, %v2083_v5  ;;  %895 = vmatmul.f32.gmra.mxu1 %v349_v36  ;;  %v2383_v41 = vmul.f32 %v3107_v18, %v4319_v17  ;;  %v1156_v59 = vpop.f32.mrf.mxu3  ;;  %v849_v2 = vadd.f32 %v848_v56, %v601_v48  ;;  %v2394_v7 = vor.u32 1.1754944e-38, %v2393_v37  ;;  %vm2089_vm13 = vmor %vm2087_vm8, %vm2088_vm9 }
 0x1f7   : > { %3112 = vrcp.f32 %v4341_v39  ;;  %v1096_v54 = vpop.f32.mrf.mxu2  ;;  %v1157_v49 = vadd.f32 %v1156_v59, %v3992_v46  ;;  %vm2388_vm14 = vweird.f32 %v3107_v18  ;;  %vm2402_vm15 = vweird.f32 %v4335_v9 }
 0x1f8   : > { %v2085_v29 = vmul.f32 %v3103_v30, %v2084_v13  ;;  %v2384_v63 = vsub.f32 1.0, %v2383_v41  ;;  %3114 = vpow2.f32 %v2847_v51  ;;  %v1097_v1 = vadd.f32 %v1096_v54, %v849_v2  ;;  %vm2389_vm0 = vmor %vm2387_vm11, %vm2388_vm14 }
 0x1f9   : > { %v2868_v0 = vmul.f32 -1.442695, %v1157_v49  ;;  %v2406_v16 = vand.u32 2147483647, %v4335_v9  ;;  %v2106_v12 = vand.u32 2147483647, %v4341_v39  ;;  %vm2102_vm3 = vweird.f32 %v4341_v39 }
 0x1fa   : > { %v2086_v52 = vadd.f32 %v3103_v30, %v2085_v29  ;;  %v3109_v58 = vpop.eup %3108  ;;  %v2385_v44 = vmul.f32 %v3107_v18, %v2384_v63  ;;  %v603_v19 = vpop.f32.mrf.mxu0  ;;  %v2848_v28 = vmul.f32 -1.442695, %v1097_v1  ;;  %v2408_v33 = vand.u32 2147483648, %v4335_v9 }
 0x1fb   : > { %v851_v3 = vpop.f32.mrf.mxu1  ;;  %v3111_v60 = vpop.eup %3110  ;;  %v2398_v14 = vmul.f32 %v3109_v58, %v4335_v9  ;;  %3116 = vpow2.f32 %v2868_v0  ;;  %vm2403_vm1 = vweird.f32 %v3109_v58  ;;  %v2108_v8 = vand.u32 2147483648, %v4341_v39 }
 0x1fc   : > { %v2090_v53 = vsel %vm2089_vm13, %v3103_v30, %v2086_v52  ;;  %v2386_v25 = vadd.f32 %v3107_v18, %v2385_v44  ;;  %v4367_v57 = vadd.f32 1.0, %v3111_v60  ;;  %v604_v40 = vadd.f32 %v4153_v31, %v603_v19  ;;  %vm2404_vm4 = vmor %vm2402_vm15, %vm2403_vm1 }
 0x1fd   : > { %v3113_v20 = vpop.eup %3112  ;;  %v2095_v46 = vsel %vm4351_vm10, %v2094_v47, %v2090_v53  ;;  %v2399_v30 = vsub.f32 1.0, %v2398_v14  ;;  %vm2407_vm5 = vcmp.eq.f32.partialorder %v2406_v16, 8.507059e+37  ;;  %v2409_v37 = vor.u32 1.1754944e-38, %v2408_v33 }
 0x1fe   : > { %2705 = vst [vmem:[%s3682_s19 + $0x130] sm:$0xff] %v2095_v46  ;;  %v2098_v36 = vmul.f32 %v3113_v20, %v4341_v39  ;;  %v2390_v10 = vsel %vm2389_vm0, %v3107_v18, %v2386_v25  ;;  %3118 = vrcp.f32 %v4367_v57  ;;  %v1159_v34 = vpop.f32.mrf.mxu3  ;;  %v3115_v22 = vpop.eup %3114  ;;  %vm2103_vm2 = vweird.f32 %v3113_v20 }
 0x1ff   : > { %v1099_v56 = vpop.f32.mrf.mxu2  ;;  %v2395_v17 = vsel %vm4356_vm12, %v2394_v7, %v2390_v10  ;;  %v2400_v5 = vmul.f32 %v3109_v58, %v2399_v30  ;;  %3120 = vpow2.f32 %v2848_v28  ;;  %v1160_v48 = vadd.f32 %v1159_v34, %v4009_v62  ;;  %vm2104_vm7 = vmor %vm2102_vm3, %vm2103_vm2 }
 0x200   : > { %v2099_v35 = vsub.f32 1.0, %v2098_v36  ;;  %2725 = vst [vmem:[%s3682_s19 + $0x1d0] sm:$0xff] %v2395_v17  ;;  %v4384_v43 = vadd.f32 1.0, %v3115_v22  ;;  %v852_v41 = vadd.f32 %v851_v3, %v604_v40  ;;  %vm2107_vm6 = vcmp.eq.f32.partialorder %v2106_v12, 8.507059e+37 }
 0x201   : > { %v2401_v13 = vadd.f32 %v3109_v58, %v2400_v5  ;;  %v3117_v29 = vpop.eup %3116  ;;  %v2109_v63 = vor.u32 1.1754944e-38, %v2108_v8  ;;  %v2869_v51 = vmul.f32 -1.442695, %v1160_v48  ;;  %v2421_v6 = vand.u32 2147483647, %v4367_v57 }
 0x202   : > { %v2100_v18 = vmul.f32 %v3113_v20, %v2099_v35  ;;  %v606_v54 = vpop.f32.mrf.mxu0  ;;  %3122 = vrcp.f32 %v4384_v43  ;;  %v4391_v9 = vadd.f32 1.0, %v3117_v29  ;;  %v1100_v7 = vadd.f32 %v1099_v56, %v852_v41 }
 0x203   : > { %v854_v59 = vpop.f32.mrf.mxu1  ;;  %v2405_v62 = vsel %vm2404_vm4, %v3109_v58, %v2401_v13  ;;  %v2121_v44 = vand.u32 2147483647, %v4384_v43  ;;  %v2423_v1 = vand.u32 2147483648, %v4367_v57  ;;  %v2123_v60 = vand.u32 2147483648, %v4384_v43 }
 0x204   : > { %v2101_v38 = vadd.f32 %v3113_v20, %v2100_v18  ;;  %v3119_v47 = vpop.eup %3118  ;;  %v2410_v39 = vsel %vm2407_vm5, %v2409_v37, %v2405_v62  ;;  %3124 = vrcp.f32 %v4391_v9  ;;  %vm2417_vm8 = vweird.f32 %v4367_v57 }
 0x205   : > { %2726 = vst [vmem:[%s3682_s19 + $0x1d8] sm:$0xff] %v2410_v39  ;;  %v2413_v52 = vmul.f32 %v3119_v47, %v4367_v57  ;;  %v3121_v49 = vpop.eup %3120  ;;  %v2849_v0 = vmul.f32 -1.442695, %v1100_v7  ;;  %3126 = vpow2.f32 %v2869_v51  ;;  %vm2418_vm9 = vweird.f32 %v3119_v47  ;;  %v4429_v57 = vld [vmem:[%s5047_s2] ss:$0 sm:$0xff] }
 0x206   : > { %v2105_v2 = vsel %vm2104_vm7, %v3113_v20, %v2101_v38  ;;  %v1162_v3 = vpop.f32.mrf.mxu3  ;;  %v4401_v14 = vadd.f32 1.0, %v3121_v49  ;;  %v607_v20 = vadd.f32 %v4153_v31, %v606_v54  ;;  %vm4405_vm10 = vcmp.eq.f32.partialorder %v2421_v6, 8.507059e+37  ;;  %vm2419_vm14 = vmor %vm2417_vm8, %vm2418_vm9 }
 0x207   : > { %v2110_v58 = vsel %vm2107_vm6, %v2109_v63, %v2105_v2  ;;  %v1102_v19 = vpop.f32.mrf.mxu2  ;;  %v2414_v53 = vsub.f32 1.0, %v2413_v52  ;;  %vm2117_vm11 = vweird.f32 %v4384_v43  ;;  %vm4412_vm12 = vcmp.eq.f32.partialorder %v2121_v44, 8.507059e+37 }
 0x208   : > { %2706 = vst [vmem:[%s3682_s19 + $0x138] sm:$0xff] %v2110_v58  ;;  %v3123_v46 = vpop.eup %3122  ;;  %3128 = vrcp.f32 %v4401_v14  ;;  %v2424_v16 = vor.u32 1.1754944e-38, %v2423_v1  ;;  %v2124_v12 = vor.u32 1.1754944e-38, %v2123_v60  ;;  %vm2432_vm13 = vweird.f32 %v4391_v9 }
 0x209   : > { %v2415_v25 = vmul.f32 %v3119_v47, %v2414_v53  ;;  %v2113_v36 = vmul.f32 %v3123_v46, %v4384_v43  ;;  %3130 = vpow2.f32 %v2849_v0  ;;  %v2436_v17 = vand.u32 2147483647, %v4391_v9 }
 0x20a   : > { %v609_v10 = vpop.f32.mrf.mxu0  ;;  %v3125_v56 = vpop.eup %3124  ;;  %v2438_v35 = vand.u32 2147483648, %v4391_v9  ;;  %v855_v5 = vadd.f32 %v854_v59, %v607_v20  ;;  %vm2118_vm15 = vweird.f32 %v3123_v46  ;;  %v1163_v40 = vadd.f32 %v1162_v3, %v4026_v24 }
 0x20b   : > { %v857_v31 = vpop.f32.mrf.mxu1  ;;  %v2416_v33 = vadd.f32 %v3119_v47, %v2415_v25  ;;  %v2114_v34 = vsub.f32 1.0, %v2113_v36  ;;  %v2428_v8 = vmul.f32 %v3125_v56, %v4391_v9  ;;  %v3127_v48 = vpop.eup %3126  ;;  %v610_v41 = vadd.f32 %v4429_v57, %v609_v10  ;;  %vm2119_vm1 = vmor %vm2117_vm11, %vm2118_vm15 }
 0x20c   : > { %v1103_v37 = vadd.f32 %v1102_v19, %v855_v5  ;;  %vm2132_vm0 = vweird.f32 %v4401_v14  ;;  %v2136_v24 = vand.u32 2147483647, %v4401_v14  ;;  %v4435_v62 = vadd.f32 1.0, %v3127_v48 }
 0x20d   : > { %v2420_v22 = vsel %vm2419_vm14, %v3119_v47, %v2416_v33  ;;  %v2115_v18 = vmul.f32 %v3123_v46, %v2114_v34  ;;  %v2429_v38 = vsub.f32 1.0, %v2428_v8  ;;  %v2138_v39 = vand.u32 2147483648, %v4401_v14 }
 0x20e   : > { %v2425_v13 = vsel %vm4405_vm10, %v2424_v16, %v2420_v22  ;;  %v1165_v59 = vpop.f32.mrf.mxu3  ;;  %v3129_v29 = vpop.eup %3128  ;;  %v2850_v51 = vmul.f32 -1.442695, %v1103_v37  ;;  %vm2433_vm2 = vweird.f32 %v3125_v56  ;;  %3132 = vrcp.f32 %v4435_v62 }
 0x20f   : > { %v1105_v54 = vpop.f32.mrf.mxu2  ;;  %2727 = vst [vmem:[%s3682_s19 + $0x1e0] sm:$0xff] %v2425_v13  ;;  %v2116_v47 = vadd.f32 %v3123_v46, %v2115_v18  ;;  %v2128_v63 = vmul.f32 %v3129_v29, %v4401_v14  ;;  %v3131_v2 = vpop.eup %3130  ;;  %v2430_v52 = vmul.f32 %v3125_v56, %v2429_v38  ;;  %v2870_v6 = vmul.f32 -1.442695, %v1163_v40  ;;  %vm2434_vm4 = vmor %vm2432_vm13, %vm2433_vm2 }
 0x210   : > { %v4443_v58 = vadd.f32 1.0, %v3131_v2  ;;  %v858_v44 = vadd.f32 %v857_v31, %v610_v41  ;;  %3134 = vpow2.f32 %v2850_v51  ;;  %v1166_v43 = vadd.f32 %v1165_v59, %v4047_v50 }
 0x211   : > { %v2120_v7 = vsel %vm2119_vm1, %v3123_v46, %v2116_v47  ;;  %v2129_v49 = vsub.f32 1.0, %v2128_v63  ;;  %v2431_v60 = vadd.f32 %v3125_v56, %v2430_v52  ;;  %vm2133_vm3 = vweird.f32 %v3129_v29 }
 0x212   : > { %v612_v1 = vpop.f32.mrf.mxu0  ;;  %v2125_v3 = vsel %vm4412_vm12, %v2124_v12, %v2120_v7  ;;  %v2439_v0 = vor.u32 1.1754944e-38, %v2438_v35  ;;  %3136 = vrcp.f32 %v4443_v58  ;;  %vm4453_vm5 = vcmp.eq.f32.partialorder %v2136_v24, 8.507059e+37  ;;  %vm2134_vm7 = vmor %vm2132_vm0, %vm2133_vm3 }
 0x213   : > { %v860_v19 = vpop.f32.mrf.mxu1  ;;  %2707 = vst [vmem:[%s3682_s19 + $0x140] sm:$0xff] %v2125_v3  ;;  %v2130_v53 = vmul.f32 %v3129_v29, %v2129_v49  ;;  %v2435_v46 = vsel %vm2434_vm4, %v3125_v56, %v2431_v60  ;;  %vm2437_vm6 = vcmp.eq.f32.partialorder %v2436_v17, 8.507059e+37  ;;  %3138 = vpow2.f32 %v2870_v6 }
 0x214   : > { %v2139_v50 = vor.u32 1.1754944e-38, %v2138_v39  ;;  %v2440_v28 = vsel %vm2437_vm6, %v2439_v0, %v2435_v46  ;;  %v1106_v36 = vadd.f32 %v1105_v54, %v858_v44  ;;  %v3133_v10 = vpop.eup %3132  ;;  %v2451_v9 = vand.u32 2147483647, %v4435_v62 }
 0x215   : > { %v2131_v25 = vadd.f32 %v3129_v29, %v2130_v53  ;;  %2728 = vst [vmem:[%s3682_s19 + $0x1e8] sm:$0xff] %v2440_v28  ;;  %v2871_v31 = vmul.f32 -1.442695, %v1166_v43  ;;  %v613_v12 = vadd.f32 %v4429_v57, %v612_v1  ;;  %v2443_v34 = vmul.f32 %v3133_v10, %v4435_v62 }
 0x216   : > { %v1168_v16 = vpop.f32.mrf.mxu3  ;;  %v2453_v17 = vand.u32 2147483648, %v4435_v62  ;;  %v2851_v35 = vmul.f32 -1.442695, %v1106_v36  ;;  %v3135_v5 = vpop.eup %3134  ;;  %v2151_v48 = vand.u32 2147483647, %v4443_v58  ;;  %vm2447_vm8 = vweird.f32 %v4435_v62 }
 0x217   : > { %v1108_v30 = vpop.f32.mrf.mxu2  ;;  %v1169_v33 = vadd.f32 %v1168_v16, %v4065_v4  ;;  %v2135_v56 = vsel %vm2134_vm7, %v3129_v29, %v2131_v25  ;;  %3140 = vpow2.f32 %v2871_v31  ;;  %v861_v22 = vadd.f32 %v860_v19, %v613_v12 }
 0x218   : > { %v2140_v14 = vsel %vm4453_vm5, %v2139_v50, %v2135_v56  ;;  %v3137_v40 = vpop.eup %3136  ;;  %v2444_v18 = vsub.f32 1.0, %v2443_v34  ;;  %v4470_v13 = vadd.f32 1.0, %v3135_v5  ;;  %3142 = vpow2.f32 %v2851_v35 }
 0x219   : > { %v2872_v8 = vmul.f32 -1.442695, %v1169_v33  ;;  %2708 = vst [vmem:[%s3682_s19 + $0x148] sm:$0xff] %v2140_v14  ;;  %v3139_v41 = vpop.eup %3138  ;;  %v2143_v54 = vmul.f32 %v3137_v40, %v4443_v58  ;;  %v1109_v59 = vadd.f32 %v1108_v30, %v861_v22  ;;  %v2153_v29 = vand.u32 2147483648, %v4443_v58 }
 0x21a   : > { %v615_v4 = vpop.f32.mrf.mxu0  ;;  %v2445_v24 = vmul.f32 %v3133_v10, %v2444_v18  ;;  %vm2448_vm9 = vweird.f32 %v3133_v10  ;;  %vm4478_vm10 = vcmp.eq.f32.partialorder %v2451_v9, 8.507059e+37  ;;  %v4482_v63 = vadd.f32 1.0, %v3139_v41 }
 0x21b   : > { %v4472_v37 = vpop.f32.mrf.mxu1  ;;  %3144 = vpow2.f32 %v2872_v8  ;;  %v2144_v38 = vsub.f32 1.0, %v2143_v54  ;;  %v2852_v39 = vmul.f32 -1.442695, %v1109_v59  ;;  %vm2147_vm11 = vweird.f32 %v4443_v58  ;;  %vm2449_vm14 = vmor %vm2447_vm8, %vm2448_vm9 }
 0x21c   : > { %3146 = vrcp.f32 %v4470_v13  ;;  %vm4485_vm12 = vcmp.eq.f32.partialorder %v2151_v48, 8.507059e+37  ;;  %v2446_v2 = vadd.f32 %v3133_v10, %v2445_v24  ;;  %v2454_v52 = vor.u32 1.1754944e-38, %v2453_v17 }
 0x21d   : > { %v3141_v49 = vpop.eup %3140  ;;  %v2145_v44 = vmul.f32 %v3137_v40, %v2144_v38  ;;  %vm2148_vm13 = vweird.f32 %v3137_v40  ;;  %v2166_v1 = vand.u32 2147483647, %v4470_v13  ;;  %3148 = vrcp.f32 %v4482_v63 }
 0x21e   : > { %v4491_v7 = vpop.f32.mrf.mxu3  ;;  %v3143_v19 = vpop.eup %3142  ;;  %v2154_v3 = vor.u32 1.1754944e-38, %v2153_v29  ;;  %v2450_v60 = vsel %vm2449_vm14, %v3133_v10, %v2446_v2  ;;  %v2168_v43 = vand.u32 2147483648, %v4470_v13  ;;  %v4499_v53 = vadd.f32 1.0, %v3141_v49  ;;  %vm2149_vm15 = vmor %vm2147_vm11, %vm2148_vm13 }
 0x21f   : > { %v4489_v6 = vpop.f32.mrf.mxu2  ;;  %v2146_v20 = vadd.f32 %v3137_v40, %v2145_v44  ;;  %v2455_v46 = vsel %vm4478_vm10, %v2454_v52, %v2450_v60  ;;  %v4503_v25 = vadd.f32 1.0, %v3143_v19  ;;  %3150 = vpow2.f32 %v2852_v39 }
 0x220   : > { %2729 = vst [vmem:[%s3682_s19 + $0x1f0] sm:$0xff] %v2455_v46  ;;  %vm2162_vm0 = vweird.f32 %v4470_v13  ;;  %v2466_v50 = vand.u32 2147483647, %v4482_v63  ;;  %v2468_v28 = vand.u32 2147483648, %v4482_v63  ;;  %3152 = vrcp.f32 %v4499_v53 }
 0x221   : > { %v3145_v0 = vpop.eup %3144  ;;  %v2150_v16 = vsel %vm2149_vm15, %v3137_v40, %v2146_v20  ;;  %vm4518_vm1 = vcmp.eq.f32.partialorder %v2166_v1, 8.507059e+37  ;;  %3154 = vrcp.f32 %v4503_v25  ;;  %v2169_v31 = vor.u32 1.1754944e-38, %v2168_v43 }
 0x222   : > { %v3147_v62 = vpop.eup %3146  ;;  %v4513_v36 = vpop.f32.mrf.mxu0  ;;  %v2155_v9 = vsel %vm4485_vm12, %v2154_v3, %v2150_v16  ;;  %v2183_v12 = vand.u32 2147483648, %v4503_v25  ;;  %v4527_v33 = vadd.f32 %v4429_v57, %v615_v4  ;;  %vm2462_vm2 = vweird.f32 %v4482_v63 }
 0x223   : > { %v4515_v30 = vpop.f32.mrf.mxu1  ;;  %v2158_v10 = vmul.f32 %v3147_v62, %v4470_v13  ;;  %v3149_v56 = vpop.eup %3148  ;;  %2709 = vst [vmem:[%s3682_s19 + $0x150] sm:$0xff] %v2155_v9  ;;  %v2481_v17 = vand.u32 2147483647, %v4499_v53  ;;  %v4532_v35 = vadd.f32 1.0, %v3145_v0  ;;  %vm4535_vm3 = vcmp.eq.f32.partialorder %v2466_v50, 8.507059e+37 }
 0x224   : > { %v2458_v5 = vmul.f32 %v3149_v56, %v4482_v63  ;;  %v2469_v22 = vor.u32 1.1754944e-38, %v2468_v28  ;;  %v2181_v8 = vand.u32 2147483647, %v4503_v25  ;;  %vm2163_vm4 = vweird.f32 %v3147_v62 }
 0x225   : > { %v2159_v34 = vsub.f32 1.0, %v2158_v10  ;;  %v3151_v18 = vpop.eup %3150  ;;  %vm2477_vm5 = vweird.f32 %v4499_v53  ;;  %v2483_v41 = vand.u32 2147483648, %v4499_v53  ;;  %3156 = vrcp.f32 %v4532_v35  ;;  %vm2164_vm9 = vmor %vm2162_vm0, %vm2163_vm4 }
 0x226   : > { %v4542_v48 = vpop.f32.mrf.mxu3  ;;  %v3153_v54 = vpop.eup %3152  ;;  %v2459_v59 = vsub.f32 1.0, %v2458_v5  ;;  %vm2463_vm6 = vweird.f32 %v3149_v56  ;;  %vm2177_vm7 = vweird.f32 %v4503_v25  ;;  %v2184_v29 = vor.u32 1.1754944e-38, %v2183_v12 }
 0x227   : > { %v4540_v40 = vpop.f32.mrf.mxu2  ;;  %v2160_v4 = vmul.f32 %v3147_v62, %v2159_v34  ;;  %v4548_v24 = vadd.f32 1.0, %v3151_v18  ;;  %v3155_v38 = vpop.eup %3154  ;;  %v2473_v39 = vmul.f32 %v3153_v54, %v4499_v53  ;;  %vm4551_vm8 = vcmp.eq.f32.partialorder %v2481_v17, 8.507059e+37  ;;  %vm2464_vm13 = vmor %vm2462_vm2, %vm2463_vm6 }
 0x228   : > { %v2498_v2 = vand.u32 2147483648, %v4532_v35  ;;  %v2460_v52 = vmul.f32 %v3149_v56, %v2459_v59  ;;  %v2173_v49 = vmul.f32 %v3155_v38, %v4503_v25  ;;  %vm4560_vm10 = vcmp.eq.f32.partialorder %v2181_v8, 8.507059e+37 }
 0x229   : > { %v2161_v47 = vadd.f32 %v3147_v62, %v2160_v4  ;;  %3158 = vrcp.f32 %v4548_v24  ;;  %v2496_v1 = vand.u32 2147483647, %v4532_v35  ;;  %v2474_v43 = vsub.f32 1.0, %v2473_v39 }
 0x22a   : > { %v621_v19 = vpop.f32.mrf.mxu0  ;;  %vm2478_vm11 = vweird.f32 %v3153_v54  ;;  %v2484_v13 = vor.u32 1.1754944e-38, %v2483_v41  ;;  %v2461_v20 = vadd.f32 %v3149_v56, %v2460_v52  ;;  %v2174_v46 = vsub.f32 1.0, %v2173_v49 }
 0x22b   : > { %v4566_v3 = vpop.f32.mrf.mxu1  ;;  %v2165_v60 = vsel %vm2164_vm9, %v3147_v62, %v2161_v47  ;;  %v2198_v50 = vand.u32 2147483648, %v4548_v24  ;;  %vm2492_vm12 = vweird.f32 %v4532_v35  ;;  %v3157_v28 = vpop.eup %3156  ;;  %vm2178_vm14 = vweird.f32 %v3155_v38  ;;  %vm2479_vm2 = vmor %vm2477_vm5, %vm2478_vm11 }
 0x22c   : > { %v2170_v0 = vsel %vm4518_vm1, %v2169_v31, %v2165_v60  ;;  %v2475_v62 = vmul.f32 %v3153_v54, %v2474_v43  ;;  %v2196_v16 = vand.u32 2147483647, %v4548_v24  ;;  %v2499_v10 = vor.u32 1.1754944e-38, %v2498_v2 }
 0x22d   : > { %2710 = vst [vmem:[%s3682_s19 + $0x158] sm:$0xff] %v2170_v0  ;;  %v2465_v58 = vsel %vm2464_vm13, %v3149_v56, %v2461_v20  ;;  %v2175_v9 = vmul.f32 %v3155_v38, %v2174_v46  ;;  %v4577_v31 = vor.u32 1.1754944e-38, %v2198_v50  ;;  %v2488_v12 = vmul.f32 %v3157_v28, %v4532_v35 }
 0x22e   : > { %vm4580_vm15 = vcmp.eq.f32.partialorder %v2496_v1, 8.507059e+37  ;;  %v1177_v5 = vpop.f32.mrf.mxu3  ;;  %v2470_v63 = vsel %vm4535_vm3, %v2469_v22, %v2465_v58  ;;  %v2476_v8 = vadd.f32 %v3153_v54, %v2475_v62  ;;  %vm2192_vm0 = vweird.f32 %v4548_v24  ;;  %vm2179_vm3 = vmor %vm2177_vm7, %vm2178_vm14 }
 0x22f   : > { %v1117_v17 = vpop.f32.mrf.mxu2  ;;  %vm2493_vm1 = vweird.f32 %v3157_v28  ;;  %v864_v56 = vadd.f32 %v4472_v37, %v4527_v33  ;;  %v3159_v18 = vpop.eup %3158  ;;  %2730 = vst [vmem:[%s3682_s19 + $0x1f8] sm:$0xff] %v2470_v63  ;;  %v2176_v4 = vadd.f32 %v3155_v38, %v2175_v9  ;;  %v2489_v41 = vsub.f32 1.0, %v2488_v12 }
 0x230   : > { %v1172_v14 = vadd.f32 %v4491_v7, %v4083_v42  ;;  %v619_v22 = vadd.f32 %v4429_v57, %v4513_v36  ;;  %v2480_v37 = vsel %vm2479_vm2, %v3153_v54, %v2476_v8  ;;  %v2188_v33 = vmul.f32 %v3159_v18, %v4548_v24  ;;  %vm2494_vm5 = vmor %vm2492_vm12, %vm2493_vm1 }
 0x231   : > { %vm2193_vm4 = vweird.f32 %v3159_v18  ;;  %v1112_v53 = vadd.f32 %v4489_v6, %v864_v56  ;;  %v2180_v59 = vsel %vm2179_vm3, %v3155_v38, %v2176_v4  ;;  %v2485_v47 = vsel %vm4551_vm8, %v2484_v13, %v2480_v37 }
 0x232   : > { %v2490_v39 = vmul.f32 %v3157_v28, %v2489_v41  ;;  %v2873_v42 = vmul.f32 -1.442695, %v1172_v14  ;;  %v624_v7 = vpop.f32.mrf.mxu0  ;;  %v2185_v36 = vsel %vm4560_vm10, %v2184_v29, %v2180_v59  ;;  %2731 = vst [vmem:[%s3682_s19 + $0x200] sm:$0xff] %v2485_v47  ;;  %v2189_v25 = vsub.f32 1.0, %v2188_v33  ;;  %vm2194_vm6 = vmor %vm2192_vm0, %vm2193_vm4 }
 0x233   : > { %v872_v2 = vpop.f32.mrf.mxu1  ;;  %v2853_v52 = vmul.f32 -1.442695, %v1112_v53  ;;  %v867_v54 = vadd.f32 %v4515_v30, %v619_v22  ;;  %2711 = vst [vmem:[%s3682_s19 + $0x160] sm:$0xff] %v2185_v36  ;;  %v1175_v6 = vadd.f32 %v4542_v48, %v4103_v15  ;;  %v622_v38 = vadd.f32 %v4429_v57, %v621_v19 }
 0x234   : > { %v2491_v49 = vadd.f32 %v3157_v28, %v2490_v39  ;;  %3160 = vpow2.f32 %v2873_v42  ;;  %v2190_v51 = vmul.f32 %v3159_v18, %v2189_v25  ;;  %v1178_v44 = vadd.f32 %v1177_v5, %v4120_v32 }
 0x235   : > { %3162 = vpow2.f32 %v2853_v52  ;;  %v1115_v29 = vadd.f32 %v4540_v40, %v867_v54  ;;  %v2874_v1 = vmul.f32 -1.442695, %v1175_v6  ;;  %v870_v60 = vadd.f32 %v4566_v3, %v622_v38 }
 0x236   : > { %v2495_v30 = vsel %vm2494_vm5, %v3157_v28, %v2491_v49  ;;  %v625_v43 = vadd.f32 %v4429_v57, %v624_v7  ;;  %v1180_v48 = vpop.f32.mrf.mxu3  ;;  %v2191_v19 = vadd.f32 %v3159_v18, %v2190_v51  ;;  %v2875_v0 = vmul.f32 -1.442695, %v1178_v44 }
 0x237   : > { %v1120_v15 = vpop.f32.mrf.mxu2  ;;  %v2500_v13 = vsel %vm4580_vm15, %v2499_v10, %v2495_v30  ;;  %v2854_v35 = vmul.f32 -1.442695, %v1115_v29  ;;  %3164 = vpow2.f32 %v2874_v1  ;;  %v1118_v32 = vadd.f32 %v1117_v17, %v870_v60 }
 0x238   : > { %2732 = vst [vmem:[%s3682_s19 + $0x208] sm:$0xff] %v2500_v13  ;;  %v873_v40 = vadd.f32 %v872_v2, %v625_v43  ;;  %v1181_v3 = vadd.f32 %v1180_v48, %v4137_v61  ;;  %v2195_v20 = vsel %vm2194_vm6, %v3159_v18, %v2191_v19  ;;  %vm2197_vm7 = vcmp.eq.f32.partialorder %v2196_v16, 8.507059e+37 }
 0x239   : > { %3166 = vpow2.f32 %v2854_v35  ;;  %v2200_v50 = vsel %vm2197_vm7, %v4577_v31, %v2195_v20  ;;  %v2855_v28 = vmul.f32 -1.442695, %v1118_v32 }
 0x23a   : > { %v3161_v46 = vpop.eup %3160  ;;  %3168 = vpow2.f32 %v2875_v0  ;;  %v1121_v62 = vadd.f32 %v1120_v15, %v873_v40  ;;  %v627_v10 = vpop.f32.mrf.mxu0  ;;  %2712 = vst [vmem:[%s3682_s19 + $0x168] sm:$0xff] %v2200_v50  ;;  %v2876_v24 = vmul.f32 -1.442695, %v1181_v3 }
 0x23b   : > { %v4629_v58 = vpop.f32.mrf.mxu1  ;;  %v3163_v9 = vpop.eup %3162  ;;  %v4632_v12 = vadd.f32 1.0, %v3161_v46  ;;  %3170 = vpow2.f32 %v2855_v28  ;;  %v4654_v37 = vadd.f32 %v4429_v57, %v627_v10 }
 0x23c   : > { %v4634_v34 = vadd.f32 1.0, %v3163_v9  ;;  %v2856_v61 = vmul.f32 -1.442695, %v1121_v62 }
 0x23d   : > { %3172 = vrcp.f32 %v4632_v12  ;;  %v3165_v16 = vpop.eup %3164  ;;  %v2511_v56 = vand.u32 2147483647, %v4632_v12  ;;  %v2513_v18 = vand.u32 2147483648, %v4632_v12  ;;  %vm2507_vm8 = vweird.f32 %v4632_v12 }
 0x23e   : > { %3174 = vrcp.f32 %v4634_v34  ;;  %v4640_v17 = vpop.f32.mrf.mxu3  ;;  %v4642_v63 = vadd.f32 1.0, %v3165_v16  ;;  %v2211_v41 = vand.u32 2147483647, %v4634_v34  ;;  %v2213_v22 = vand.u32 2147483648, %v4634_v34 }
 0x23f   : > { %v4638_v31 = vpop.f32.mrf.mxu2  ;;  %v3167_v5 = vpop.eup %3166  ;;  %3176 = vpow2.f32 %v2856_v61  ;;  %vm2207_vm9 = vweird.f32 %v4634_v34  ;;  %vm4671_vm10 = vcmp.eq.f32.partialorder %v2511_v56, 8.507059e+37  ;;  %v2514_v52 = vor.u32 1.1754944e-38, %v2513_v18 }
 0x240   : > { %v3169_v8 = vpop.eup %3168  ;;  %v4646_v4 = vadd.f32 1.0, %v3167_v5  ;;  %3178 = vpow2.f32 %v2876_v24  ;;  %v2528_v39 = vand.u32 2147483648, %v4642_v63  ;;  %v2526_v54 = vand.u32 2147483647, %v4642_v63 }
 0x241   : > { %3180 = vrcp.f32 %v4642_v63  ;;  %v3171_v14 = vpop.eup %3170  ;;  %v4667_v7 = vadd.f32 1.0, %v3169_v8  ;;  %vm4677_vm11 = vcmp.eq.f32.partialorder %v2211_v41, 8.507059e+37  ;;  %v2214_v44 = vor.u32 1.1754944e-38, %v2213_v22 }
 0x242   : > { %3182 = vrcp.f32 %v4646_v4  ;;  %v4656_v33 = vpop.f32.mrf.mxu0  ;;  %v2228_v47 = vand.u32 2147483648, %v4646_v4  ;;  %v4665_v42 = vadd.f32 1.0, %v3171_v14  ;;  %v2226_v51 = vand.u32 2147483647, %v4646_v4 }
 0x243   : > { %v4658_v53 = vpop.f32.mrf.mxu1  ;;  %v4660_v59 = vpop.eup %3172  ;;  %vm2522_vm12 = vweird.f32 %v4642_v63  ;;  %vm2222_vm14 = vweird.f32 %v4646_v4  ;;  %v2529_v19 = vor.u32 1.1754944e-38, %v2528_v39  ;;  %vm4693_vm0 = vcmp.eq.f32.partialorder %v2526_v54, 8.507059e+37 }
 0x244   : > { %v3175_v2 = vpop.eup %3174  ;;  %v2503_v36 = vmul.f32 %v4660_v59, %v4632_v12  ;;  %3184 = vrcp.f32 %v4665_v42  ;;  %vm2508_vm13 = vweird.f32 %v4660_v59  ;;  %v2229_v48 = vor.u32 1.1754944e-38, %v2228_v47 }
 0x245   : > { %v3177_v49 = vpop.eup %3176  ;;  %v2203_v6 = vmul.f32 %v3175_v2, %v4634_v34  ;;  %3186 = vrcp.f32 %v4667_v7  ;;  %vm2208_vm15 = vweird.f32 %v3175_v2  ;;  %v2241_v40 = vand.u32 2147483647, %v4665_v42  ;;  %vm2509_vm4 = vmor %vm2507_vm8, %vm2508_vm13 }
 0x246   : > { %v3179_v29 = vpop.eup %3178  ;;  %v2504_v30 = vsub.f32 1.0, %v2503_v36  ;;  %v4687_v60 = vpop.f32.mrf.mxu3  ;;  %vm4699_vm1 = vcmp.eq.f32.partialorder %v2226_v51, 8.507059e+37  ;;  %v2243_v50 = vand.u32 2147483648, %v4665_v42  ;;  %v2541_v28 = vand.u32 2147483647, %v4667_v7  ;;  %vm2209_vm7 = vmor %vm2207_vm9, %vm2208_vm15 }
 0x247   : > { %v4685_v1 = vpop.f32.mrf.mxu2  ;;  %v3181_v43 = vpop.eup %3180  ;;  %v2204_v15 = vsub.f32 1.0, %v2203_v6  ;;  %vm2237_vm3 = vweird.f32 %v4665_v42  ;;  %v2543_v9 = vand.u32 2147483648, %v4667_v7  ;;  %vm2537_vm6 = vweird.f32 %v4667_v7 }
 0x248   : > { %v3183_v13 = vpop.eup %3182  ;;  %v2505_v35 = vmul.f32 %v4660_v59, %v2504_v30  ;;  %v2518_v0 = vmul.f32 %v3181_v43, %v4642_v63  ;;  %vm2523_vm2 = vweird.f32 %v3181_v43  ;;  %v4715_v8 = vadd.f32 1.0, %v3177_v49 }
 0x249   : > { %v2205_v3 = vmul.f32 %v3175_v2, %v2204_v15  ;;  %v2218_v20 = vmul.f32 %v3183_v13, %v4646_v4  ;;  %vm2223_vm5 = vweird.f32 %v3183_v13  ;;  %v4724_v22 = vadd.f32 1.0, %v3179_v29  ;;  %vm2524_vm9 = vmor %vm2522_vm12, %vm2523_vm2 }
 0x24a   : > { %v2506_v62 = vadd.f32 %v4660_v59, %v2505_v35  ;;  %v2519_v10 = vsub.f32 1.0, %v2518_v0  ;;  %v4708_v61 = vpop.f32.mrf.mxu0  ;;  %v3185_v24 = vpop.eup %3184  ;;  %vm4732_vm8 = vcmp.eq.f32.partialorder %v2241_v40, 8.507059e+37  ;;  %3188 = vrcp.f32 %v4715_v8 }
 0x24b   : > { %v2206_v16 = vadd.f32 %v3175_v2, %v2205_v3  ;;  %v2219_v5 = vsub.f32 1.0, %v2218_v20  ;;  %v4717_v56 = vpop.f32.mrf.mxu1  ;;  %v3187_v18 = vpop.eup %3186  ;;  %v2233_v12 = vmul.f32 %v3185_v24, %v4665_v42  ;;  %3190 = vrcp.f32 %v4724_v22 }
 0x24c   : > { %v2510_v41 = vsel %vm2509_vm4, %v4660_v59, %v2506_v62  ;;  %v2520_v14 = vmul.f32 %v3181_v43, %v2519_v10  ;;  %v2533_v54 = vmul.f32 %v3187_v18, %v4667_v7  ;;  %vm2538_vm13 = vweird.f32 %v3187_v18 }
 0x24d   : > { %v2210_v47 = vsel %vm2209_vm7, %v3175_v2, %v2206_v16  ;;  %v2515_v39 = vsel %vm4671_vm10, %v2514_v52, %v2510_v41  ;;  %v2220_v36 = vmul.f32 %v3183_v13, %v2219_v5  ;;  %v2234_v6 = vsub.f32 1.0, %v2233_v12  ;;  %vm2539_vm15 = vmor %vm2537_vm6, %vm2538_vm13 }
 0x24e   : > { %v2215_v49 = vsel %vm4677_vm11, %v2214_v44, %v2210_v47  ;;  %2733 = vst [vmem:[%s3682_s19 + $0x210] sm:$0xff] %v2515_v39  ;;  %v2521_v34 = vadd.f32 %v3181_v43, %v2520_v14  ;;  %vm2238_vm10 = vweird.f32 %v3185_v24  ;;  %v2534_v2 = vsub.f32 1.0, %v2533_v54  ;;  %v1189_v52 = vpop.f32.mrf.mxu3  ;;  %vm2224_vm11 = vmor %vm2222_vm14, %vm2223_vm5 }
 0x24f   : > { %2713 = vst [vmem:[%s3682_s19 + $0x170] sm:$0xff] %v2215_v49  ;;  %v2221_v51 = vadd.f32 %v3183_v13, %v2220_v36  ;;  %v4741_v25 = vpop.f32.mrf.mxu2  ;;  %v2235_v29 = vmul.f32 %v3185_v24, %v2234_v6  ;;  %v2258_v44 = vand.u32 2147483648, %v4715_v8  ;;  %v2244_v4 = vor.u32 1.1754944e-38, %v2243_v50  ;;  %vm2239_vm12 = vmor %vm2237_vm3, %vm2238_vm10 }
 0x250   : > { %v2525_v38 = vsel %vm2524_vm9, %v3181_v43, %v2521_v34  ;;  %v2535_v15 = vmul.f32 %v3187_v18, %v2534_v2  ;;  %v2256_v40 = vand.u32 2147483647, %v4715_v8  ;;  %vm4758_vm14 = vcmp.eq.f32.partialorder %v2541_v28, 8.507059e+37  ;;  %v3189_v50 = vpop.eup %3188 }
 0x251   : > { %v2225_v63 = vsel %vm2224_vm11, %v3183_v13, %v2221_v51  ;;  %v2530_v30 = vsel %vm4693_vm0, %v2529_v19, %v2525_v38  ;;  %v2236_v0 = vadd.f32 %v3185_v24, %v2235_v29  ;;  %v2544_v32 = vor.u32 1.1754944e-38, %v2543_v9 }
 0x252   : > { %v2230_v35 = vsel %vm4699_vm1, %v2229_v48, %v2225_v63  ;;  %2734 = vst [vmem:[%s3682_s19 + $0x218] sm:$0xff] %v2530_v30  ;;  %v636_v43 = vpop.f32.mrf.mxu0  ;;  %v2536_v13 = vadd.f32 %v3187_v18, %v2535_v15  ;;  %v2259_v3 = vor.u32 1.1754944e-38, %v2258_v44  ;;  %vm2252_vm0 = vweird.f32 %v4715_v8 }
 0x253   : > { %2714 = vst [vmem:[%s3682_s19 + $0x178] sm:$0xff] %v2230_v35  ;;  %v2240_v48 = vsel %vm2239_vm12, %v3185_v24, %v2236_v0  ;;  %v876_v20 = vadd.f32 %v4629_v58, %v4654_v37  ;;  %v1184_v42 = vadd.f32 %v4640_v17, %v4163_v27  ;;  %v631_v46 = vadd.f32 %v4429_v57, %v4656_v33  ;;  %v884_v9 = vpop.f32.mrf.mxu1  ;;  %v3191_v33 = vpop.eup %3190 }
 0x254   : > { %v2245_v28 = vsel %vm4732_vm8, %v2244_v4, %v2240_v48  ;;  %v2540_v62 = vsel %vm2539_vm15, %v3187_v18, %v2536_v13  ;;  %v2556_v7 = vand.u32 2147483647, %v4724_v22  ;;  %v2558_v10 = vand.u32 2147483648, %v4724_v22 }
 0x255   : > { %2715 = vst [vmem:[%s3682_s19 + $0x180] sm:$0xff] %v2245_v28  ;;  %v2545_v58 = vsel %vm4758_vm14, %v2544_v32, %v2540_v62  ;;  %v2248_v37 = vmul.f32 %v3189_v50, %v4715_v8  ;;  %vm2253_vm1 = vweird.f32 %v3189_v50  ;;  %vm4780_vm2 = vcmp.eq.f32.partialorder %v2256_v40, 8.507059e+37 }
 0x256   : > { %v1124_v17 = vadd.f32 %v4638_v31, %v876_v20  ;;  %2735 = vst [vmem:[%s3682_s19 + $0x220] sm:$0xff] %v2545_v58  ;;  %v2877_v24 = vmul.f32 -1.442695, %v1184_v42  ;;  %v879_v16 = vadd.f32 %v4658_v53, %v631_v46  ;;  %v1187_v5 = vadd.f32 %v4687_v60, %v4181_v21  ;;  %v1192_v54 = vpop.f32.mrf.mxu3  ;;  %vm2254_vm4 = vmor %vm2252_vm0, %vm2253_vm1 }
 0x257   : > { %v634_v18 = vadd.f32 %v4429_v57, %v4708_v61  ;;  %v2249_v41 = vsub.f32 1.0, %v2248_v37  ;;  %v2548_v14 = vmul.f32 %v3191_v33, %v4724_v22  ;;  %vm2553_vm3 = vweird.f32 %v3191_v33  ;;  %v1132_v36 = vpop.f32.mrf.mxu2 }
 0x258   : > { %v2857_v12 = vmul.f32 -1.442695, %v1124_v17  ;;  %3192 = vpow2.f32 %v2877_v24  ;;  %v1127_v47 = vadd.f32 %v4685_v1, %v879_v16  ;;  %v2878_v31 = vmul.f32 -1.442695, %v1187_v5 }
 0x259   : > { %v882_v39 = vadd.f32 %v4717_v56, %v634_v18  ;;  %v2250_v53 = vmul.f32 %v3189_v50, %v2249_v41  ;;  %v2549_v49 = vsub.f32 1.0, %v2548_v14  ;;  %v1190_v21 = vadd.f32 %v1189_v52, %v4199_v11 }
 0x25a   : > { %3194 = vpow2.f32 %v2857_v12  ;;  %v2858_v60 = vmul.f32 -1.442695, %v1127_v47  ;;  %v637_v34 = vadd.f32 %v4429_v57, %v636_v43  ;;  %v639_v6 = vpop.f32.mrf.mxu0  ;;  %v1193_v2 = vadd.f32 %v1192_v54, %v4219_v45 }
 0x25b   : > { %3196 = vpow2.f32 %v2878_v31  ;;  %v1130_v61 = vadd.f32 %v4741_v25, %v882_v39  ;;  %v2251_v59 = vadd.f32 %v3189_v50, %v2250_v53  ;;  %v2550_v51 = vmul.f32 %v3191_v33, %v2549_v49 }
 0x25c   : > { %v2879_v1 = vmul.f32 -1.442695, %v1190_v21  ;;  %vm2552_vm5 = vweird.f32 %v4724_v22  ;;  %3198 = vpow2.f32 %v2858_v60  ;;  %v885_v56 = vadd.f32 %v884_v9, %v637_v34  ;;  %v887_v22 = vpop.f32.mrf.mxu1 }
 0x25d   : > { %v2859_v11 = vmul.f32 -1.442695, %v1130_v61  ;;  %v2255_v52 = vsel %vm2254_vm4, %v3189_v50, %v2251_v59  ;;  %v2551_v25 = vadd.f32 %v3191_v33, %v2550_v51  ;;  %v640_v38 = vadd.f32 %v4429_v57, %v639_v6  ;;  %vm2554_vm6 = vmor %vm2552_vm5, %vm2553_vm3 }
 0x25e   : > { %3200 = vpow2.f32 %v2879_v1  ;;  %v3193_v29 = vpop.eup %3192  ;;  %v2260_v44 = vsel %vm4780_vm2, %v2259_v3, %v2255_v52  ;;  %v2559_v45 = vor.u32 1.1754944e-38, %v2558_v10  ;;  %v1133_v8 = vadd.f32 %v1132_v36, %v885_v56  ;;  %v1195_v32 = vpop.f32.mrf.mxu3 }
 0x25f   : > { %3202 = vpow2.f32 %v2859_v11  ;;  %2716 = vst [vmem:[%s3682_s19 + $0x188] sm:$0xff] %v2260_v44  ;;  %v2555_v30 = vsel %vm2554_vm6, %v3191_v33, %v2551_v25  ;;  %vm2557_vm7 = vcmp.eq.f32.partialorder %v2556_v7, 8.507059e+37  ;;  %v4807_v15 = vadd.f32 1.0, %v3193_v29  ;;  %v1135_v19 = vpop.f32.mrf.mxu2 }
 0x260   : > { %v3195_v63 = vpop.eup %3194  ;;  %v2880_v35 = vmul.f32 -1.442695, %v1193_v2  ;;  %v2560_v57 = vsel %vm2557_vm7, %v2559_v45, %v2555_v30  ;;  %v2860_v40 = vmul.f32 -1.442695, %v1133_v8  ;;  %v888_v43 = vadd.f32 %v887_v22, %v640_v38 }
 0x261   : > { %v3197_v0 = vpop.eup %3196  ;;  %v4809_v4 = vadd.f32 1.0, %v3195_v63  ;;  %2736 = vst [vmem:[%s3682_s19 + $0x228] sm:$0xff] %v2560_v57  ;;  %3204 = vrcp.f32 %v4807_v15  ;;  %v2571_v46 = vand.u32 2147483647, %v4807_v15  ;;  %v2573_v28 = vand.u32 2147483648, %v4807_v15 }
 0x262   : > { %v3199_v13 = vpop.eup %3198  ;;  %v4816_v20 = vadd.f32 1.0, %v3197_v0  ;;  %v4823_v62 = vadd.f32 %v1135_v19, %v888_v43  ;;  %v4826_v7 = vadd.f32 %v1195_v32, %v4236_v23  ;;  %v4828_v10 = vpop.f32.mrf.mxu0  ;;  %vm2567_vm8 = vweird.f32 %v4807_v15 }
 0x263   : > { %3206 = vrcp.f32 %v4809_v4  ;;  %v4814_v48 = vadd.f32 1.0, %v3199_v13  ;;  %v2271_v9 = vand.u32 2147483647, %v4809_v4  ;;  %v2273_v58 = vand.u32 2147483648, %v4809_v4 }
 0x264   : > { %v3201_v3 = vpop.eup %3200  ;;  %3208 = vpow2.f32 %v2880_v35  ;;  %v2588_v17 = vand.u32 2147483648, %v4816_v20  ;;  %vm2267_vm9 = vweird.f32 %v4809_v4  ;;  %vm4841_vm10 = vcmp.eq.f32.partialorder %v2571_v46, 8.507059e+37  ;;  %v4851_v47 = vpop.f32.mrf.mxu1 }
 0x265   : > { %v3203_v42 = vpop.eup %3202  ;;  %v4819_v50 = vadd.f32 1.0, %v3201_v3  ;;  %3210 = vpow2.f32 %v2860_v40  ;;  %v2288_v27 = vand.u32 2147483648, %v4814_v48  ;;  %v2286_v5 = vand.u32 2147483647, %v4814_v48 }
 0x266   : > { %3212 = vrcp.f32 %v4814_v48  ;;  %v4836_v33 = vadd.f32 1.0, %v3203_v42  ;;  %v2574_v14 = vor.u32 1.1754944e-38, %v2573_v28  ;;  %v2586_v12 = vand.u32 2147483647, %v4816_v20  ;;  %v4881_v8 = vpop.f32.mrf.mxu3 }
 0x267   : > { %3214 = vrcp.f32 %v4816_v20  ;;  %v3205_v37 = vpop.eup %3204  ;;  %vm4853_vm11 = vcmp.eq.f32.partialorder %v2271_v9, 8.507059e+37  ;;  %v2274_v36 = vor.u32 1.1754944e-38, %v2273_v58  ;;  %vm2282_vm13 = vweird.f32 %v4814_v48  ;;  %v4874_v25 = vpop.f32.mrf.mxu2 }
 0x268   : > { %3216 = vrcp.f32 %v4819_v50  ;;  %v2563_v24 = vmul.f32 %v3205_v37, %v4807_v15  ;;  %vm2568_vm12 = vweird.f32 %v3205_v37  ;;  %v2289_v21 = vor.u32 1.1754944e-38, %v2288_v27 }
 0x269   : > { %v3207_v23 = vpop.eup %3206  ;;  %3218 = vrcp.f32 %v4836_v33  ;;  %vm2582_vm14 = vweird.f32 %v4816_v20  ;;  %v2589_v60 = vor.u32 1.1754944e-38, %v2588_v17  ;;  %vm4860_vm0 = vcmp.eq.f32.partialorder %v2286_v5, 8.507059e+37  ;;  %vm2569_vm4 = vmor %vm2567_vm8, %vm2568_vm12 }
 0x26a   : > { %v4846_v18 = vpop.eup %3208  ;;  %v2263_v41 = vmul.f32 %v3207_v23, %v4809_v4  ;;  %v2564_v54 = vsub.f32 1.0, %v2563_v24  ;;  %vm2268_vm15 = vweird.f32 %v3207_v23  ;;  %v2301_v51 = vand.u32 2147483647, %v4836_v33  ;;  %v4887_v0 = vpop.f32.mrf.mxu0 }
 0x26b   : > { %v3211_v31 = vpop.eup %3210  ;;  %vm4868_vm1 = vcmp.eq.f32.partialorder %v2586_v12, 8.507059e+37  ;;  %v2303_v52 = vand.u32 2147483648, %v4836_v33  ;;  %vm2597_vm2 = vweird.f32 %v4819_v50  ;;  %vm2297_vm3 = vweird.f32 %v4836_v33  ;;  %vm2269_vm6 = vmor %vm2267_vm9, %vm2268_vm15 }
 0x26c   : > { %v3213_v53 = vpop.eup %3212  ;;  %v2264_v49 = vsub.f32 1.0, %v2263_v41  ;;  %v2565_v34 = vmul.f32 %v3205_v37, %v2564_v54  ;;  %v4879_v45 = vadd.f32 1.0, %v3211_v31  ;;  %v2603_v35 = vand.u32 2147483648, %v4819_v50  ;;  %v893_v58 = vpop.f32.mrf.mxu1 }
 0x26d   : > { %v3215_v61 = vpop.eup %3214  ;;  %v2278_v6 = vmul.f32 %v3213_v53, %v4814_v48  ;;  %vm2283_vm5 = vweird.f32 %v3213_v53  ;;  %v2601_v9 = vand.u32 2147483647, %v4819_v50  ;;  %v4910_v48 = vadd.f32 1.0, %v4846_v18 }
 0x26e   : > { %v4865_v1 = vpop.eup %3216  ;;  %v2265_v2 = vmul.f32 %v3207_v23, %v2264_v49  ;;  %v2578_v11 = vmul.f32 %v3215_v61, %v4816_v20  ;;  %v2566_v38 = vadd.f32 %v3205_v37, %v2565_v34  ;;  %vm2583_vm7 = vweird.f32 %v3215_v61  ;;  %vm2284_vm8 = vmor %vm2282_vm13, %vm2283_vm5  ;;  %v1201_v49 = vpop.f32.mrf.mxu3 }
 0x26f   : > { %v2279_v29 = vsub.f32 1.0, %v2278_v6  ;;  %v2593_v44 = vmul.f32 %v4865_v1, %v4819_v50  ;;  %v3219_v22 = vpop.eup %3218  ;;  %3220 = vrcp.f32 %v4879_v45  ;;  %vm2598_vm9 = vweird.f32 %v4865_v1  ;;  %v1141_v31 = vpop.f32.mrf.mxu2 }
 0x270   : > { %v2266_v63 = vadd.f32 %v3207_v23, %v2265_v2  ;;  %v2579_v30 = vsub.f32 1.0, %v2578_v11  ;;  %v2570_v57 = vsel %vm2569_vm4, %v3205_v37, %v2566_v38  ;;  %v2293_v43 = vmul.f32 %v3219_v22, %v4836_v33  ;;  %vm2599_vm12 = vmor %vm2597_vm2, %vm2598_vm9 }
 0x271   : > { %v2280_v40 = vmul.f32 %v3213_v53, %v2279_v29  ;;  %v2575_v15 = vsel %vm4841_vm10, %v2574_v14, %v2570_v57  ;;  %v2594_v32 = vsub.f32 1.0, %v2593_v44  ;;  %vm2584_vm10 = vmor %vm2582_vm14, %vm2583_vm7  ;;  %vm4914_vm13 = vcmp.eq.f32.partialorder %v2301_v51, 8.507059e+37 }
 0x272   : > { %v2270_v13 = vsel %vm2269_vm6, %v3207_v23, %v2266_v63  ;;  %v2580_v19 = vmul.f32 %v3215_v61, %v2579_v30  ;;  %2737 = vst [vmem:[%s3682_s19 + $0x230] sm:$0xff] %v2575_v15  ;;  %v2294_v46 = vsub.f32 1.0, %v2293_v43  ;;  %v2604_v18 = vor.u32 1.1754944e-38, %v2603_v35 }
 0x273   : > { %v2275_v3 = vsel %vm4853_vm11, %v2274_v36, %v2270_v13  ;;  %v2281_v42 = vadd.f32 %v3213_v53, %v2280_v40  ;;  %v2595_v28 = vmul.f32 %v4865_v1, %v2594_v32  ;;  %vm2298_vm11 = vweird.f32 %v3219_v22 }
 0x274   : > { %2717 = vst [vmem:[%s3682_s19 + $0x190] sm:$0xff] %v2275_v3  ;;  %v2581_v4 = vadd.f32 %v3215_v61, %v2580_v19  ;;  %v2295_v27 = vmul.f32 %v3219_v22, %v2294_v46  ;;  %3222 = vrcp.f32 %v4910_v48  ;;  %vm2299_vm14 = vmor %vm2297_vm3, %vm2298_vm11  ;;  %v2304_v41 = vor.u32 1.1754944e-38, %v2303_v52  ;;  %v896_v29 = vpop.f32.mrf.mxu1 }
 0x275   : > { %v2285_v37 = vsel %vm2284_vm8, %v3213_v53, %v2281_v42  ;;  %v2596_v16 = vadd.f32 %v4865_v1, %v2595_v28  ;;  %vm2602_vm15 = vcmp.eq.f32.partialorder %v2601_v9, 8.507059e+37  ;;  %v2316_v12 = vand.u32 2147483647, %v4879_v45  ;;  %v3221_v39 = vpop.eup %3220 }
 0x276   : > { %v2290_v17 = vsel %vm4860_vm0, %v2289_v21, %v2285_v37  ;;  %v2585_v23 = vsel %vm2584_vm10, %v3215_v61, %v2581_v4  ;;  %v2296_v5 = vadd.f32 %v3219_v22, %v2295_v27  ;;  %v2861_v54 = vmul.f32 -1.442695, %v4823_v62  ;;  %v3255_v62 = vld [vmem:[%s5047_s2] ss:$0 sm:$0xff] }
 0x277   : > { %2718 = vst [vmem:[%s3682_s19 + $0x198] sm:$0xff] %v2290_v17  ;;  %v2590_v20 = vsel %vm4868_vm1, %v2589_v60, %v2585_v23  ;;  %v2600_v14 = vsel %vm2599_vm12, %v4865_v1, %v2596_v16  ;;  %v2881_v53 = vmul.f32 -1.442695, %v4826_v7  ;;  %v2308_v21 = vmul.f32 %v3221_v39, %v4879_v45  ;;  %v648_v60 = vpop.f32.mrf.mxu0  ;;  %v1144_v19 = vpop.f32.mrf.mxu2 }
 0x278   : > { %2738 = vst [vmem:[%s3682_s19 + $0x238] sm:$0xff] %v2590_v20  ;;  %v2300_v36 = vsel %vm2299_vm14, %v3219_v22, %v2296_v5  ;;  %v2605_v50 = vsel %vm2602_vm15, %v2604_v18, %v2600_v14  ;;  %vm2312_vm0 = vweird.f32 %v4879_v45  ;;  %v2318_v61 = vand.u32 2147483648, %v4879_v45 }
 0x279   : > { %v2305_v33 = vsel %vm4914_vm13, %v2304_v41, %v2300_v36  ;;  %2739 = vst [vmem:[%s3682_s19 + $0x240] sm:$0xff] %v2605_v50  ;;  %3224 = vpow2.f32 %v2861_v54  ;;  %v643_v7 = vadd.f32 %v3255_v62, %v4828_v10  ;;  %v1199_v34 = vadd.f32 %v4881_v8, %v4253_v55 }
 0x27a   : > { %2719 = vst [vmem:[%s3682_s19 + $0x1a0] sm:$0xff] %v2305_v33  ;;  %v2309_v6 = vsub.f32 1.0, %v2308_v21  ;;  %3226 = vpow2.f32 %v2881_v53  ;;  %v646_v59 = vadd.f32 %v3255_v62, %v4887_v0  ;;  %v1202_v51 = vadd.f32 %v1201_v49, %v4274_v26  ;;  %v3223_v1 = vpop.eup %3222 }
 0x27b   : > { %vm4949_vm1 = vcmp.eq.f32.partialorder %v2316_v12, 8.507059e+37  ;;  %v891_v11 = vadd.f32 %v4851_v47, %v643_v7  ;;  %v2882_v56 = vmul.f32 -1.442695, %v1199_v34  ;;  %v649_v52 = vadd.f32 %v3255_v62, %v648_v60 }
 0x27c   : > { %v2310_v38 = vmul.f32 %v3221_v39, %v2309_v6  ;;  %vm2313_vm2 = vweird.f32 %v3221_v39  ;;  %v2608_v10 = vmul.f32 %v3223_v1, %v4910_v48  ;;  %v894_v55 = vadd.f32 %v893_v58, %v646_v59 }
 0x27d   : > { %v2319_v44 = vor.u32 1.1754944e-38, %v2318_v61  ;;  %v1139_v8 = vadd.f32 %v4874_v25, %v891_v11  ;;  %3228 = vpow2.f32 %v2882_v56  ;;  %v2883_v26 = vmul.f32 -1.442695, %v1202_v51  ;;  %vm2314_vm3 = vmor %vm2312_vm0, %vm2313_vm2 }
 0x27e   : > { %v2311_v22 = vadd.f32 %v3221_v39, %v2310_v38  ;;  %v2609_v63 = vsub.f32 1.0, %v2608_v10  ;;  %v2616_v30 = vand.u32 2147483647, %v4910_v48  ;;  %v1142_v35 = vadd.f32 %v1141_v31, %v894_v55 }
 0x27f   : > { %v3225_v0 = vpop.eup %3224  ;;  %v2618_v47 = vand.u32 2147483648, %v4910_v48  ;;  %v2862_v57 = vmul.f32 -1.442695, %v1139_v8  ;;  %3230 = vpow2.f32 %v2883_v26  ;;  %v897_v40 = vadd.f32 %v896_v29, %v649_v52 }
 0x280   : > { %v3227_v43 = vpop.eup %3226  ;;  %v2315_v13 = vsel %vm2314_vm3, %v3221_v39, %v2311_v22  ;;  %v2610_v25 = vmul.f32 %v3223_v1, %v2609_v63  ;;  %vm2613_vm4 = vweird.f32 %v3223_v1  ;;  %v1489_v15 = vadd.f32 1.0, %v3225_v0 }
 0x281   : > { %v2320_v32 = vsel %vm4949_vm1, %v2319_v44, %v2315_v13  ;;  %v4962_v3 = vadd.f32 1.0, %v3227_v43  ;;  %3232 = vpow2.f32 %v2862_v57  ;;  %v2863_v45 = vmul.f32 -1.442695, %v1142_v35 }
 0x282   : > { %2720 = vst [vmem:[%s3682_s19 + $0x1a8] sm:$0xff] %v2320_v32  ;;  %v2611_v42 = vadd.f32 %v3223_v1, %v2610_v25  ;;  %vm2612_vm5 = vweird.f32 %v4910_v48  ;;  %3234 = vrcp.f32 %v1489_v15  ;;  %v2619_v4 = vor.u32 1.1754944e-38, %v2618_v47 }
 0x283   : > { %v3229_v46 = vpop.eup %3228  ;;  %vm2614_vm6 = vmor %vm2612_vm5, %vm2613_vm4  ;;  %3236 = vrcp.f32 %v4962_v3  ;;  %v1145_v28 = vadd.f32 %v1144_v19, %v897_v40  ;;  %vm2617_vm7 = vcmp.eq.f32.partialorder %v2616_v30, 8.507059e+37  ;;  %v2331_v23 = vand.u32 2147483647, %v1489_v15 }
 0x284   : > { %v2615_v9 = vsel %vm2614_vm6, %v3223_v1, %v2611_v42  ;;  %v4967_v58 = vadd.f32 1.0, %v3229_v46  ;;  %3238 = vpow2.f32 %v2863_v45  ;;  %vm2327_vm8 = vweird.f32 %v1489_v15 }
 0x285   : > { %v3231_v37 = vpop.eup %3230  ;;  %v2620_v27 = vsel %vm2617_vm7, %v2619_v4, %v2615_v9  ;;  %v2864_v24 = vmul.f32 -1.442695, %v1145_v28  ;;  %v2333_v41 = vand.u32 2147483648, %v1489_v15  ;;  %vm2627_vm9 = vweird.f32 %v4962_v3 }
 0x286   : > { %2740 = vst [vmem:[%s3682_s19 + $0x248] sm:$0xff] %v2620_v27  ;;  %3240 = vrcp.f32 %v4967_v58  ;;  %v4971_v48 = vadd.f32 1.0, %v3231_v37  ;;  %v2631_v12 = vand.u32 2147483647, %v4962_v3  ;;  %vm4980_vm10 = vcmp.eq.f32.partialorder %v2331_v23, 8.507059e+37 }
 0x287   : > { %v3233_v17 = vpop.eup %3232  ;;  %v2633_v50 = vand.u32 2147483648, %v4962_v3  ;;  %v2646_v49 = vand.u32 2147483647, %v4967_v58  ;;  %v2648_v33 = vand.u32 2147483648, %v4967_v58  ;;  %v2334_v61 = vor.u32 1.1754944e-38, %v2333_v41 }
 0x288   : > { %v3235_v16 = vpop.eup %3234  ;;  %v4973_v20 = vadd.f32 1.0, %v3233_v17  ;;  %3242 = vrcp.f32 %v4971_v48  ;;  %vm4990_vm12 = vcmp.eq.f32.partialorder %v2631_v12, 8.507059e+37  ;;  %vm2642_vm14 = vweird.f32 %v4967_v58 }
 0x289   : > { %v3237_v5 = vpop.eup %3236  ;;  %v2323_v18 = vmul.f32 %v3235_v16, %v1489_v15  ;;  %vm2328_vm11 = vweird.f32 %v3235_v16  ;;  %v2634_v51 = vor.u32 1.1754944e-38, %v2633_v50  ;;  %vm4999_vm0 = vcmp.eq.f32.partialorder %v2646_v49, 8.507059e+37 }
 0x28a   : > { %v2623_v14 = vmul.f32 %v3237_v5, %v4962_v3  ;;  %3244 = vrcp.f32 %v4973_v20  ;;  %v3239_v31 = vpop.eup %3238  ;;  %vm2628_vm13 = vweird.f32 %v3237_v5  ;;  %vm2329_vm15 = vmor %vm2327_vm8, %vm2328_vm11  ;;  %v2649_v52 = vor.u32 1.1754944e-38, %v2648_v33 }
 0x28b   : > { %v2324_v39 = vsub.f32 1.0, %v2323_v18  ;;  %3246 = vpow2.f32 %v2864_v24  ;;  %v4987_v21 = vadd.f32 1.0, %v3239_v31  ;;  %vm2629_vm1 = vmor %vm2627_vm9, %vm2628_vm13  ;;  %vm2342_vm3 = vweird.f32 %v4973_v20 }
 0x28c   : > { %v3241_v54 = vpop.eup %3240  ;;  %v2624_v53 = vsub.f32 1.0, %v2623_v14  ;;  %v2346_v22 = vand.u32 2147483647, %v4973_v20  ;;  %v2348_v57 = vand.u32 2147483648, %v4973_v20  ;;  %v2661_v40 = vand.u32 2147483647, %v4971_v48 }
 0x28d   : > { %v2325_v60 = vmul.f32 %v3235_v16, %v2324_v39  ;;  %v2638_v62 = vmul.f32 %v3241_v54, %v4967_v58  ;;  %3248 = vrcp.f32 %v4987_v21  ;;  %vm2643_vm2 = vweird.f32 %v3241_v54 }
 0x28e   : > { %v2625_v7 = vmul.f32 %v3237_v5, %v2624_v53  ;;  %v4995_v6 = vpop.eup %3242  ;;  %vm2644_vm4 = vmor %vm2642_vm14, %vm2643_vm2  ;;  %v2663_v43 = vand.u32 2147483648, %v4971_v48  ;;  %vm2347_vm7 = vcmp.eq.f32.partialorder %v2346_v22, 8.507059e+37  ;;  %vm2657_vm8 = vweird.f32 %v4971_v48 }
 0x28f   : > { %v2326_v59 = vadd.f32 %v3235_v16, %v2325_v60  ;;  %v2639_v1 = vsub.f32 1.0, %v2638_v62  ;;  %v2653_v38 = vmul.f32 %v4995_v6, %v4971_v48  ;;  %vm2658_vm6 = vweird.f32 %v4995_v6 }
 0x290   : > { %v3245_v2 = vpop.eup %3244  ;;  %v2626_v11 = vadd.f32 %v3237_v5, %v2625_v7  ;;  %v2349_v46 = vor.u32 1.1754944e-38, %v2348_v57  ;;  %v2361_v4 = vand.u32 2147483647, %v4987_v21  ;;  %v2363_v28 = vand.u32 2147483648, %v4987_v21  ;;  %vm2659_vm11 = vmor %vm2657_vm8, %vm2658_vm6 }
 0x291   : > { %v3247_v10 = vpop.eup %3246  ;;  %v2330_v55 = vsel %vm2329_vm15, %v3235_v16, %v2326_v59  ;;  %v2338_v29 = vmul.f32 %v3245_v2, %v4973_v20  ;;  %v2640_v44 = vmul.f32 %v3241_v54, %v2639_v1  ;;  %v2654_v0 = vsub.f32 1.0, %v2653_v38 }
 0x292   : > { %v2335_v8 = vsel %vm4980_vm10, %v2334_v61, %v2330_v55  ;;  %v2630_v26 = vsel %vm2629_vm1, %v3237_v5, %v2626_v11  ;;  %v1492_v13 = vadd.f32 1.0, %v3247_v10  ;;  %vm2343_vm5 = vweird.f32 %v3245_v2 }
 0x293   : > { %2721 = vst [vmem:[%s3682_s19 + $0x1b0] sm:$0xff] %v2335_v8  ;;  %v2635_v63 = vsel %vm4990_vm12, %v2634_v51, %v2630_v26  ;;  %v2339_v30 = vsub.f32 1.0, %v2338_v29  ;;  %v2641_v35 = vadd.f32 %v3241_v54, %v2640_v44  ;;  %v3249_v47 = vpop.eup %3248  ;;  %v2655_v3 = vmul.f32 %v4995_v6, %v2654_v0  ;;  %vm2344_vm9 = vmor %vm2342_vm3, %vm2343_vm5 }
 0x294   : > { %2741 = vst [vmem:[%s3682_s19 + $0x250] sm:$0xff] %v2635_v63  ;;  %v2353_v19 = vmul.f32 %v3249_v47, %v4987_v21  ;;  %3250 = vrcp.f32 %v1492_v13  ;;  %vm2358_vm10 = vweird.f32 %v3249_v47  ;;  %v2664_v27 = vor.u32 1.1754944e-38, %v2663_v43 }
 0x295   : > { %v2340_v25 = vmul.f32 %v3245_v2, %v2339_v30  ;;  %v2645_v15 = vsel %vm2644_vm4, %v3241_v54, %v2641_v35  ;;  %v2656_v9 = vadd.f32 %v4995_v6, %v2655_v3  ;;  %vm2662_vm13 = vcmp.eq.f32.partialorder %v2661_v40, 8.507059e+37 }
 0x296   : > { %v2650_v32 = vsel %vm4999_vm0, %v2649_v52, %v2645_v15  ;;  %v2354_v42 = vsub.f32 1.0, %v2353_v19  ;;  %vm2357_vm12 = vweird.f32 %v4987_v21  ;;  %v2364_v20 = vor.u32 1.1754944e-38, %v2363_v28 }
 0x297   : > { %v2341_v45 = vadd.f32 %v3245_v2, %v2340_v25  ;;  %2742 = vst [vmem:[%s3682_s19 + $0x258] sm:$0xff] %v2650_v32  ;;  %v2660_v23 = vsel %vm2659_vm11, %v4995_v6, %v2656_v9  ;;  %vm2359_vm14 = vmor %vm2357_vm12, %vm2358_vm10  ;;  %vm2362_vm15 = vcmp.eq.f32.partialorder %v2361_v4, 8.507059e+37  ;;  %v2378_v12 = vand.u32 2147483648, %v1492_v13 }
 0x298   : > { %v2355_v37 = vmul.f32 %v3249_v47, %v2354_v42  ;;  %v2665_v24 = vsel %vm2662_vm13, %v2664_v27, %v2660_v23  ;;  %v2376_v39 = vand.u32 2147483647, %v1492_v13  ;;  %vm2372_vm1 = vweird.f32 %v1492_v13 }
 0x299   : > { %v2345_v58 = vsel %vm2344_vm9, %v3245_v2, %v2341_v45  ;;  %2743 = vst [vmem:[%s3682_s19 + $0x260] sm:$0xff] %v2665_v24  ;;  %v2379_v50 = vor.u32 1.1754944e-38, %v2378_v12 }
 0x29a   : > { %v2350_v17 = vsel %vm2347_vm7, %v2349_v46, %v2345_v58  ;;  %v2356_v48 = vadd.f32 %v3249_v47, %v2355_v37  ;;  %v3251_v16 = vpop.eup %3250  ;;  %vm2377_vm3 = vcmp.eq.f32.partialorder %v2376_v39, 8.507059e+37 }
 0x29b   : > { %2722 = vst [vmem:[%s3682_s19 + $0x1b8] sm:$0xff] %v2350_v17  ;;  %v2368_v18 = vmul.f32 %v3251_v16, %v1492_v13  ;;  %vm2373_vm0 = vweird.f32 %v3251_v16 }
 0x29c   : > { %v2360_v5 = vsel %vm2359_vm14, %v3249_v47, %v2356_v48  ;;  %vm2374_vm2 = vmor %vm2372_vm1, %vm2373_vm0 }
 0x29d   : > { %v2365_v41 = vsel %vm2362_vm15, %v2364_v20, %v2360_v5  ;;  %v2369_v14 = vsub.f32 1.0, %v2368_v18 }
 0x29e   : > { %2723 = vst [vmem:[%s3682_s19 + $0x1c0] sm:$0xff] %v2365_v41 }
 0x29f   : > { %v2370_v31 = vmul.f32 %v3251_v16, %v2369_v14 }
 0x2a1   : > { %v2371_v36 = vadd.f32 %v3251_v16, %v2370_v31 }
 0x2a3   : > { %v2375_v54 = vsel %vm2374_vm2, %v3251_v16, %v2371_v36 }
 0x2a4   : > { %v2380_v53 = vsel %vm2377_vm3, %v2379_v50, %v2375_v54 }
 0x2a5   : > { %2724 = vst [vmem:[%s3682_s19 + $0x1c8] sm:$0xff] %v2380_v53 }
 0x2a6 PF: > { %s13_s12 = sadd.s32 1, %s3262_s12  }
 0x2a7   : > { %p10_p4 = scmp.ge.s32.totalorder %s13_s12, 12  }
 0x2a9   :  { %12 = sbr.rel (!%p10_p4) target bundleno = 1 (0x1), region = 62 }

</bundles_post_ra>
